<compile_context>
chip_gen: v7x
topology: tpu7x:2x2x1
jax: 0.10.0
libtpu: 0.0.40
codegen_flags: <defaults>
</compile_context>

<pallas_src>
import functools

import jax
import jax.numpy as jnp
from jax.experimental import pallas as pl
from jax.experimental.pallas import tpu as pltpu

LEAKY_RATE = 0.1
BN_EPS = 1e-5


def _leaky_relu(x):
    return jnp.where(x >= 0, x, LEAKY_RATE * x)


def _round_up(x, m):
    return ((x + m - 1) // m) * m


def _sceneflow_kernel(n_points, nsample, clamp_lo, clamp_hi,
                      xyz_ref, pts_ref,
                      wx1_ref, wp1_ref, b1_ref,
                      wx2_ref, wp2_ref, b2_ref,
                      wm1_ref, bm1_ref, wm2_ref, bm2_ref,
                      wf_ref, bf_ref,
                      feat_out_ref, flow_out_ref):
    N = n_points
    xyz = xyz_ref[...]            # [N, 3]
    pts = pts_ref[...]            # [N, C0]  (feats ++ cost ++ flow)

    # ---- brute-force kNN (self included) ----------------------------------
    # Squared pairwise distances; dot_general((1,),(1,)) avoids materializing xyz.T.
    sq = jnp.sum(xyz * xyz, axis=-1, keepdims=True)                      # [N, 1]
    gram = jax.lax.dot_general(xyz, xyz, (((1,), (1,)), ((), ())),
                               preferred_element_type=jnp.float32)       # [N, N]
    d2 = jnp.maximum(sq + sq.T - 2.0 * gram, 0.0)                        # [N, N], >= 0

    # Composite key: distance (high mantissa bits) | column index (low bits).
    # Non-negative f32 bit patterns are order-preserving, so one float min-reduce
    # per neighbor gives the (distance, lowest-index) lexicographic argmin.
    bits = max((N - 1).bit_length(), 1)
    high_mask = jnp.int32(~((1 << bits) - 1))
    col = jax.lax.broadcasted_iota(jnp.int32, (N, N), 1)
    key = pltpu.bitcast((pltpu.bitcast(d2, jnp.int32) & high_mask) | col,
                        jnp.float32)
    inf = jnp.float32(jnp.inf)

    onehots = []
    for _ in range(nsample):
        mn = jnp.min(key, axis=1, keepdims=True)      # single XLU reduce / neighbor
        sel = key == mn                               # exactly one hit per row
        onehots.append(sel.astype(jnp.float32))
        key = jnp.where(sel, inf, key)
    # Stacked one-hot gather matrix, bf16 (exact for 0/1 values): [nsample*N, N]
    oh_stack = jnp.concatenate(onehots, axis=0).astype(jnp.bfloat16)

    # ---- PointConv2 (restructured: gather once in Cout space) -------------
    def pointconv(pts_in, wx_ref, wp_ref, b_ref):
        px = jnp.dot(xyz, wx_ref[...], preferred_element_type=jnp.float32)      # [N, Cout]
        q = px + jnp.dot(pts_in, wp_ref[...], preferred_element_type=jnp.float32)
        c = b_ref[...] - px                                                      # [N, Cout]
        # One big bf16 gather matmul instead of 4 matmuls per neighbor.
        h = jnp.dot(oh_stack, q.astype(jnp.bfloat16),
                    preferred_element_type=jnp.float32)                          # [K*N, Cout]
        g = h[0:N]
        for k in range(1, nsample):
            g = jnp.maximum(g, h[k * N:(k + 1) * N])
        # max_k leaky(h_k + c) == leaky(max_k h_k + c)  (leaky is monotone).
        return _leaky_relu(g + c)

    x = pointconv(pts, wx1_ref, wp1_ref, b1_ref)
    x = pointconv(x, wx2_ref, wp2_ref, b2_ref)

    # ---- MLP Conv1d(k=1, bn=False) + LeakyReLU -----------------------------
    def conv1d(x_in, w_ref, b_ref):
        return _leaky_relu(jnp.dot(x_in, w_ref[...],
                                   preferred_element_type=jnp.float32) + b_ref[...])

    x = conv1d(x, wm1_ref, bm1_ref)
    x = conv1d(x, wm2_ref, bm2_ref)       # wm2/bm2 zero-padded to 128 output lanes
    feat_out_ref[...] = x                 # lane-dense [N, 128] store

    # fc (weights zero-padded to 128 lanes) + clamp; extra lanes sliced off in wrapper.
    fl = jnp.dot(x, wf_ref[...], preferred_element_type=jnp.float32) + bf_ref[...]
    flow_out_ref[...] = jnp.clip(fl, clamp_lo, clamp_hi)


def init_params(key, feat_ch, cost_ch, flow_ch, channels, mlp):
    """Deterministic synthetic parameters; BN (eval mode) folded into the 1x1 convs."""
    params = {}
    last = feat_ch + cost_ch + flow_ch
    pcs = []
    for ch_out in channels:
        in_ch = last + 3
        key, k1, k2, k3, k4, k5, k6 = jax.random.split(key, 7)
        W = 0.1 * jax.random.normal(k1, (ch_out, in_ch), jnp.float32)
        b = 0.1 * jax.random.normal(k2, (ch_out,), jnp.float32)
        gamma = 1.0 + 0.1 * jax.random.normal(k3, (ch_out,), jnp.float32)
        beta = 0.1 * jax.random.normal(k4, (ch_out,), jnp.float32)
        rmean = 0.1 * jax.random.normal(k5, (ch_out,), jnp.float32)
        rvar = 1.0 + 0.1 * jax.random.uniform(k6, (ch_out,), jnp.float32)
        scale = gamma / jnp.sqrt(rvar + BN_EPS)
        Wf = W * scale[:, None]
        bf = b * scale + (beta - rmean * scale)
        pcs.append((Wf[:, :3].T, Wf[:, 3:].T, bf.reshape(1, ch_out)))
        last = ch_out
    mls = []
    for ch_out in mlp:
        key, k1, k2 = jax.random.split(key, 3)
        W = 0.1 * jax.random.normal(k1, (ch_out, last), jnp.float32)
        b = 0.1 * jax.random.normal(k2, (ch_out,), jnp.float32)
        mls.append((W.T, b.reshape(1, ch_out)))
        last = ch_out
    key, k1, k2 = jax.random.split(key, 3)
    Wfc = 0.1 * jax.random.normal(k1, (3, last), jnp.float32)
    bfc = 0.1 * jax.random.normal(k2, (3,), jnp.float32)
    params["pointconv"] = pcs
    params["mlp"] = mls
    params["fc"] = (Wfc.T, bfc.reshape(1, 3))
    return params


def scene_flow_estimator_pointconv(xyz, feats, cost_volume, flow, params,
                                   neighbors=8, clamp=(-20.0, 20.0)):
    """xyz: [B,3,N]; feats: [B,C1,N]; cost_volume: [B,C2,N]; flow: [B,3,N] or None.
    Returns (new_points [B, mlp[-1], N], flow [B, 3, N])."""
    B, _, N = xyz.shape
    if flow is None:
        pts = jnp.concatenate([feats, cost_volume], axis=1)
    else:
        pts = jnp.concatenate([feats, cost_volume, flow], axis=1)
    xyz_t = jnp.transpose(xyz, (0, 2, 1)).astype(jnp.float32)   # [B, N, 3]
    pts_t = jnp.transpose(pts, (0, 2, 1)).astype(jnp.float32)   # [B, N, C0]

    (wx1, wp1, b1), (wx2, wp2, b2) = params["pointconv"]
    (wm1, bm1), (wm2, bm2) = params["mlp"]
    wfc, bfc = params["fc"]
    out_ch = wm2.shape[1]

    # Zero-pad the final layers to lane-dense (multiple of 128) output widths so the
    # kernel emits full-lane stores / wide output DMAs; extra lanes are sliced off below.
    # TODO(synk): if N is scaled up (>~1-2K points) the [N,N] kNN buffers need tiling
    # to fit v7x's 64 MiB VMEM.
    feat_slab = _round_up(out_ch, 128)
    flow_slab = _round_up(3, 128)
    wm2_p = jnp.zeros((wm2.shape[0], feat_slab), jnp.float32).at[:, :out_ch].set(wm2)
    bm2_p = jnp.zeros((1, feat_slab), jnp.float32).at[:, :out_ch].set(bm2)
    wfc_p = jnp.zeros((feat_slab, flow_slab), jnp.float32).at[:out_ch, :3].set(wfc)
    bfc_p = jnp.zeros((1, flow_slab), jnp.float32).at[:, :3].set(bfc)

    weights = [wx1, wp1, b1, wx2, wp2, b2, wm1, bm1, wm2_p, bm2_p, wfc_p, bfc_p]

    def batch_spec(shape):
        return pl.BlockSpec((None,) + tuple(shape[1:]), lambda b: (b, 0, 0))

    def rep_spec(shape):
        nd = len(shape)
        return pl.BlockSpec(tuple(shape), lambda b, _nd=nd: (0,) * _nd)

    kernel = functools.partial(_sceneflow_kernel, N, neighbors,
                               float(clamp[0]), float(clamp[1]))

    feat_o, flow_o = pl.pallas_call(
        kernel,
        out_shape=(jax.ShapeDtypeStruct((B, N, feat_slab), jnp.float32),
                   jax.ShapeDtypeStruct((B, N, flow_slab), jnp.float32)),
        grid_spec=pltpu.PrefetchScalarGridSpec(
            num_scalar_prefetch=0,
            grid=(B,),
            in_specs=[batch_spec(xyz_t.shape), batch_spec(pts_t.shape)]
                     + [rep_spec(w.shape) for w in weights],
            out_specs=[pl.BlockSpec((None, N, feat_slab), lambda b: (b, 0, 0)),
                       pl.BlockSpec((None, N, flow_slab), lambda b: (b, 0, 0))],
        ),
        compiler_params=pltpu.CompilerParams(dimension_semantics=("parallel",)),
    )(xyz_t, pts_t, *weights)

    feat_o = feat_o[:, :, :out_ch]
    flow_o = flow_o[:, :, :3]
    return (jnp.transpose(feat_o, (0, 2, 1)), jnp.transpose(flow_o, (0, 2, 1)))


if __name__ == "__main__":
    B, N = 2, 128
    feat_ch, cost_ch, flow_ch = 16, 16, 3
    channels, mlp, neighbors = [32, 32], [32, 16], 8

    key = jax.random.PRNGKey(0)
    kx, kf, kc, kfl, kp = jax.random.split(key, 5)
    xyz = jax.random.normal(kx, (B, 3, N), jnp.float32)
    feats = jax.random.normal(kf, (B, feat_ch, N), jnp.float32)
    cost = jax.random.normal(kc, (B, cost_ch, N), jnp.float32)
    flow = jax.random.normal(kfl, (B, flow_ch, N), jnp.float32)

    params = init_params(kp, feat_ch, cost_ch, flow_ch, channels, mlp)

    new_points, out_flow = scene_flow_estimator_pointconv(
        xyz, feats, cost, flow, params, neighbors=neighbors, clamp=(-20.0, 20.0))
    jax.block_until_ready((new_points, out_flow))

    assert new_points.shape == (B, mlp[-1], N)
    assert out_flow.shape == (B, 3, N)
    print("KERNEL_OK")
</pallas_src>

<mosaic_0001>
module attributes {stable_mosaic.version = 11 : i64} {
  func.func @_sceneflow_kernel(%arg0: i32, %arg1: memref<1x128x3xf32, #tpu.memory_space<vmem>>, %arg2: memref<1x128x35xf32, #tpu.memory_space<vmem>>, %arg3: memref<3x32xf32, #tpu.memory_space<vmem>>, %arg4: memref<35x32xf32, #tpu.memory_space<vmem>>, %arg5: memref<1x32xf32, #tpu.memory_space<vmem>>, %arg6: memref<3x32xf32, #tpu.memory_space<vmem>>, %arg7: memref<32x32xf32, #tpu.memory_space<vmem>>, %arg8: memref<1x32xf32, #tpu.memory_space<vmem>>, %arg9: memref<32x32xf32, #tpu.memory_space<vmem>>, %arg10: memref<1x32xf32, #tpu.memory_space<vmem>>, %arg11: memref<32x128xf32, #tpu.memory_space<vmem>>, %arg12: memref<1x128xf32, #tpu.memory_space<vmem>>, %arg13: memref<128x128xf32, #tpu.memory_space<vmem>>, %arg14: memref<1x128xf32, #tpu.memory_space<vmem>>, %arg15: memref<1x128x128xf32, #tpu.memory_space<vmem>>, %arg16: memref<1x128x128xf32, #tpu.memory_space<vmem>>) attributes {dimension_semantics = [#tpu.dimension_semantics<parallel>], iteration_bounds = array<i64: 2>, scalar_prefetch = 0 : i64, scratch_operands = 0 : i64, tpu.core_type = #tpu.core_type<tc>, window_params = [{transform_indices = @transform_0, window_bounds = array<i64: 1, 128, 3>}, {transform_indices = @transform_1, window_bounds = array<i64: 1, 128, 35>}, {pipeline_mode = #tpu.pipeline_mode<synchronous>, transform_indices = @transform_2, window_bounds = array<i64: 3, 32>}, {pipeline_mode = #tpu.pipeline_mode<synchronous>, transform_indices = @transform_3, window_bounds = array<i64: 35, 32>}, {pipeline_mode = #tpu.pipeline_mode<synchronous>, transform_indices = @transform_4, window_bounds = array<i64: 1, 32>}, {pipeline_mode = #tpu.pipeline_mode<synchronous>, transform_indices = @transform_5, window_bounds = array<i64: 3, 32>}, {pipeline_mode = #tpu.pipeline_mode<synchronous>, transform_indices = @transform_6, window_bounds = array<i64: 32, 32>}, {pipeline_mode = #tpu.pipeline_mode<synchronous>, transform_indices = @transform_7, window_bounds = array<i64: 1, 32>}, {pipeline_mode = #tpu.pipeline_mode<synchronous>, transform_indices = @transform_8, window_bounds = array<i64: 32, 32>}, {pipeline_mode = #tpu.pipeline_mode<synchronous>, transform_indices = @transform_9, window_bounds = array<i64: 1, 32>}, {pipeline_mode = #tpu.pipeline_mode<synchronous>, transform_indices = @transform_10, window_bounds = array<i64: 32, 128>}, {pipeline_mode = #tpu.pipeline_mode<synchronous>, transform_indices = @transform_11, window_bounds = array<i64: 1, 128>}, {pipeline_mode = #tpu.pipeline_mode<synchronous>, transform_indices = @transform_12, window_bounds = array<i64: 128, 128>}, {pipeline_mode = #tpu.pipeline_mode<synchronous>, transform_indices = @transform_13, window_bounds = array<i64: 1, 128>}, {transform_indices = @transform_14, window_bounds = array<i64: 1, 128, 128>}, {transform_indices = @transform_15, window_bounds = array<i64: 1, 128, 128>}]} {
    %c0 = arith.constant 0 : index
    %c0_0 = arith.constant 0 : index
    %c0_1 = arith.constant 0 : index
    %0 = vector.load %arg1[%c0, %c0_0, %c0_1] : memref<1x128x3xf32, #tpu.memory_space<vmem>>, vector<1x128x3xf32>
    %1 = vector.shape_cast %0 : vector<1x128x3xf32> to vector<128x3xf32>
    %c0_2 = arith.constant 0 : index
    %c0_3 = arith.constant 0 : index
    %c0_4 = arith.constant 0 : index
    %2 = vector.load %arg2[%c0_2, %c0_3, %c0_4] : memref<1x128x35xf32, #tpu.memory_space<vmem>>, vector<1x128x35xf32>
    %3 = vector.shape_cast %2 : vector<1x128x35xf32> to vector<128x35xf32>
    %4 = arith.mulf %1, %1 : vector<128x3xf32>
    %cst = arith.constant dense<0.000000e+00> : vector<128xf32>
    %5 = vector.multi_reduction <add>, %4, %cst [1] : vector<128x3xf32> to vector<128xf32>
    %6 = vector.shape_cast %5 : vector<128xf32> to vector<128x1xf32>
    %cst_5 = arith.constant dense<0.000000e+00> : vector<128x128xf32>
    %7 = tpu.matmul %1, %1, %cst_5 {dimension_numbers = #tpu.dot_dimension_numbers<[1], [1], [0], [0], [0, 0, 1, 0], [], []>} : vector<128x3xf32>, vector<128x3xf32>, vector<128x128xf32> -> vector<128x128xf32>
    %8 = tpu.transpose %6, [1, 0] : vector<128x1xf32> -> vector<1x128xf32>
    %9 = vector.broadcast %6 : vector<128x1xf32> to vector<128x128xf32>
    %10 = vector.broadcast %8 : vector<1x128xf32> to vector<128x128xf32>
    %11 = arith.addf %9, %10 : vector<128x128xf32>
    %cst_6 = arith.constant 2.000000e+00 : f32
    %12 = vector.broadcast %cst_6 : f32 to vector<128x128xf32>
    %13 = arith.mulf %12, %7 : vector<128x128xf32>
    %14 = arith.subf %11, %13 : vector<128x128xf32>
    %cst_7 = arith.constant 0.000000e+00 : f32
    %15 = vector.broadcast %cst_7 : f32 to vector<128x128xf32>
    %16 = arith.maximumf %14, %15 : vector<128x128xf32>
    %17 = tpu.iota {dimensions = array<i32: 1>} : vector<128x128xi32>
    %18 = tpu.bitcast %16 : vector<128x128xf32> -> vector<128x128xi32>
    %c-128_i32 = arith.constant -128 : i32
    %19 = vector.broadcast %c-128_i32 : i32 to vector<128x128xi32>
    %20 = arith.andi %18, %19 : vector<128x128xi32>
    %21 = arith.ori %20, %17 : vector<128x128xi32>
    %22 = tpu.bitcast %21 : vector<128x128xi32> -> vector<128x128xf32>
    %cst_8 = arith.constant dense<0x7F800000> : vector<128xf32>
    %23 = vector.multi_reduction <minimumf>, %22, %cst_8 [1] : vector<128x128xf32> to vector<128xf32>
    %24 = vector.shape_cast %23 : vector<128xf32> to vector<128x1xf32>
    %25 = vector.broadcast %24 : vector<128x1xf32> to vector<128x128xf32>
    %26 = arith.cmpf oeq, %22, %25 : vector<128x128xf32>
    %27 = arith.extui %26 : vector<128x128xi1> to vector<128x128xi32>
    %28 = arith.sitofp %27 : vector<128x128xi32> to vector<128x128xf32>
    %cst_9 = arith.constant 0x7F800000 : f32
    %29 = vector.broadcast %cst_9 : f32 to vector<128x128xf32>
    %30 = arith.select %26, %29, %22 : vector<128x128xi1>, vector<128x128xf32>
    %cst_10 = arith.constant dense<0x7F800000> : vector<128xf32>
    %31 = vector.multi_reduction <minimumf>, %30, %cst_10 [1] : vector<128x128xf32> to vector<128xf32>
    %32 = vector.shape_cast %31 : vector<128xf32> to vector<128x1xf32>
    %33 = vector.broadcast %32 : vector<128x1xf32> to vector<128x128xf32>
    %34 = arith.cmpf oeq, %30, %33 : vector<128x128xf32>
    %35 = arith.extui %34 : vector<128x128xi1> to vector<128x128xi32>
    %36 = arith.sitofp %35 : vector<128x128xi32> to vector<128x128xf32>
    %cst_11 = arith.constant 0x7F800000 : f32
    %37 = vector.broadcast %cst_11 : f32 to vector<128x128xf32>
    %38 = arith.select %34, %37, %30 : vector<128x128xi1>, vector<128x128xf32>
    %cst_12 = arith.constant dense<0x7F800000> : vector<128xf32>
    %39 = vector.multi_reduction <minimumf>, %38, %cst_12 [1] : vector<128x128xf32> to vector<128xf32>
    %40 = vector.shape_cast %39 : vector<128xf32> to vector<128x1xf32>
    %41 = vector.broadcast %40 : vector<128x1xf32> to vector<128x128xf32>
    %42 = arith.cmpf oeq, %38, %41 : vector<128x128xf32>
    %43 = arith.extui %42 : vector<128x128xi1> to vector<128x128xi32>
    %44 = arith.sitofp %43 : vector<128x128xi32> to vector<128x128xf32>
    %cst_13 = arith.constant 0x7F800000 : f32
    %45 = vector.broadcast %cst_13 : f32 to vector<128x128xf32>
    %46 = arith.select %42, %45, %38 : vector<128x128xi1>, vector<128x128xf32>
    %cst_14 = arith.constant dense<0x7F800000> : vector<128xf32>
    %47 = vector.multi_reduction <minimumf>, %46, %cst_14 [1] : vector<128x128xf32> to vector<128xf32>
    %48 = vector.shape_cast %47 : vector<128xf32> to vector<128x1xf32>
    %49 = vector.broadcast %48 : vector<128x1xf32> to vector<128x128xf32>
    %50 = arith.cmpf oeq, %46, %49 : vector<128x128xf32>
    %51 = arith.extui %50 : vector<128x128xi1> to vector<128x128xi32>
    %52 = arith.sitofp %51 : vector<128x128xi32> to vector<128x128xf32>
    %cst_15 = arith.constant 0x7F800000 : f32
    %53 = vector.broadcast %cst_15 : f32 to vector<128x128xf32>
    %54 = arith.select %50, %53, %46 : vector<128x128xi1>, vector<128x128xf32>
    %cst_16 = arith.constant dense<0x7F800000> : vector<128xf32>
    %55 = vector.multi_reduction <minimumf>, %54, %cst_16 [1] : vector<128x128xf32> to vector<128xf32>
    %56 = vector.shape_cast %55 : vector<128xf32> to vector<128x1xf32>
    %57 = vector.broadcast %56 : vector<128x1xf32> to vector<128x128xf32>
    %58 = arith.cmpf oeq, %54, %57 : vector<128x128xf32>
    %59 = arith.extui %58 : vector<128x128xi1> to vector<128x128xi32>
    %60 = arith.sitofp %59 : vector<128x128xi32> to vector<128x128xf32>
    %cst_17 = arith.constant 0x7F800000 : f32
    %61 = vector.broadcast %cst_17 : f32 to vector<128x128xf32>
    %62 = arith.select %58, %61, %54 : vector<128x128xi1>, vector<128x128xf32>
    %cst_18 = arith.constant dense<0x7F800000> : vector<128xf32>
    %63 = vector.multi_reduction <minimumf>, %62, %cst_18 [1] : vector<128x128xf32> to vector<128xf32>
    %64 = vector.shape_cast %63 : vector<128xf32> to vector<128x1xf32>
    %65 = vector.broadcast %64 : vector<128x1xf32> to vector<128x128xf32>
    %66 = arith.cmpf oeq, %62, %65 : vector<128x128xf32>
    %67 = arith.extui %66 : vector<128x128xi1> to vector<128x128xi32>
    %68 = arith.sitofp %67 : vector<128x128xi32> to vector<128x128xf32>
    %cst_19 = arith.constant 0x7F800000 : f32
    %69 = vector.broadcast %cst_19 : f32 to vector<128x128xf32>
    %70 = arith.select %66, %69, %62 : vector<128x128xi1>, vector<128x128xf32>
    %cst_20 = arith.constant dense<0x7F800000> : vector<128xf32>
    %71 = vector.multi_reduction <minimumf>, %70, %cst_20 [1] : vector<128x128xf32> to vector<128xf32>
    %72 = vector.shape_cast %71 : vector<128xf32> to vector<128x1xf32>
    %73 = vector.broadcast %72 : vector<128x1xf32> to vector<128x128xf32>
    %74 = arith.cmpf oeq, %70, %73 : vector<128x128xf32>
    %75 = arith.extui %74 : vector<128x128xi1> to vector<128x128xi32>
    %76 = arith.sitofp %75 : vector<128x128xi32> to vector<128x128xf32>
    %cst_21 = arith.constant 0x7F800000 : f32
    %77 = vector.broadcast %cst_21 : f32 to vector<128x128xf32>
    %78 = arith.select %74, %77, %70 : vector<128x128xi1>, vector<128x128xf32>
    %cst_22 = arith.constant dense<0x7F800000> : vector<128xf32>
    %79 = vector.multi_reduction <minimumf>, %78, %cst_22 [1] : vector<128x128xf32> to vector<128xf32>
    %80 = vector.shape_cast %79 : vector<128xf32> to vector<128x1xf32>
    %81 = vector.broadcast %80 : vector<128x1xf32> to vector<128x128xf32>
    %82 = arith.cmpf oeq, %78, %81 : vector<128x128xf32>
    %83 = arith.extui %82 : vector<128x128xi1> to vector<128x128xi32>
    %84 = arith.sitofp %83 : vector<128x128xi32> to vector<128x128xf32>
    %85 = tpu.concatenate %28, %36, %44, %52, %60, %68, %76, %84 in 0 : vector<128x128xf32>, vector<128x128xf32>, vector<128x128xf32>, vector<128x128xf32>, vector<128x128xf32>, vector<128x128xf32>, vector<128x128xf32>, vector<128x128xf32> -> vector<1024x128xf32>
    %86 = arith.truncf %85 : vector<1024x128xf32> to vector<1024x128xbf16>
    %c0_23 = arith.constant 0 : index
    %c0_24 = arith.constant 0 : index
    %87 = vector.load %arg3[%c0_23, %c0_24] : memref<3x32xf32, #tpu.memory_space<vmem>>, vector<3x32xf32>
    %cst_25 = arith.constant dense<0.000000e+00> : vector<128x32xf32>
    %88 = tpu.matmul %1, %87, %cst_25 {dimension_numbers = #tpu.dot_dimension_numbers<[1], [0], [0], [1], [0, 0, 1, 1], [], []>} : vector<128x3xf32>, vector<3x32xf32>, vector<128x32xf32> -> vector<128x32xf32>
    %c0_26 = arith.constant 0 : index
    %c0_27 = arith.constant 0 : index
    %89 = vector.load %arg4[%c0_26, %c0_27] : memref<35x32xf32, #tpu.memory_space<vmem>>, vector<35x32xf32>
    %cst_28 = arith.constant dense<0.000000e+00> : vector<128x32xf32>
    %90 = tpu.matmul %3, %89, %cst_28 {dimension_numbers = #tpu.dot_dimension_numbers<[1], [0], [0], [1], [0, 0, 1, 1], [], []>} : vector<128x35xf32>, vector<35x32xf32>, vector<128x32xf32> -> vector<128x32xf32>
    %91 = arith.addf %88, %90 : vector<128x32xf32>
    %c0_29 = arith.constant 0 : index
    %c0_30 = arith.constant 0 : index
    %92 = vector.load %arg5[%c0_29, %c0_30] : memref<1x32xf32, #tpu.memory_space<vmem>>, vector<1x32xf32>
    %93 = vector.broadcast %92 : vector<1x32xf32> to vector<128x32xf32>
    %94 = arith.subf %93, %88 : vector<128x32xf32>
    %95 = arith.truncf %91 : vector<128x32xf32> to vector<128x32xbf16>
    %cst_31 = arith.constant dense<0.000000e+00> : vector<1024x32xf32>
    %96 = tpu.matmul %86, %95, %cst_31 {dimension_numbers = #tpu.dot_dimension_numbers<[1], [0], [0], [1], [0, 0, 1, 1], [], []>} : vector<1024x128xbf16>, vector<128x32xbf16>, vector<1024x32xf32> -> vector<1024x32xf32>
    %97 = vector.extract_strided_slice %96 {offsets = [0, 0], sizes = [128, 32], strides = [1, 1]} : vector<1024x32xf32> to vector<128x32xf32>
    %98 = vector.extract_strided_slice %96 {offsets = [128, 0], sizes = [128, 32], strides = [1, 1]} : vector<1024x32xf32> to vector<128x32xf32>
    %99 = arith.maximumf %97, %98 : vector<128x32xf32>
    %100 = vector.extract_strided_slice %96 {offsets = [256, 0], sizes = [128, 32], strides = [1, 1]} : vector<1024x32xf32> to vector<128x32xf32>
    %101 = arith.maximumf %99, %100 : vector<128x32xf32>
    %102 = vector.extract_strided_slice %96 {offsets = [384, 0], sizes = [128, 32], strides = [1, 1]} : vector<1024x32xf32> to vector<128x32xf32>
    %103 = arith.maximumf %101, %102 : vector<128x32xf32>
    %104 = vector.extract_strided_slice %96 {offsets = [512, 0], sizes = [128, 32], strides = [1, 1]} : vector<1024x32xf32> to vector<128x32xf32>
    %105 = arith.maximumf %103, %104 : vector<128x32xf32>
    %106 = vector.extract_strided_slice %96 {offsets = [640, 0], sizes = [128, 32], strides = [1, 1]} : vector<1024x32xf32> to vector<128x32xf32>
    %107 = arith.maximumf %105, %106 : vector<128x32xf32>
    %108 = vector.extract_strided_slice %96 {offsets = [768, 0], sizes = [128, 32], strides = [1, 1]} : vector<1024x32xf32> to vector<128x32xf32>
    %109 = arith.maximumf %107, %108 : vector<128x32xf32>
    %110 = vector.extract_strided_slice %96 {offsets = [896, 0], sizes = [128, 32], strides = [1, 1]} : vector<1024x32xf32> to vector<128x32xf32>
    %111 = arith.maximumf %109, %110 : vector<128x32xf32>
    %112 = arith.addf %111, %94 : vector<128x32xf32>
    %cst_32 = arith.constant 0.000000e+00 : f32
    %113 = vector.broadcast %cst_32 : f32 to vector<128x32xf32>
    %114 = arith.cmpf oge, %112, %113 : vector<128x32xf32>
    %cst_33 = arith.constant 1.000000e-01 : f32
    %115 = vector.broadcast %cst_33 : f32 to vector<128x32xf32>
    %116 = arith.mulf %115, %112 : vector<128x32xf32>
    %117 = arith.select %114, %112, %116 : vector<128x32xi1>, vector<128x32xf32>
    %c0_34 = arith.constant 0 : index
    %c0_35 = arith.constant 0 : index
    %118 = vector.load %arg6[%c0_34, %c0_35] : memref<3x32xf32, #tpu.memory_space<vmem>>, vector<3x32xf32>
    %cst_36 = arith.constant dense<0.000000e+00> : vector<128x32xf32>
    %119 = tpu.matmul %1, %118, %cst_36 {dimension_numbers = #tpu.dot_dimension_numbers<[1], [0], [0], [1], [0, 0, 1, 1], [], []>} : vector<128x3xf32>, vector<3x32xf32>, vector<128x32xf32> -> vector<128x32xf32>
    %c0_37 = arith.constant 0 : index
    %c0_38 = arith.constant 0 : index
    %120 = vector.load %arg7[%c0_37, %c0_38] : memref<32x32xf32, #tpu.memory_space<vmem>>, vector<32x32xf32>
    %cst_39 = arith.constant dense<0.000000e+00> : vector<128x32xf32>
    %121 = tpu.matmul %117, %120, %cst_39 {dimension_numbers = #tpu.dot_dimension_numbers<[1], [0], [0], [1], [0, 0, 1, 1], [], []>} : vector<128x32xf32>, vector<32x32xf32>, vector<128x32xf32> -> vector<128x32xf32>
    %122 = arith.addf %119, %121 : vector<128x32xf32>
    %c0_40 = arith.constant 0 : index
    %c0_41 = arith.constant 0 : index
    %123 = vector.load %arg8[%c0_40, %c0_41] : memref<1x32xf32, #tpu.memory_space<vmem>>, vector<1x32xf32>
    %124 = vector.broadcast %123 : vector<1x32xf32> to vector<128x32xf32>
    %125 = arith.subf %124, %119 : vector<128x32xf32>
    %126 = arith.truncf %122 : vector<128x32xf32> to vector<128x32xbf16>
    %cst_42 = arith.constant dense<0.000000e+00> : vector<1024x32xf32>
    %127 = tpu.matmul %86, %126, %cst_42 {dimension_numbers = #tpu.dot_dimension_numbers<[1], [0], [0], [1], [0, 0, 1, 1], [], []>} : vector<1024x128xbf16>, vector<128x32xbf16>, vector<1024x32xf32> -> vector<1024x32xf32>
    %128 = vector.extract_strided_slice %127 {offsets = [0, 0], sizes = [128, 32], strides = [1, 1]} : vector<1024x32xf32> to vector<128x32xf32>
    %129 = vector.extract_strided_slice %127 {offsets = [128, 0], sizes = [128, 32], strides = [1, 1]} : vector<1024x32xf32> to vector<128x32xf32>
    %130 = arith.maximumf %128, %129 : vector<128x32xf32>
    %131 = vector.extract_strided_slice %127 {offsets = [256, 0], sizes = [128, 32], strides = [1, 1]} : vector<1024x32xf32> to vector<128x32xf32>
    %132 = arith.maximumf %130, %131 : vector<128x32xf32>
    %133 = vector.extract_strided_slice %127 {offsets = [384, 0], sizes = [128, 32], strides = [1, 1]} : vector<1024x32xf32> to vector<128x32xf32>
    %134 = arith.maximumf %132, %133 : vector<128x32xf32>
    %135 = vector.extract_strided_slice %127 {offsets = [512, 0], sizes = [128, 32], strides = [1, 1]} : vector<1024x32xf32> to vector<128x32xf32>
    %136 = arith.maximumf %134, %135 : vector<128x32xf32>
    %137 = vector.extract_strided_slice %127 {offsets = [640, 0], sizes = [128, 32], strides = [1, 1]} : vector<1024x32xf32> to vector<128x32xf32>
    %138 = arith.maximumf %136, %137 : vector<128x32xf32>
    %139 = vector.extract_strided_slice %127 {offsets = [768, 0], sizes = [128, 32], strides = [1, 1]} : vector<1024x32xf32> to vector<128x32xf32>
    %140 = arith.maximumf %138, %139 : vector<128x32xf32>
    %141 = vector.extract_strided_slice %127 {offsets = [896, 0], sizes = [128, 32], strides = [1, 1]} : vector<1024x32xf32> to vector<128x32xf32>
    %142 = arith.maximumf %140, %141 : vector<128x32xf32>
    %143 = arith.addf %142, %125 : vector<128x32xf32>
    %cst_43 = arith.constant 0.000000e+00 : f32
    %144 = vector.broadcast %cst_43 : f32 to vector<128x32xf32>
    %145 = arith.cmpf oge, %143, %144 : vector<128x32xf32>
    %cst_44 = arith.constant 1.000000e-01 : f32
    %146 = vector.broadcast %cst_44 : f32 to vector<128x32xf32>
    %147 = arith.mulf %146, %143 : vector<128x32xf32>
    %148 = arith.select %145, %143, %147 : vector<128x32xi1>, vector<128x32xf32>
    %c0_45 = arith.constant 0 : index
    %c0_46 = arith.constant 0 : index
    %149 = vector.load %arg9[%c0_45, %c0_46] : memref<32x32xf32, #tpu.memory_space<vmem>>, vector<32x32xf32>
    %cst_47 = arith.constant dense<0.000000e+00> : vector<128x32xf32>
    %150 = tpu.matmul %148, %149, %cst_47 {dimension_numbers = #tpu.dot_dimension_numbers<[1], [0], [0], [1], [0, 0, 1, 1], [], []>} : vector<128x32xf32>, vector<32x32xf32>, vector<128x32xf32> -> vector<128x32xf32>
    %c0_48 = arith.constant 0 : index
    %c0_49 = arith.constant 0 : index
    %151 = vector.load %arg10[%c0_48, %c0_49] : memref<1x32xf32, #tpu.memory_space<vmem>>, vector<1x32xf32>
    %152 = vector.broadcast %151 : vector<1x32xf32> to vector<128x32xf32>
    %153 = arith.addf %150, %152 : vector<128x32xf32>
    %cst_50 = arith.constant 0.000000e+00 : f32
    %154 = vector.broadcast %cst_50 : f32 to vector<128x32xf32>
    %155 = arith.cmpf oge, %153, %154 : vector<128x32xf32>
    %cst_51 = arith.constant 1.000000e-01 : f32
    %156 = vector.broadcast %cst_51 : f32 to vector<128x32xf32>
    %157 = arith.mulf %156, %153 : vector<128x32xf32>
    %158 = arith.select %155, %153, %157 : vector<128x32xi1>, vector<128x32xf32>
    %c0_52 = arith.constant 0 : index
    %c0_53 = arith.constant 0 : index
    %159 = vector.load %arg11[%c0_52, %c0_53] : memref<32x128xf32, #tpu.memory_space<vmem>>, vector<32x128xf32>
    %cst_54 = arith.constant dense<0.000000e+00> : vector<128x128xf32>
    %160 = tpu.matmul %158, %159, %cst_54 {dimension_numbers = #tpu.dot_dimension_numbers<[1], [0], [0], [1], [0, 0, 1, 1], [], []>} : vector<128x32xf32>, vector<32x128xf32>, vector<128x128xf32> -> vector<128x128xf32>
    %c0_55 = arith.constant 0 : index
    %c0_56 = arith.constant 0 : index
    %161 = vector.load %arg12[%c0_55, %c0_56] : memref<1x128xf32, #tpu.memory_space<vmem>>, vector<1x128xf32>
    %162 = vector.broadcast %161 : vector<1x128xf32> to vector<128x128xf32>
    %163 = arith.addf %160, %162 : vector<128x128xf32>
    %cst_57 = arith.constant 0.000000e+00 : f32
    %164 = vector.broadcast %cst_57 : f32 to vector<128x128xf32>
    %165 = arith.cmpf oge, %163, %164 : vector<128x128xf32>
    %cst_58 = arith.constant 1.000000e-01 : f32
    %166 = vector.broadcast %cst_58 : f32 to vector<128x128xf32>
    %167 = arith.mulf %166, %163 : vector<128x128xf32>
    %168 = arith.select %165, %163, %167 : vector<128x128xi1>, vector<128x128xf32>
    %c0_59 = arith.constant 0 : index
    %c0_60 = arith.constant 0 : index
    %c0_61 = arith.constant 0 : index
    %169 = vector.load %arg15[%c0_59, %c0_60, %c0_61] : memref<1x128x128xf32, #tpu.memory_space<vmem>>, vector<1x128x128xf32>
    %170 = vector.shape_cast %169 : vector<1x128x128xf32> to vector<128x128xf32>
    %171 = vector.shape_cast %168 : vector<128x128xf32> to vector<1x128x128xf32>
    tpu.vector_store %arg15[%c0_59, %c0_60, %c0_61], %171 {strides = array<i32>} : memref<1x128x128xf32, #tpu.memory_space<vmem>>, vector<1x128x128xf32>,
    %c0_62 = arith.constant 0 : index
    %c0_63 = arith.constant 0 : index
    %172 = vector.load %arg13[%c0_62, %c0_63] : memref<128x128xf32, #tpu.memory_space<vmem>>, vector<128x128xf32>
    %cst_64 = arith.constant dense<0.000000e+00> : vector<128x128xf32>
    %173 = tpu.matmul %168, %172, %cst_64 {dimension_numbers = #tpu.dot_dimension_numbers<[1], [0], [0], [1], [0, 0, 1, 1], [], []>} : vector<128x128xf32>, vector<128x128xf32>, vector<128x128xf32> -> vector<128x128xf32>
    %c0_65 = arith.constant 0 : index
    %c0_66 = arith.constant 0 : index
    %174 = vector.load %arg14[%c0_65, %c0_66] : memref<1x128xf32, #tpu.memory_space<vmem>>, vector<1x128xf32>
    %175 = vector.broadcast %174 : vector<1x128xf32> to vector<128x128xf32>
    %176 = arith.addf %173, %175 : vector<128x128xf32>
    %cst_67 = arith.constant -2.000000e+01 : f32
    %cst_68 = arith.constant 2.000000e+01 : f32
    %177 = vector.broadcast %cst_67 : f32 to vector<128x128xf32>
    %178 = arith.maximumf %177, %176 : vector<128x128xf32>
    %179 = vector.broadcast %cst_68 : f32 to vector<128x128xf32>
    %180 = arith.minimumf %179, %178 : vector<128x128xf32>
    %c0_69 = arith.constant 0 : index
    %c0_70 = arith.constant 0 : index
    %c0_71 = arith.constant 0 : index
    %181 = vector.load %arg16[%c0_69, %c0_70, %c0_71] : memref<1x128x128xf32, #tpu.memory_space<vmem>>, vector<1x128x128xf32>
    %182 = vector.shape_cast %181 : vector<1x128x128xf32> to vector<128x128xf32>
    %183 = vector.shape_cast %180 : vector<128x128xf32> to vector<1x128x128xf32>
    tpu.vector_store %arg16[%c0_69, %c0_70, %c0_71], %183 {strides = array<i32>} : memref<1x128x128xf32, #tpu.memory_space<vmem>>, vector<1x128x128xf32>,
    return
  }
  func.func @transform_0(%arg0: i32) -> (i32, i32, i32) {
    %c0_i32 = arith.constant 0 : i32
    %c0_i32_0 = arith.constant 0 : i32
    %c0_i32_1 = arith.constant 0 : i32
    return %arg0, %c0_i32, %c0_i32_0 : i32, i32, i32
  }
  func.func @transform_1(%arg0: i32) -> (i32, i32, i32) {
    %c0_i32 = arith.constant 0 : i32
    %c0_i32_0 = arith.constant 0 : i32
    %c0_i32_1 = arith.constant 0 : i32
    return %arg0, %c0_i32, %c0_i32_0 : i32, i32, i32
  }
  func.func @transform_2(%arg0: i32) -> (i32, i32) {
    %c0_i32 = arith.constant 0 : i32
    %c0_i32_0 = arith.constant 0 : i32
    %c0_i32_1 = arith.constant 0 : i32
    return %c0_i32, %c0_i32_0 : i32, i32
  }
  func.func @transform_3(%arg0: i32) -> (i32, i32) {
    %c0_i32 = arith.constant 0 : i32
    %c0_i32_0 = arith.constant 0 : i32
    %c0_i32_1 = arith.constant 0 : i32
    return %c0_i32, %c0_i32_0 : i32, i32
  }
  func.func @transform_4(%arg0: i32) -> (i32, i32) {
    %c0_i32 = arith.constant 0 : i32
    %c0_i32_0 = arith.constant 0 : i32
    %c0_i32_1 = arith.constant 0 : i32
    return %c0_i32, %c0_i32_0 : i32, i32
  }
  func.func @transform_5(%arg0: i32) -> (i32, i32) {
    %c0_i32 = arith.constant 0 : i32
    %c0_i32_0 = arith.constant 0 : i32
    %c0_i32_1 = arith.constant 0 : i32
    return %c0_i32, %c0_i32_0 : i32, i32
  }
  func.func @transform_6(%arg0: i32) -> (i32, i32) {
    %c0_i32 = arith.constant 0 : i32
    %c0_i32_0 = arith.constant 0 : i32
    %c0_i32_1 = arith.constant 0 : i32
    return %c0_i32, %c0_i32_0 : i32, i32
  }
  func.func @transform_7(%arg0: i32) -> (i32, i32) {
    %c0_i32 = arith.constant 0 : i32
    %c0_i32_0 = arith.constant 0 : i32
    %c0_i32_1 = arith.constant 0 : i32
    return %c0_i32, %c0_i32_0 : i32, i32
  }
  func.func @transform_8(%arg0: i32) -> (i32, i32) {
    %c0_i32 = arith.constant 0 : i32
    %c0_i32_0 = arith.constant 0 : i32
    %c0_i32_1 = arith.constant 0 : i32
    return %c0_i32, %c0_i32_0 : i32, i32
  }
  func.func @transform_9(%arg0: i32) -> (i32, i32) {
    %c0_i32 = arith.constant 0 : i32
    %c0_i32_0 = arith.constant 0 : i32
    %c0_i32_1 = arith.constant 0 : i32
    return %c0_i32, %c0_i32_0 : i32, i32
  }
  func.func @transform_10(%arg0: i32) -> (i32, i32) {
    %c0_i32 = arith.constant 0 : i32
    %c0_i32_0 = arith.constant 0 : i32
    %c0_i32_1 = arith.constant 0 : i32
    return %c0_i32, %c0_i32_0 : i32, i32
  }
  func.func @transform_11(%arg0: i32) -> (i32, i32) {
    %c0_i32 = arith.constant 0 : i32
    %c0_i32_0 = arith.constant 0 : i32
    %c0_i32_1 = arith.constant 0 : i32
    return %c0_i32, %c0_i32_0 : i32, i32
  }
  func.func @transform_12(%arg0: i32) -> (i32, i32) {
    %c0_i32 = arith.constant 0 : i32
    %c0_i32_0 = arith.constant 0 : i32
    %c0_i32_1 = arith.constant 0 : i32
    return %c0_i32, %c0_i32_0 : i32, i32
  }
  func.func @transform_13(%arg0: i32) -> (i32, i32) {
    %c0_i32 = arith.constant 0 : i32
    %c0_i32_0 = arith.constant 0 : i32
    %c0_i32_1 = arith.constant 0 : i32
    return %c0_i32, %c0_i32_0 : i32, i32
  }
  func.func @transform_14(%arg0: i32) -> (i32, i32, i32) {
    %c0_i32 = arith.constant 0 : i32
    %c0_i32_0 = arith.constant 0 : i32
    %c0_i32_1 = arith.constant 0 : i32
    return %arg0, %c0_i32, %c0_i32_0 : i32, i32, i32
  }
  func.func @transform_15(%arg0: i32) -> (i32, i32, i32) {
    %c0_i32 = arith.constant 0 : i32
    %c0_i32_0 = arith.constant 0 : i32
    %c0_i32_1 = arith.constant 0 : i32
    return %arg0, %c0_i32, %c0_i32_0 : i32, i32, i32
  }
}

</mosaic_0001>

<bundles_post_ra>
// kernel: tpu_custom_call.1
= control target key start
LH: loop header
LB: loop body
LE: loop exit
PB: predicated region body
PF: predicated region fallthrough
CT: control target
= control target key end

     0   :  { %s9567_s0 = inlined_call_operand.vmem [shape: f32[2,128,3], index: 0, kind: input, shape index: {}]   ;;  %s9568_s1 = inlined_call_operand.vmem [shape: f32[2,128,35], index: 1, kind: input, shape index: {}]   ;;  %s9569_s2 = inlined_call_operand.vmem [shape: f32[3,32], index: 2, kind: input, shape index: {}]   ;;  %s9570_s3 = inlined_call_operand.vmem [shape: f32[35,32], index: 3, kind: input, shape index: {}]   ;;  %s9571_s4 = inlined_call_operand.vmem [shape: f32[1,32], index: 4, kind: input, shape index: {}]   ;;  %s9572_s5 = inlined_call_operand.vmem [shape: f32[3,32], index: 5, kind: input, shape index: {}]   ;;  %s9573_s6 = inlined_call_operand.vmem [shape: f32[32,32], index: 6, kind: input, shape index: {}]   ;;  %s9574_s7 = inlined_call_operand.vmem [shape: f32[1,32], index: 7, kind: input, shape index: {}]   ;;  %s9575_s8 = inlined_call_operand.vmem [shape: f32[32,32], index: 8, kind: input, shape index: {}]   ;;  %s9576_s9 = inlined_call_operand.vmem [shape: f32[1,32], index: 9, kind: input, shape index: {}]   ;;  %s9577_s10 = inlined_call_operand.vmem [shape: f32[32,128], index: 10, kind: input, shape index: {}]   ;;  %s9578_s11 = inlined_call_operand.vmem [shape: f32[1,128], index: 11, kind: input, shape index: {}]   ;;  %s9579_s12 = inlined_call_operand.vmem [shape: f32[128,128], index: 12, kind: input, shape index: {}]   ;;  %s9580_s13 = inlined_call_operand.vmem [shape: f32[1,128], index: 13, kind: input, shape index: {}]   ;;  %s9581_s14 = inlined_call_operand.hbm [shape: f32[2,128,128], index: 14, kind: output, shape index: {0}]   ;;  %s9582_s15 = inlined_call_operand.hbm [shape: f32[2,128,128], index: 15, kind: output, shape index: {1}]  }
   0x1   :  { %9708 = sst [smem:[#allocation71_spill]] %s9567_s0 }
   0x2   :  { %9709 = sst [smem:[#allocation72_spill]] %s9568_s1 }
   0x3   :  { %9710 = sst [smem:[#allocation73_spill]] %s9569_s2 }
   0x4   :  { %9711 = sst [smem:[#allocation74_spill]] %s9570_s3 }
   0x5   :  { %9712 = sst [smem:[#allocation75_spill]] %s9571_s4 }
   0x6   :  { %21 = vsyncpa [#allocation3], 0 }
   0x7   :  { %23 = vsyncpa [#allocation3 + $0x1], 0 }
   0x8   :  { %24 = vsyncpa [#allocation5], 0 }
   0x9   :  { %26 = vsyncpa [#allocation5 + $0x1], 0  ;;  %s6727_s18 = smov 0   ;;  %s6729_s19 = smov 0  }
   0xa   :  { %s6731_s20 = smov 0   ;;  %s6733_s21 = smov 0  }
   0xb LB: > { %s6748_s22 = sadd.s32 4294967295, %s6640_s21   ;;  %s4909_s23 = sadd.s32 4294967294, %s6640_s21   ;;  %s6640_s21 = sphi %s6733_s21, %s10100_s21   ;;  %s6636_s20 = sphi %s6731_s20, %s10099_s20   ;;  %s6632_s19 = sphi %s6729_s19, %s10098_s19   ;;  %s6628_s18 = sphi %s6727_s18, %s10097_s18  }
   0xc   : > { %s6752_s24 = sadd.s32 1, %s6640_s21   ;;  %s343_s25 = sadd.s32 1, %s6636_s20 }
   0xd   : > { %s340_s26 = ssub.s32 %s6640_s21, %s6752_s24  ;;  %p353_p0 = scmp.ne.s32.totalorder %s6636_s20, %s6632_s19 }
   0xe   : > { %p341_p1 = scmp.eq.s32.totalorder %s340_s26, 0  ;;  %p354_p2 = scmp.eq.s32.totalorder %s6748_s22, 1 }
   0xf   : > { %p359_p3 = scmp.ne.s32.totalorder %s6632_s19, %s6628_s18  ;;  %p360_p4 = scmp.eq.s32.totalorder %s4909_s23, 1 }
  0x10   : > { %s6763_s27 = scalar_select %p341_p1, %s6636_s20, %s343_s25  }
  0x11   : > { %p6765_p5 = por %p354_p2, %p353_p0  ;;  %p6769_p6 = por %p360_p4, %p359_p3 }
  0x12   : > { %p4912_p7 = scmp.ge.s32.totalorder %s6640_s21, 1  ;;  %p456_p8 = scmp.lt.s32.totalorder %s6640_s21, 3 }
  0x14   : > { %p457_p9 = pnand %p4912_p7, %p456_p8 }
  0x16   : > { %460 = sbr.rel (%p457_p9) target bundleno = 3128 (0xc38), region = 76 }
  0x1d   : > { %p514_p10 = scmp.lt.s32.totalorder %s6748_s22, 1  ;;  %vm9584_vm0 = vcmask 23552   ;;  %s9715_s0 = sld [smem:[#allocation71_spill]]  ;;  %vm9585_vm2 = vcmask 1042432   ;;  %vm1952_vm3 = vcmask 285696  }
  0x1e   : > { %vm6789_vm1 = vmpackc.low %vm9584_vm0, %vm9584_vm0  ;;  %s9718_s2 = sld [smem:[#allocation73_spill]]  ;;  %s9719_s3 = sld [smem:[#allocation74_spill]] }
  0x1f   : > { %s6777_s30 = scalar_select %p514_p10, %s6748_s22, 1 }
  0x20   : > { %s9721_s1 = sld [smem:[#allocation72_spill]]  ;;  %s9975_s4 = sld [smem:[#allocation75_spill]] }
  0x21   : > { %s9583_s16 = sshll.u32 %s6777_s30, 7  ;;  %s9705_s17 = sshll.u32 %s6748_s22, 11 }
  0x23   : > { %s6785_s25 = scalar_lea.vmem %s9715_s0, %s9583_s16  ;;  %s9720_s0 = sshll.u32 %s6777_s30, 7 }
  0x24   : > { %v6794_v1 = vld [vmem:[%s6785_s25] sm:$0xff]  ;;  %v6797_v2 = vld [vmem:[%s6785_s25 + $0x8] sm:$0xff]  ;;  %v6800_v3 = vld [vmem:[%s6785_s25 + $0x10] sm:$0xff]  ;;  %s9408_s30 = sand.u32 1, %s6632_s19  }
  0x25   : > { %v6372_v4 = vpack.c.bf16 %v6797_v2, %v6794_v1  ;;  %v557_v5 = vmul.f32 %v6794_v1, %v6794_v1  ;;  %v558_v6 = vmul.f32 %v6797_v2, %v6797_v2  ;;  %v6809_v7 = vld [vmem:[%s6785_s25 + $0x18] sm:$0xff]  ;;  %v559_v8 = vmul.f32 %v6800_v3, %v6800_v3  ;;  %5822 = vmatprep.mubr.msk.f32.mxu0 %vm9584_vm0, %v6794_v1  ;;  %v6820_v11 = vld [vmem:[%s6785_s25 + $0x20] sm:$0xff]  ;;  %v6834_v15 = vld [vmem:[%s6785_s25 + $0x28] sm:$0xff] }
  0x26   : > { %v6378_v9 = vpack.c.bf16 %v6809_v7, %v6800_v3  ;;  %v560_v10 = vmul.f32 %v6809_v7, %v6809_v7  ;;  %5848 = vmatprep.mubr.msk.f32.mxu1 %vm9584_vm0, %v6794_v1  ;;  %v561_v16 = vmul.f32 %v6820_v11, %v6820_v11  ;;  %v562_v18 = vmul.f32 %v6834_v15, %v6834_v15  ;;  %v6842_v19 = vld [vmem:[%s6785_s25 + $0x30] sm:$0xff]  ;;  %v6848_v22 = vld [vmem:[%s6785_s25 + $0x38] sm:$0xff]  ;;  %v6856_v26 = vld [vmem:[%s6785_s25 + $0x40] sm:$0xff]  ;;  %s6997_s26 = scalar_lea.vmem %s9721_s1, %s9720_s0 }
  0x27   : > { %6374 = vmatprep.subr.msk.bf16.mxu0 %vm6789_vm1, %v6372_v4  ;;  %v574_v12 = vsel %vm9584_vm0, %v557_v5, 0.0  ;;  %v580_v13 = vsel %vm9584_vm0, %v559_v8, 0.0  ;;  %v577_v14 = vsel %vm9584_vm0, %v558_v6, 0.0  ;;  %v6384_v20 = vpack.c.bf16 %v6834_v15, %v6820_v11  ;;  %v6864_v28 = vld [vmem:[%s6785_s25 + $0x48] sm:$0xff]  ;;  %v6872_v32 = vld [vmem:[%s6785_s25 + $0x50] sm:$0xff]  ;;  %v6878_v35 = vld [vmem:[%s6785_s25 + $0x58] sm:$0xff] }
  0x28   : > { %6377 = vmatpush3.bf16.xpose.msk.msra.mxu0 %vm6789_vm1, %v6372_v4  ;;  %575 = vadd.xlane.f32.xlu0 %v574_v12  ;;  %v583_v17 = vsel %vm9584_vm0, %v560_v10, 0.0  ;;  %v586_v21 = vsel %vm9584_vm0, %v561_v16, 0.0  ;;  %v563_v23 = vmul.f32 %v6842_v19, %v6842_v19  ;;  %v589_v24 = vsel %vm9584_vm0, %v562_v18, 0.0  ;;  %v6886_v39 = vld [vmem:[%s6785_s25 + $0x60] sm:$0xff]  ;;  %v6894_v41 = vld [vmem:[%s6785_s25 + $0x68] sm:$0xff]  ;;  %v6902_v45 = vld [vmem:[%s6785_s25 + $0x70] sm:$0xff] }
  0x29   : > { %6380 = vmatprep.subr.msk.bf16.mxu0 %vm6789_vm1, %v6378_v9  ;;  %581 = vadd.xlane.f32.xlu1 %v580_v13  ;;  %v564_v25 = vmul.f32 %v6848_v22, %v6848_v22  ;;  %v565_v29 = vmul.f32 %v6856_v26, %v6856_v26  ;;  %v566_v31 = vmul.f32 %v6864_v28, %v6864_v28  ;;  %v6908_v48 = vld [vmem:[%s6785_s25 + $0x78] sm:$0xff]  ;;  %v1797_v54 = vld [vmem:[%s9718_s2] sm:$0x7]  ;;  %v1948_v59 = vld [vmem:[%s9719_s3 + $0x8] sm:$0xff] }
  0x2a   : > { %v592_v27 = vsel %vm9584_vm0, %v563_v23, 0.0  ;;  %v6390_v33 = vpack.c.bf16 %v6848_v22, %v6842_v19  ;;  %v567_v36 = vmul.f32 %v6872_v32, %v6872_v32  ;;  %v568_v38 = vmul.f32 %v6878_v35, %v6878_v35  ;;  %5846 = vmatprep.subr.msk.mxu1 %vm9585_vm2, %v1797_v54  ;;  %v1947_v58 = vld [vmem:[%s9719_s3] sm:$0xff]  ;;  %v1949_v61 = vld [vmem:[%s9719_s3 + $0x10] sm:$0xff]  ;;  %v1950_v62 = vld [vmem:[%s9719_s3 + $0x18] sm:$0xff] }
  0x2b   : > { %v595_v30 = vsel %vm9584_vm0, %v564_v25, 0.0  ;;  %v598_v34 = vsel %vm9584_vm0, %v565_v29, 0.0  ;;  %v601_v37 = vsel %vm9584_vm0, %v566_v31, 0.0  ;;  %v569_v42 = vmul.f32 %v6886_v39, %v6886_v39  ;;  %5847 = vmatpush3.msk.msra.mxu1 %vm9585_vm2, %v1797_v54  ;;  %v1951_v4 = vld [vmem:[%s9719_s3 + $0x20] sm:$0x7]  ;;  %v542_v5 = vld [vmem:[%s6997_s26 + $0x8] sm:$0xff] }
  0x2c   : > { %578 = vadd.xlane.f32.xlu0 %v577_v14  ;;  %v604_v40 = vsel %vm9584_vm0, %v567_v36, 0.0  ;;  %v607_v43 = vsel %vm9584_vm0, %v568_v38, 0.0  ;;  %v570_v44 = vmul.f32 %v6894_v41, %v6894_v41  ;;  %v6396_v46 = vpack.c.bf16 %v6864_v28, %v6856_v26  ;;  %5849 = vmatmul.mubr.msk.f32.vlgmr.msra.gmra.mrb[0].mxu1 %vm9584_vm0, %v6797_v2  ;;  %v541_v0 = vld [vmem:[%s6997_s26] sm:$0xff]  ;;  %v543_v6 = vld [vmem:[%s6997_s26 + $0x10] sm:$0xff]  ;;  %v544_v8 = vld [vmem:[%s6997_s26 + $0x18] sm:$0xff]  ;;  %s6643_s3 = smov [#allocation2]  }
  0x2d   : > { %584 = vadd.xlane.f32.xlu1 %v583_v17  ;;  %v610_v47 = vsel %vm9584_vm0, %v569_v42, 0.0  ;;  %v571_v49 = vmul.f32 %v6902_v45, %v6902_v45  ;;  %v572_v51 = vmul.f32 %v6908_v48, %v6908_v48  ;;  %v6402_v55 = vpack.c.bf16 %v6878_v35, %v6872_v32  ;;  %5851 = vmatprep.mubr.msk.f32.mxu1 %vm9584_vm0, %v6800_v3  ;;  %v549_v10 = vld [vmem:[%s6997_s26 + $0x40] sm:$0xff]  ;;  %v551_v12 = vld [vmem:[%s6997_s26 + $0x50] sm:$0xff]  ;;  %v552_v13 = vld [vmem:[%s6997_s26 + $0x58] sm:$0xff] }
  0x2e   : > { %v613_v50 = vsel %vm9584_vm0, %v570_v44, 0.0  ;;  %v6408_v56 = vpack.c.bf16 %v6894_v41, %v6886_v39  ;;  %v6414_v57 = vpack.c.bf16 %v6908_v48, %v6902_v45  ;;  %v6420_v60 = vpack.c.bf16 %v1948_v59, %v1947_v58  ;;  %v553_v14 = vld [vmem:[%s6997_s26 + $0x60] sm:$0xff]  ;;  %v555_v16 = vld [vmem:[%s6997_s26 + $0x70] sm:$0xff]  ;;  %v556_v17 = vld [vmem:[%s6997_s26 + $0x78] sm:$0xff] }
  0x2f   : > { %v616_v52 = vsel %vm9584_vm0, %v571_v49, 0.0  ;;  %v619_v53 = vsel %vm9584_vm0, %v572_v51, 0.0  ;;  %v6424_v63 = vpack.c.bf16 %v1950_v62, %v1949_v61 }
  0x30   : > { %6383 = vmatpush3.bf16.xpose.msk.msra.mxu0 %vm6789_vm1, %v6378_v9  ;;  %587 = vadd.xlane.f32.xlu0 %v586_v21  ;;  %v546_v9 = vld [vmem:[%s6997_s26 + $0x28] sm:$0xff] }
  0x31   : > { %6386 = vmatprep.subr.msk.bf16.mxu0 %vm6789_vm1, %v6384_v20  ;;  %590 = vadd.xlane.f32.xlu1 %v589_v24 }
  0x32   : > { %5852 = vmatmul.mubr.msk.f32.gmra.mrb[2].mxu1 %vm9584_vm0, %v6809_v7  ;;  %6421 = vmatprep.subr.bf16.mxu1 %v6420_v60 }
  0x33   : > { %5854 = vmatprep.mubr.msk.f32.mxu1 %vm9584_vm0, %v6820_v11  ;;  %6423 = vmatpush3.bf16.msra.mxu1 %v6420_v60 }
  0x34   : > { %593 = vadd.xlane.f32.xlu0 %v592_v27  ;;  %6425 = vmatprep.subr.bf16.mxu1 %v6424_v63 }
  0x35   : > { %596 = vadd.xlane.f32.xlu1 %v595_v30 }
  0x36   : > { %5855 = vmatmul.mubr.msk.f32.gmra.mrb[4].mxu1 %vm9584_vm0, %v6834_v15 }
  0x37   : > { %5857 = vmatprep.mubr.msk.f32.mxu1 %vm9584_vm0, %v6842_v19  ;;  %6427 = vmatpush3.bf16.msra.mxu1 %v6424_v63 }
  0x38   : > { %6389 = vmatpush3.bf16.xpose.msk.msra.mxu0 %vm6789_vm1, %v6384_v20  ;;  %599 = vadd.xlane.f32.xlu0 %v598_v34 }
  0x39   : > { %6392 = vmatprep.subr.msk.bf16.mxu0 %vm6789_vm1, %v6390_v33  ;;  %602 = vadd.xlane.f32.xlu1 %v601_v37 }
  0x3a   : > { %5858 = vmatmul.mubr.msk.f32.gmra.mrb[6].mxu1 %vm9584_vm0, %v6848_v22  ;;  %5880 = vmatprep.subr.msk.mxu1 %vm9585_vm2, %v1951_v4 }
  0x3b   : > { %5860 = vmatprep.mubr.msk.f32.mxu1 %vm9584_vm0, %v6856_v26  ;;  %5881 = vmatpush3.msk.msra.mxu1 %vm9585_vm2, %v1951_v4 }
  0x3c   : > { %605 = vadd.xlane.f32.xlu0 %v604_v40 }
  0x3d   : > { %608 = vadd.xlane.f32.xlu1 %v607_v43  ;;  %v847_v43 = vlaneseq }
  0x3e   : > { %5861 = vmatmul.mubr.msk.f32.gmra.mrb[8].mxu1 %vm9584_vm0, %v6864_v28 }
  0x3f   : > { %5863 = vmatprep.mubr.msk.f32.mxu1 %vm9584_vm0, %v6872_v32  ;;  %v7140_v4 = vand.u32 127, %v847_v43 }
  0x40   : > { %6395 = vmatpush3.bf16.xpose.msk.msra.mxu0 %vm6789_vm1, %v6390_v33  ;;  %611 = vadd.xlane.f32.xlu0 %v610_v47 }
  0x41   : > { %6398 = vmatprep.subr.msk.bf16.mxu0 %vm6789_vm1, %v6396_v46  ;;  %614 = vadd.xlane.f32.xlu1 %v613_v50 }
  0x42   : > { %5864 = vmatmul.mubr.msk.f32.gmra.mrb[10].mxu1 %vm9584_vm0, %v6878_v35 }
  0x43   : > { %5866 = vmatprep.mubr.msk.f32.mxu1 %vm9584_vm0, %v6886_v39 }
  0x44   : > { %617 = vadd.xlane.f32.xlu0 %v616_v52 }
  0x45   : > { %620 = vadd.xlane.f32.xlu1 %v619_v53 }
  0x46   : > { %5867 = vmatmul.mubr.msk.f32.gmra.mrb[12].mxu1 %vm9584_vm0, %v6894_v41 }
  0x47   : > { %5869 = vmatprep.mubr.msk.f32.mxu1 %vm9584_vm0, %v6902_v45 }
  0x48   : > { %6401 = vmatpush3.bf16.xpose.msk.msra.mxu0 %vm6789_vm1, %v6396_v46  ;;  %v848_v46 = vshrl.u32 %v847_v43, 7 }
  0x49   : > { %6404 = vmatprep.subr.msk.bf16.mxu0 %vm6789_vm1, %v6402_v55 }
  0x4a   : > { %5870 = vmatmul.mubr.msk.f32.gmra.mrb[14].mxu1 %vm9584_vm0, %v6908_v48  ;;  %v849_v49 = vsub.s32 0, %v848_v46 }
  0x4b   : > { %5882 = vmatprep.mubr.msk.f32.mxu1 %vm1952_vm3, %v541_v0 }
  0x4e   : > { %5883 = vmatmul.mubr.msk.f32.vlgmr.msra.gmra.mrb[16].mxu1 %vm1952_vm3, %v542_v5 }
  0x4f   : > { %5885 = vmatprep.mubr.msk.f32.mxu1 %vm1952_vm3, %v543_v6 }
  0x50   : > { %6407 = vmatpush3.bf16.xpose.msk.msra.mxu0 %vm6789_vm1, %v6402_v55 }
  0x51   : > { %6410 = vmatprep.subr.msk.bf16.mxu0 %vm6789_vm1, %v6408_v56 }
  0x52   : > { %5886 = vmatmul.mubr.msk.f32.gmra.mrb[18].mxu1 %vm1952_vm3, %v544_v8 }
  0x58   : > { %6413 = vmatpush3.bf16.xpose.msk.msra.mxu0 %vm6789_vm1, %v6408_v56 }
  0x59   : > { %6416 = vmatprep.subr.msk.bf16.mxu0 %vm6789_vm1, %v6414_v57 }
  0x60   : > { %6419 = vmatpush3.bf16.xpose.msk.msra.mxu0 %vm6789_vm1, %v6414_v57 }
  0x67   : > { %5823 = vmatmul.mubr.msk.f32.vlgmr.msra.gmra.mrb[0].mxu0 %vm9584_vm0, %v6797_v2  ;;  %v545_v2 = vld [vmem:[%s6997_s26 + $0x20] sm:$0xff] }
  0x68   : > { %5825 = vmatprep.mubr.msk.f32.mxu0 %vm9584_vm0, %v6800_v3  ;;  %5888 = vmatprep.mubr.msk.f32.mxu1 %vm1952_vm3, %v545_v2  ;;  %v547_v3 = vld [vmem:[%s6997_s26 + $0x30] sm:$0xff] }
  0x69   : > { %5889 = vmatmul.mubr.msk.f32.gmra.mrb[20].mxu1 %vm1952_vm3, %v546_v9 }
  0x6a   : > { %5891 = vmatprep.mubr.msk.f32.mxu1 %vm1952_vm3, %v547_v3 }
  0x6b   : > { %5826 = vmatmul.mubr.msk.f32.gmra.mrb[2].mxu0 %vm9584_vm0, %v6809_v7  ;;  %v548_v7 = vld [vmem:[%s6997_s26 + $0x38] sm:$0xff] }
  0x6c   : > { %5828 = vmatprep.mubr.msk.f32.mxu0 %vm9584_vm0, %v6820_v11  ;;  %v550_v11 = vld [vmem:[%s6997_s26 + $0x48] sm:$0xff] }
  0x6d   : > { %5892 = vmatmul.mubr.msk.f32.gmra.mrb[22].mxu1 %vm1952_vm3, %v548_v7 }
  0x6e   : > { %5894 = vmatprep.mubr.msk.f32.mxu1 %vm1952_vm3, %v549_v10 }
  0x6f   : > { %5829 = vmatmul.mubr.msk.f32.gmra.mrb[4].mxu0 %vm9584_vm0, %v6834_v15  ;;  %v554_v15 = vld [vmem:[%s6997_s26 + $0x68] sm:$0xff]  ;;  %s9459_s26 = scalar_lea.hbm %s9581_s14, %s9705_s17 }
  0x70   : > { %5831 = vmatprep.mubr.msk.f32.mxu0 %vm9584_vm0, %v6842_v19 }
  0x71   : > { %5895 = vmatmul.mubr.msk.f32.gmra.mrb[24].mxu1 %vm1952_vm3, %v550_v11 }
  0x72   : > { %5897 = vmatprep.mubr.msk.f32.mxu1 %vm1952_vm3, %v551_v12 }
  0x73   : > { %5832 = vmatmul.mubr.msk.f32.gmra.mrb[6].mxu0 %vm9584_vm0, %v6848_v22 }
  0x74   : > { %5834 = vmatprep.mubr.msk.f32.mxu0 %vm9584_vm0, %v6856_v26 }
  0x75   : > { %5898 = vmatmul.mubr.msk.f32.gmra.mrb[26].mxu1 %vm1952_vm3, %v552_v13 }
  0x76   : > { %5900 = vmatprep.mubr.msk.f32.mxu1 %vm1952_vm3, %v553_v14 }
  0x77   : > { %5835 = vmatmul.mubr.msk.f32.gmra.mrb[8].mxu0 %vm9584_vm0, %v6864_v28 }
  0x78   : > { %5837 = vmatprep.mubr.msk.f32.mxu0 %vm9584_vm0, %v6872_v32 }
  0x79   : > { %5901 = vmatmul.mubr.msk.f32.gmra.mrb[28].mxu1 %vm1952_vm3, %v554_v15 }
  0x7a   : > { %5903 = vmatprep.mubr.msk.f32.mxu1 %vm1952_vm3, %v555_v16 }
  0x7b   : > { %5838 = vmatmul.mubr.msk.f32.gmra.mrb[10].mxu0 %vm9584_vm0, %v6878_v35 }
  0x7c   : > { %5840 = vmatprep.mubr.msk.f32.mxu0 %vm9584_vm0, %v6886_v39 }
  0x7d   : > { %5904 = vmatmul.mubr.msk.f32.gmra.mrb[30].mxu1 %vm1952_vm3, %v556_v17 }
  0x7f   : > { %5841 = vmatmul.mubr.msk.f32.gmra.mrb[12].mxu0 %vm9584_vm0, %v6894_v41 }
  0x80   : > { %5843 = vmatprep.mubr.msk.f32.mxu0 %vm9584_vm0, %v6902_v45 }
  0x83   : > { %5844 = vmatmul.mubr.msk.f32.gmra.mrb[14].mxu0 %vm9584_vm0, %v6908_v48 }
  0x84   : > { %6052 = vmatprep.mubr.msk.f32.mxu0 %vm9584_vm0, %v6794_v1 }
  0xb5   : > { %v576_v18 = vpop.xlane.xlu0 %575 }
  0xb6   : > { %815 = vxpose.xlu0.b32.start [1/16] (narrow) %v576_v18, 8  ;;  %v7064_v20 = vpop.xlane.xlu1 %581 }
  0xb9   : > { %v579_v19 = vpop.xlane.xlu0 %578 }
  0xba   : > { %816 = vxpose.xlu0.b32.cont [2/16] (narrow) %v579_v19, 8  ;;  %v585_v21 = vpop.xlane.xlu1 %584 }
  0xbd   : > { %v7067_v22 = vpop.xlane.xlu0 %587 }
  0xbe   : > { %817 = vxpose.xlu0.b32.cont [3/16] (narrow) %v7064_v20, 8  ;;  %v7070_v23 = vpop.xlane.xlu1 %590 }
  0xc1   : > { %v7073_v24 = vpop.xlane.xlu0 %593 }
  0xc2   : > { %818 = vxpose.xlu0.b32.cont [4/16] (narrow) %v585_v21, 8  ;;  %v7076_v1 = vpop.xlane.xlu1 %596 }
  0xc5   : > { %v7079_v25 = vpop.xlane.xlu0 %599 }
  0xc6   : > { %819 = vxpose.xlu0.b32.cont [5/16] (narrow) %v7067_v22, 8  ;;  %v7082_v26 = vpop.xlane.xlu1 %602 }
  0xc9   : > { %v7085_v27 = vpop.xlane.xlu0 %605 }
  0xca   : > { %820 = vxpose.xlu0.b32.cont [6/16] (narrow) %v7070_v23, 8  ;;  %v7088_v28 = vpop.xlane.xlu1 %608 }
  0xcd   : > { %v7091_v29 = vpop.xlane.xlu0 %611 }
  0xce   : > { %821 = vxpose.xlu0.b32.cont [7/16] (narrow) %v7073_v24, 8  ;;  %v7094_v30 = vpop.xlane.xlu1 %614 }
  0xd1   : > { %v7097_v31 = vpop.xlane.xlu0 %617 }
  0xd2   : > { %822 = vxpose.xlu0.b32.cont [8/16] (narrow) %v7076_v1, 8  ;;  %v7100_v32 = vpop.xlane.xlu1 %620 }
  0xd6   : > { %823 = vxpose.xlu0.b32.cont [9/16] (narrow) %v7079_v25, 8 }
  0xda   : > { %824 = vxpose.xlu0.b32.cont [10/16] (narrow) %v7082_v26, 8 }
  0xde   : > { %825 = vxpose.xlu0.b32.cont [11/16] (narrow) %v7085_v27, 8 }
  0xe2   : > { %826 = vxpose.xlu0.b32.cont [12/16] (narrow) %v7088_v28, 8 }
  0xe6   : > { %827 = vxpose.xlu0.b32.cont [13/16] (narrow) %v7091_v29, 8 }
  0xea   : > { %828 = vxpose.xlu0.b32.cont [14/16] (narrow) %v7094_v30, 8 }
  0xee   : > { %829 = vxpose.xlu0.b32.cont [15/16] (narrow) %v7097_v31, 8 }
  0xf2   : > { %830 = vxpose.xlu0.b32.end [16/16] (narrow) %v7100_v32, 8 }
  0xff   : > { %v7103_v33 = vpop.f32.mrb[0].mxu1 }
 0x100   : > { %9722 = vst [vmem:[#allocation8_spill] sm:$0xff] %v7103_v33  ;;  %v7105_v34 = vpop.f32.mrb[1].mxu1 }
 0x105   : > { %v7107_v35 = vpop.f32.mrb[2].mxu1 }
 0x106   : > { %v7109_v36 = vpop.f32.mrb[3].mxu1 }
 0x109   : > { %v7111_v37 = vpop.f32.mrb[4].mxu1 }
 0x10a   : > { %9723 = vst [vmem:[#allocation9_spill] sm:$0xff] %v7111_v37  ;;  %v7113_v38 = vpop.f32.mrb[5].mxu1 }
 0x10b   : > { %9724 = vst [vmem:[#allocation10_spill] sm:$0xff] %v7113_v38 }
 0x10d   : > { %v7115_v39 = vpop.f32.mrb[6].mxu1 }
 0x10e   : > { %9725 = vst [vmem:[#allocation11_spill] sm:$0xff] %v7115_v39  ;;  %v7117_v40 = vpop.f32.mrb[7].mxu1 }
 0x10f   : > { %9726 = vst [vmem:[#allocation12_spill] sm:$0xff] %v7117_v40 }
 0x111   : > { %v7119_v41 = vpop.f32.mrb[8].mxu1 }
 0x112   : > { %9727 = vst [vmem:[#allocation13_spill] sm:$0xff] %v7119_v41  ;;  %v7121_v42 = vpop.f32.mrb[9].mxu1 }
 0x113   : > { %9728 = vst [vmem:[#allocation14_spill] sm:$0xff] %v7121_v42 }
 0x115   : > { %v7123_v44 = vpop.f32.mrb[10].mxu1 }
 0x116   : > { %9729 = vst [vmem:[#allocation15_spill] sm:$0xff] %v7123_v44  ;;  %v7125_v45 = vpop.f32.mrb[11].mxu1 }
 0x117   : > { %9730 = vst [vmem:[#allocation16_spill] sm:$0xff] %v7125_v45 }
 0x119   : > { %v7127_v47 = vpop.f32.mrb[12].mxu1 }
 0x11a   : > { %9731 = vst [vmem:[#allocation17_spill] sm:$0xff] %v7127_v47  ;;  %v7129_v48 = vpop.f32.mrb[13].mxu1 }
 0x11b   : > { %9732 = vst [vmem:[#allocation18_spill] sm:$0xff] %v7129_v48 }
 0x11d   : > { %v7131_v50 = vpop.f32.mrb[14].mxu1 }
 0x11e   : > { %9733 = vst [vmem:[#allocation19_spill] sm:$0xff] %v7131_v50  ;;  %v7133_v51 = vpop.f32.mrb[15].mxu1 }
 0x11f   : > { %9734 = vst [vmem:[#allocation20_spill] sm:$0xff] %v7133_v51 }
 0x121   : > { %v5884_v58 = vpop.f32.mrb[16].mxu1 }
 0x122   : > { %v2070_v61 = vpop.f32.mrb[17].mxu1  ;;  %v2150_v63 = vadd.f32 %v5884_v58, %v7103_v33 }
 0x123   : > { %v2149_v6 = vadd.f32 %v2070_v61, %v7105_v34 }
 0x125   : > { %v5887_v10 = vpop.f32.mrb[18].mxu1  ;;  %v2188_v13 = vpack.c.bf16 %v2150_v63, %v2149_v6 }
 0x126   : > { %v2152_v14 = vadd.f32 %v5887_v10, %v7107_v35  ;;  %v2080_v15 = vpop.f32.mrb[19].mxu1 }
 0x127   : > { %5906 = vmatprep.subr.bf16.mxu1 %v2188_v13 }
 0x128   : > { %5907 = vmatpush3.bf16.msra.mxu1 %v2188_v13 }
 0x136   : > { %v831_v52 = vpop.trf.xlu0 }
 0x137   : > { %v7135_v53 = vrot.slane %v831_v52, %v849_v49 }
 0x139   : > { %v852_v55 = vadd.f32 %v7135_v53, %v579_v19  ;;  %v851_v59 = vadd.f32 %v7135_v53, %v576_v18  ;;  %v854_v2 = vadd.f32 %v7135_v53, %v585_v21  ;;  %v853_v7 = vadd.f32 %v7135_v53, %v7064_v20 }
 0x13a   : > { %v5824_v54 = vpop.f32.mrb[0].mxu0  ;;  %v2151_v18 = vadd.f32 %v2080_v15, %v7109_v36  ;;  %v856_v58 = vadd.f32 %v7135_v53, %v7070_v23  ;;  %v855_v23 = vadd.f32 %v7135_v53, %v7067_v22 }
 0x13b   : > { %v868_v56 = vmul.f32 2.0, %v5824_v54  ;;  %v736_v57 = vpop.f32.mrb[1].mxu0 }
 0x13c   : > { %v867_v60 = vmul.f32 2.0, %v736_v57  ;;  %v2189_v54 = vpack.c.bf16 %v2152_v14, %v2151_v18 }
 0x13d   : > { %v884_v62 = vsub.f32 %v852_v55, %v868_v56  ;;  %v5890_v55 = vpop.f32.mrb[20].mxu1 }
 0x13e   : > { %v883_v0 = vsub.f32 %v851_v59, %v867_v60  ;;  %v5827_v5 = vpop.f32.mrb[2].mxu0  ;;  %v2154_v56 = vadd.f32 %v5890_v55, %v7111_v37  ;;  %v2090_v57 = vpop.f32.mrb[21].mxu1  ;;  %5908 = vmatprep.subr.bf16.mxu1 %v2189_v54 }
 0x13f   : > { %v900_v8 = vmax.f32 %v884_v62, 0.0  ;;  %v870_v9 = vmul.f32 2.0, %v5827_v5  ;;  %v746_v3 = vpop.f32.mrb[3].mxu0  ;;  %v2153_v59 = vadd.f32 %v2090_v57, %v7113_v38  ;;  %5909 = vmatpush3.bf16.msra.mxu1 %v2189_v54 }
 0x140   : > { %v899_v11 = vmax.f32 %v883_v0, 0.0  ;;  %v869_v12 = vmul.f32 2.0, %v746_v3 }
 0x141   : > { %v934_v16 = vand.u32 4294967168, %v900_v8  ;;  %v886_v17 = vsub.f32 %v854_v2, %v870_v9  ;;  %v2190_v8 = vpack.c.bf16 %v2154_v56, %v2153_v59  ;;  %v5893_v2 = vpop.f32.mrb[22].mxu1 }
 0x142   : > { %v933_v19 = vand.u32 4294967168, %v899_v11  ;;  %v885_v43 = vsub.f32 %v853_v7, %v869_v12  ;;  %v5830_v46 = vpop.f32.mrb[4].mxu0  ;;  %v2156_v9 = vadd.f32 %v5893_v2, %v7115_v39  ;;  %v2100_v3 = vpop.f32.mrb[23].mxu1 }
 0x143   : > { %v902_v21 = vmax.f32 %v886_v17, 0.0  ;;  %v872_v49 = vmul.f32 2.0, %v5830_v46  ;;  %v756_v52 = vpop.f32.mrb[5].mxu0  ;;  %v7149_v20 = vor.u32 %v934_v16, %v7140_v4  ;;  %v2155_v7 = vadd.f32 %v2100_v3, %v7117_v40  ;;  %5910 = vmatprep.subr.bf16.mxu1 %v2190_v8 }
 0x144   : > { %v901_v60 = vmax.f32 %v885_v43, 0.0  ;;  %v871_v61 = vmul.f32 2.0, %v756_v52  ;;  %v7157_v6 = vor.u32 %v933_v19, %v7140_v4  ;;  %5911 = vmatpush3.bf16.msra.mxu1 %v2190_v8  ;;  %v5896_v22 = vpop.f32.mrb[24].mxu1  ;;  %v858_v43 = vadd.f32 %v7135_v53, %v7076_v1 }
 0x145   : > { %983 = vmin.xlane.f32.xlu1 %v7149_v20  ;;  %v936_v63 = vand.u32 4294967168, %v902_v21  ;;  %v888_v0 = vsub.f32 %v856_v58, %v872_v49  ;;  %v2191_v17 = vpack.c.bf16 %v2156_v9, %v2155_v7  ;;  %v2158_v18 = vadd.f32 %v5896_v22, %v7119_v41  ;;  %v2110_v19 = vpop.f32.mrb[25].mxu1 }
 0x146   : > { %v5833_v62 = vpop.f32.mrb[6].mxu0  ;;  %v935_v10 = vand.u32 4294967168, %v901_v60  ;;  %v887_v11 = vsub.f32 %v855_v23, %v871_v61  ;;  %v2157_v46 = vadd.f32 %v2110_v19, %v7121_v42  ;;  %v857_v1 = vadd.f32 %v7135_v53, %v7073_v24 }
 0x147   : > { %v766_v5 = vpop.f32.mrb[7].mxu0  ;;  %v904_v13 = vmax.f32 %v888_v0, 0.0  ;;  %v874_v14 = vmul.f32 2.0, %v5833_v62  ;;  %v7165_v16 = vor.u32 %v936_v63, %v7140_v4  ;;  %5912 = vmatprep.subr.bf16.mxu1 %v2191_v17 }
 0x148   : > { %v903_v21 = vmax.f32 %v887_v11, 0.0  ;;  %v873_v49 = vmul.f32 2.0, %v766_v5  ;;  %v7173_v57 = vor.u32 %v935_v10, %v7140_v4  ;;  %v2192_v58 = vpack.c.bf16 %v2158_v18, %v2157_v46  ;;  %5913 = vmatpush3.bf16.msra.mxu1 %v2191_v17  ;;  %v5899_v59 = vpop.f32.mrb[26].mxu1 }
 0x149   : > { %981 = vmin.xlane.f32.xlu1 %v7157_v6  ;;  %v938_v54 = vand.u32 4294967168, %v904_v13  ;;  %v890_v55 = vsub.f32 %v858_v43, %v874_v14  ;;  %v2160_v60 = vadd.f32 %v5899_v59, %v7123_v44  ;;  %v2120_v61 = vpop.f32.mrb[27].mxu1  ;;  %v860_v11 = vadd.f32 %v7135_v53, %v7082_v26 }
 0x14a   : > { %v5836_v12 = vpop.f32.mrb[8].mxu0  ;;  %v2159_v62 = vadd.f32 %v2120_v61, %v7125_v45  ;;  %5914 = vmatprep.subr.bf16.mxu1 %v2192_v58  ;;  %v937_v63 = vand.u32 4294967168, %v903_v21  ;;  %v889_v0 = vsub.f32 %v857_v1, %v873_v49  ;;  %v859_v26 = vadd.f32 %v7135_v53, %v7079_v25 }
 0x14b   : > { %v776_v15 = vpop.f32.mrb[9].mxu0  ;;  %v906_v8 = vmax.f32 %v890_v55, 0.0  ;;  %v876_v2 = vmul.f32 2.0, %v5836_v12  ;;  %v7181_v9 = vor.u32 %v938_v54, %v7140_v4  ;;  %v862_v25 = vadd.f32 %v7135_v53, %v7088_v28 }
 0x14c   : > { %v2193_v3 = vpack.c.bf16 %v2160_v60, %v2159_v62  ;;  %5915 = vmatpush3.bf16.msra.mxu1 %v2192_v58  ;;  %v5902_v24 = vpop.f32.mrb[28].mxu1  ;;  %v905_v14 = vmax.f32 %v889_v0, 0.0  ;;  %v875_v12 = vmul.f32 2.0, %v776_v15  ;;  %v7189_v43 = vor.u32 %v937_v63, %v7140_v4 }
 0x14d   : > { %987 = vmin.xlane.f32.xlu1 %v7165_v16  ;;  %v2162_v7 = vadd.f32 %v5902_v24, %v7127_v47  ;;  %v2130_v10 = vpop.f32.mrb[29].mxu1  ;;  %v940_v22 = vand.u32 4294967168, %v906_v8  ;;  %v892_v18 = vsub.f32 %v860_v11, %v876_v2 }
 0x14e   : > { %v5839_v52 = vpop.f32.mrb[10].mxu0  ;;  %v2161_v13 = vadd.f32 %v2130_v10, %v7129_v48  ;;  %5916 = vmatprep.subr.bf16.mxu1 %v2193_v3  ;;  %v939_v15 = vand.u32 4294967168, %v905_v14  ;;  %v891_v59 = vsub.f32 %v859_v26, %v875_v12  ;;  %v865_v26 = vadd.f32 %v7135_v53, %v7097_v31 }
 0x14f   : > { %v786_v56 = vpop.f32.mrb[11].mxu0  ;;  %v908_v58 = vmax.f32 %v892_v18, 0.0  ;;  %v878_v1 = vmul.f32 2.0, %v5839_v52  ;;  %v7197_v60 = vor.u32 %v940_v22, %v7140_v4  ;;  %v861_v52 = vadd.f32 %v7135_v53, %v7085_v27 }
 0x150   : > { %v2194_v46 = vpack.c.bf16 %v2162_v7, %v2161_v13  ;;  %5917 = vmatpush3.bf16.msra.mxu1 %v2193_v3  ;;  %v5905_v21 = vpop.f32.mrb[30].mxu1  ;;  %v877_v62 = vmul.f32 2.0, %v786_v56  ;;  %v907_v0 = vmax.f32 %v891_v59, 0.0  ;;  %v7203_v2 = vor.u32 %v939_v15, %v7140_v4 }
 0x151   : > { %985 = vmin.xlane.f32.xlu1 %v7173_v57  ;;  %v2164_v49 = vadd.f32 %v5905_v21, %v7131_v50  ;;  %v2140_v54 = vpop.f32.mrb[31].mxu1  ;;  %v942_v63 = vand.u32 4294967168, %v908_v58  ;;  %v894_v8 = vsub.f32 %v862_v25, %v878_v1  ;;  %v864_v56 = vadd.f32 %v7135_v53, %v7094_v30 }
 0x152   : > { %v5842_v5 = vpop.f32.mrb[12].mxu0  ;;  %5918 = vmatprep.subr.bf16.mxu1 %v2194_v46  ;;  %v2163_v55 = vadd.f32 %v2140_v54, %v7133_v51  ;;  %v893_v3 = vsub.f32 %v861_v52, %v877_v62  ;;  %v941_v24 = vand.u32 4294967168, %v907_v0  ;;  %v863_v22 = vadd.f32 %v7135_v53, %v7091_v29 }
 0x153   : > { %v796_v23 = vpop.f32.mrb[13].mxu0  ;;  %v910_v7 = vmax.f32 %v894_v8, 0.0  ;;  %v880_v28 = vmul.f32 2.0, %v5842_v5  ;;  %v7209_v10 = vor.u32 %v942_v63, %v7140_v4  ;;  %v9735_v8 = vmov 0 }
 0x154   : > { %5919 = vmatpush3.bf16.msra.mxu1 %v2194_v46  ;;  %v2195_v61 = vpack.c.bf16 %v2164_v49, %v2163_v55  ;;  %v909_v11 = vmax.f32 %v893_v3, 0.0  ;;  %v879_v12 = vmul.f32 2.0, %v796_v23  ;;  %v7215_v27 = vor.u32 %v941_v24, %v7140_v4 }
 0x155   : > { %991 = vmin.xlane.f32.xlu1 %v7181_v9  ;;  %v944_v13 = vand.u32 4294967168, %v910_v7  ;;  %v896_v14 = vsub.f32 %v864_v56, %v880_v28  ;;  %v866_v55 = vadd.f32 %v7135_v53, %v7100_v32  ;;  %v9589_v52 = vmov 1.0|1.0  }
 0x156   : > { %v5845_v17 = vpop.f32.mrb[14].mxu0  ;;  %5920 = vmatprep.subr.bf16.mxu1 %v2195_v61  ;;  %v943_v5 = vand.u32 4294967168, %v909_v11  ;;  %v895_v46 = vsub.f32 %v863_v22, %v879_v12 }
 0x157   : > { %v806_v19 = vpop.f32.mrb[15].mxu0  ;;  %v912_v18 = vmax.f32 %v896_v14, 0.0  ;;  %v7221_v30 = vor.u32 %v944_v13, %v7140_v4  ;;  %v882_v23 = vmul.f32 2.0, %v5845_v17 }
 0x158   : > { %5921 = vmatpush3.bf16.msra.mxu1 %v2195_v61  ;;  %v881_v21 = vmul.f32 2.0, %v806_v19  ;;  %v911_v54 = vmax.f32 %v895_v46, 0.0  ;;  %v7227_v29 = vor.u32 %v943_v5, %v7140_v4 }
 0x159   : > { %989 = vmin.xlane.f32.xlu1 %v7189_v43  ;;  %v946_v49 = vand.u32 4294967168, %v912_v18  ;;  %v898_v58 = vsub.f32 %v866_v55, %v882_v23 }
 0x15a   : > { %v897_v15 = vsub.f32 %v865_v26, %v881_v21  ;;  %v945_v19 = vand.u32 4294967168, %v911_v54  ;;  %v9753_v54 = vmov 0 }
 0x15b   : > { %v7233_v1 = vor.u32 %v946_v49, %v7140_v4  ;;  %v914_v31 = vmax.f32 %v898_v58, 0.0  ;;  %v9756_v58 = vmov 0 }
 0x15c   : > { %v913_v59 = vmax.f32 %v897_v15, 0.0  ;;  %v7237_v61 = vor.u32 %v945_v19, %v7140_v4 }
 0x15d   : > { %995 = vmin.xlane.f32.xlu1 %v7197_v60  ;;  %v948_v25 = vand.u32 4294967168, %v914_v31 }
 0x15e   : > { %v947_v17 = vand.u32 4294967168, %v913_v59 }
 0x15f   : > { %v7245_v53 = vor.u32 %v948_v25, %v7140_v4 }
 0x160   : > { %v7241_v32 = vor.u32 %v947_v17, %v7140_v4 }
 0x161   : > { %993 = vmin.xlane.f32.xlu1 %v7203_v2 }
 0x165   : > { %999 = vmin.xlane.f32.xlu1 %v7209_v10 }
 0x169   : > { %997 = vmin.xlane.f32.xlu1 %v7215_v27 }
 0x16d   : > { %1003 = vmin.xlane.f32.xlu1 %v7221_v30 }
 0x171   : > { %1001 = vmin.xlane.f32.xlu1 %v7227_v29 }
 0x175   : > { %1007 = vmin.xlane.f32.xlu1 %v7233_v1 }
 0x179   : > { %1005 = vmin.xlane.f32.xlu1 %v7237_v61 }
 0x17d   : > { %1009 = vmin.xlane.f32.xlu1 %v7241_v32 }
 0x181   : > { %1011 = vmin.xlane.f32.xlu1 %v7245_v53 }
 0x1d2   : > { %v984_v62 = vpop.xlane.xlu1 %983 }
 0x1d3   : > { %vm1014_vm4 = vcmp.eq.f32.partialorder %v7149_v20, %v984_v62 }
 0x1d4   : > { %v7250_v63 = vsel %vm1014_vm4, inf, %v7149_v20 }
 0x1d5   : > { %1079 = vmin.xlane.f32.xlu1 %v7250_v63 }
 0x1d6   : > { %v982_v0 = vpop.xlane.xlu1 %981 }
 0x1d7   : > { %vm1013_vm5 = vcmp.eq.f32.partialorder %v7157_v6, %v982_v0 }
 0x1d8   : > { %vm7254_vm6 = vmpackc.low %vm1014_vm4, %vm1013_vm5  ;;  %v7259_v4 = vsel %vm1013_vm5, inf, %v7157_v6  ;;  %v9738_v6 = vmov 0 }
 0x1d9   : > { %v9736_v8 = vsel %vm7254_vm6, 4294967295, %v9735_v8  ;;  %5922 = vmatprep.mubr.msk.bf16.mxu1 %vm7254_vm6, %v9589_v52  ;;  %1077 = vmin.xlane.f32.xlu1 %v7259_v4 }
 0x1da   : > { %9737 = vst [vmem:[#allocation21_spill] sm:$0xff] %v9736_v8  ;;  %v988_v20 = vpop.xlane.xlu1 %987 }
 0x1db   : > { %vm1016_vm7 = vcmp.eq.f32.partialorder %v7165_v16, %v988_v20 }
 0x1dc   : > { %v7267_v3 = vsel %vm1016_vm7, inf, %v7165_v16 }
 0x1dd   : > { %1083 = vmin.xlane.f32.xlu1 %v7267_v3 }
 0x1de   : > { %v986_v24 = vpop.xlane.xlu1 %985 }
 0x1df   : > { %vm1015_vm8 = vcmp.eq.f32.partialorder %v7173_v57, %v986_v24  ;;  %v9765_v24 = vmov 0 }
 0x1e0   : > { %vm7271_vm9 = vmpackc.low %vm1016_vm7, %vm1015_vm8  ;;  %v7276_v7 = vsel %vm1015_vm8, inf, %v7173_v57  ;;  %v9741_v57 = vmov 0 }
 0x1e1   : > { %v9739_v6 = vsel %vm7271_vm9, 4294967295, %v9738_v6  ;;  %5923 = vmatmul.mubr.msk.bf16.vlgmr.msra.gmra.mrb[32].mxu1 %vm7271_vm9, %v9589_v52  ;;  %1081 = vmin.xlane.f32.xlu1 %v7276_v7 }
 0x1e2   : > { %9740 = vst [vmem:[#allocation22_spill] sm:$0xff] %v9739_v6  ;;  %v992_v16 = vpop.xlane.xlu1 %991 }
 0x1e3   : > { %vm1018_vm10 = vcmp.eq.f32.partialorder %v7181_v9, %v992_v16 }
 0x1e4   : > { %v7284_v28 = vsel %vm1018_vm10, inf, %v7181_v9 }
 0x1e5   : > { %1087 = vmin.xlane.f32.xlu1 %v7284_v28 }
 0x1e6   : > { %v990_v56 = vpop.xlane.xlu1 %989 }
 0x1e7   : > { %vm1017_vm11 = vcmp.eq.f32.partialorder %v7189_v43, %v990_v56 }
 0x1e8   : > { %vm7288_vm12 = vmpackc.low %vm1018_vm10, %vm1017_vm11  ;;  %v7293_v11 = vsel %vm1017_vm11, inf, %v7189_v43  ;;  %v9744_v43 = vmov 0 }
 0x1e9   : > { %v9742_v57 = vsel %vm7288_vm12, 4294967295, %v9741_v57  ;;  %5926 = vmatprep.mubr.msk.bf16.mxu1 %vm7288_vm12, %v9589_v52  ;;  %1085 = vmin.xlane.f32.xlu1 %v7293_v11 }
 0x1ea   : > { %9743 = vst [vmem:[#allocation23_spill] sm:$0xff] %v9742_v57  ;;  %v996_v9 = vpop.xlane.xlu1 %995 }
 0x1eb   : > { %vm1020_vm13 = vcmp.eq.f32.partialorder %v7197_v60, %v996_v9 }
 0x1ec   : > { %v7301_v13 = vsel %vm1020_vm13, inf, %v7197_v60 }
 0x1ed   : > { %1091 = vmin.xlane.f32.xlu1 %v7301_v13 }
 0x1ee   : > { %v994_v14 = vpop.xlane.xlu1 %993 }
 0x1ef   : > { %vm1019_vm14 = vcmp.eq.f32.partialorder %v7203_v2, %v994_v14 }
 0x1f0   : > { %vm7305_vm15 = vmpackc.low %vm1020_vm13, %vm1019_vm14  ;;  %v7310_v12 = vsel %vm1019_vm14, inf, %v7203_v2  ;;  %v9747_v2 = vmov 0 }
 0x1f1   : > { %v9745_v43 = vsel %vm7305_vm15, 4294967295, %v9744_v43  ;;  %5927 = vmatmul.mubr.msk.bf16.gmra.mrb[36].mxu1 %vm7305_vm15, %v9589_v52  ;;  %1089 = vmin.xlane.f32.xlu1 %v7310_v12 }
 0x1f2   : > { %9746 = vst [vmem:[#allocation24_spill] sm:$0xff] %v9745_v43  ;;  %v1000_v60 = vpop.xlane.xlu1 %999 }
 0x1f3   : > { %vm1022_vm1 = vcmp.eq.f32.partialorder %v7209_v10, %v1000_v60 }
 0x1f4   : > { %v7318_v22 = vsel %vm1022_vm1, inf, %v7209_v10 }
 0x1f5   : > { %1095 = vmin.xlane.f32.xlu1 %v7318_v22 }
 0x1f6   : > { %v998_v5 = vpop.xlane.xlu1 %997 }
 0x1f7   : > { %vm1021_vm3 = vcmp.eq.f32.partialorder %v7215_v27, %v998_v5 }
 0x1f8   : > { %vm7322_vm4 = vmpackc.low %vm1022_vm1, %vm1021_vm3  ;;  %v7327_v18 = vsel %vm1021_vm3, inf, %v7215_v27  ;;  %v9750_v27 = vmov 0 }
 0x1f9   : > { %v9748_v2 = vsel %vm7322_vm4, 4294967295, %v9747_v2  ;;  %5930 = vmatprep.mubr.msk.bf16.mxu1 %vm7322_vm4, %v9589_v52  ;;  %1093 = vmin.xlane.f32.xlu1 %v7327_v18 }
 0x1fa   : > { %9749 = vst [vmem:[#allocation25_spill] sm:$0xff] %v9748_v2  ;;  %v1004_v10 = vpop.xlane.xlu1 %1003 }
 0x1fb   : > { %vm1024_vm5 = vcmp.eq.f32.partialorder %v7221_v30, %v1004_v10 }
 0x1fc   : > { %v7335_v46 = vsel %vm1024_vm5, inf, %v7221_v30 }
 0x1fd   : > { %1099 = vmin.xlane.f32.xlu0 %v7335_v46 }
 0x1fe   : > { %v1002_v21 = vpop.xlane.xlu1 %1001 }
 0x1ff   : > { %vm1023_vm7 = vcmp.eq.f32.partialorder %v7227_v29, %v1002_v21 }
 0x200   : > { %vm7339_vm8 = vmpackc.low %vm1024_vm5, %vm1023_vm7  ;;  %v7344_v26 = vsel %vm1023_vm7, inf, %v7227_v29 }
 0x201   : > { %v9751_v27 = vsel %vm7339_vm8, 4294967295, %v9750_v27  ;;  %5931 = vmatmul.mubr.msk.bf16.gmra.mrb[40].mxu1 %vm7339_vm8, %v9589_v52  ;;  %1097 = vmin.xlane.f32.xlu1 %v7344_v26 }
 0x202   : > { %9752 = vst [vmem:[#allocation26_spill] sm:$0xff] %v9751_v27  ;;  %v1008_v30 = vpop.xlane.xlu1 %1007 }
 0x203   : > { %vm1026_vm10 = vcmp.eq.f32.partialorder %v7233_v1, %v1008_v30 }
 0x204   : > { %v7352_v23 = vsel %vm1026_vm10, inf, %v7233_v1 }
 0x205   : > { %1103 = vmin.xlane.f32.xlu1 %v7352_v23 }
 0x206   : > { %v1006_v49 = vpop.xlane.xlu1 %1005 }
 0x207   : > { %vm1025_vm11 = vcmp.eq.f32.partialorder %v7237_v61, %v1006_v49 }
 0x208   : > { %vm7356_vm13 = vmpackc.low %vm1026_vm10, %vm1025_vm11  ;;  %v7361_v15 = vsel %vm1025_vm11, inf, %v7237_v61  ;;  %v9759_v61 = vmov 0 }
 0x209   : > { %v9754_v54 = vsel %vm7356_vm13, 4294967295, %v9753_v54  ;;  %5934 = vmatprep.mubr.msk.bf16.mxu1 %vm7356_vm13, %v9589_v52  ;;  %1101 = vmin.xlane.f32.xlu1 %v7361_v15 }
 0x20a   : > { %9755 = vst [vmem:[#allocation27_spill] sm:$0xff] %v9754_v54  ;;  %v1010_v29 = vpop.xlane.xlu1 %1009 }
 0x20b   : > { %vm1027_vm14 = vcmp.eq.f32.partialorder %v7241_v32, %v1010_v29 }
 0x20c   : > { %v7369_v55 = vsel %vm1027_vm14, inf, %v7241_v32 }
 0x20d   : > { %1105 = vmin.xlane.f32.xlu1 %v7369_v55 }
 0x20e   : > { %v1012_v19 = vpop.xlane.xlu1 %1011 }
 0x20f   : > { %vm1028_vm1 = vcmp.eq.f32.partialorder %v7245_v53, %v1012_v19 }
 0x210   : > { %vm7373_vm3 = vmpackc.low %vm1028_vm1, %vm1027_vm14  ;;  %v7378_v59 = vsel %vm1028_vm1, inf, %v7245_v53 }
 0x211   : > { %v9757_v58 = vsel %vm7373_vm3, 4294967295, %v9756_v58  ;;  %5935 = vmatmul.mubr.msk.bf16.gmra.mrb[44].mxu1 %vm7373_vm3, %v9589_v52  ;;  %1107 = vmin.xlane.f32.xlu1 %v7378_v59 }
 0x212   : > { %9758 = vst [vmem:[#allocation28_spill] sm:$0xff] %v9757_v58 }
 0x262   : > { %v1080_v1 = vpop.xlane.xlu1 %1079 }
 0x263   : > { %vm1110_vm5 = vcmp.eq.f32.partialorder %v7250_v63, %v1080_v1 }
 0x264   : > { %v7386_v31 = vsel %vm1110_vm5, inf, %v7250_v63  ;;  %v9762_v63 = vmov 0 }
 0x265   : > { %1175 = vmin.xlane.f32.xlu1 %v7386_v31 }
 0x266   : > { %v1078_v17 = vpop.xlane.xlu1 %1077 }
 0x267   : > { %vm1109_vm7 = vcmp.eq.f32.partialorder %v7259_v4, %v1078_v17 }
 0x268   : > { %vm7390_vm10 = vmpackc.low %vm1110_vm5, %vm1109_vm7  ;;  %v7395_v25 = vsel %vm1109_vm7, inf, %v7259_v4 }
 0x269   : > { %v9760_v61 = vsel %vm7390_vm10, 4294967295, %v9759_v61  ;;  %5938 = vmatprep.mubr.msk.bf16.mxu1 %vm7390_vm10, %v9589_v52  ;;  %1173 = vmin.xlane.f32.xlu1 %v7395_v25 }
 0x26a   : > { %9761 = vst [vmem:[#allocation29_spill] sm:$0xff] %v9760_v61  ;;  %v1084_v32 = vpop.xlane.xlu1 %1083  ;;  %v9808_v61 = vmov 0 }
 0x26b   : > { %vm1112_vm11 = vcmp.eq.f32.partialorder %v7267_v3, %v1084_v32 }
 0x26c   : > { %v7403_v53 = vsel %vm1112_vm11, inf, %v7267_v3 }
 0x26d   : > { %1179 = vmin.xlane.f32.xlu1 %v7403_v53 }
 0x26e   : > { %v1082_v62 = vpop.xlane.xlu1 %1081 }
 0x26f   : > { %vm1111_vm14 = vcmp.eq.f32.partialorder %v7276_v7, %v1082_v62 }
 0x270   : > { %vm7407_vm1 = vmpackc.low %vm1112_vm11, %vm1111_vm14  ;;  %v7412_v0 = vsel %vm1111_vm14, inf, %v7276_v7 }
 0x271   : > { %v9763_v63 = vsel %vm7407_vm1, 4294967295, %v9762_v63  ;;  %5939 = vmatmul.mubr.msk.bf16.gmra.mrb[48].mxu1 %vm7407_vm1, %v9589_v52  ;;  %1177 = vmin.xlane.f32.xlu1 %v7412_v0 }
 0x272   : > { %9764 = vst [vmem:[#allocation30_spill] sm:$0xff] %v9763_v63  ;;  %v1088_v4 = vpop.xlane.xlu1 %1087  ;;  %v9787_v63 = vmov 0 }
 0x273   : > { %vm1114_vm5 = vcmp.eq.f32.partialorder %v7284_v28, %v1088_v4 }
 0x274   : > { %v7420_v20 = vsel %vm1114_vm5, inf, %v7284_v28 }
 0x275   : > { %1183 = vmin.xlane.f32.xlu1 %v7420_v20 }
 0x276   : > { %v1086_v3 = vpop.xlane.xlu1 %1085 }
 0x277   : > { %vm1113_vm7 = vcmp.eq.f32.partialorder %v7293_v11, %v1086_v3 }
 0x278   : > { %vm7424_vm11 = vmpackc.low %vm1114_vm5, %vm1113_vm7  ;;  %v7429_v7 = vsel %vm1113_vm7, inf, %v7293_v11  ;;  %v9768_v11 = vmov 0 }
 0x279   : > { %v9766_v24 = vsel %vm7424_vm11, 4294967295, %v9765_v24  ;;  %5942 = vmatprep.mubr.msk.bf16.mxu1 %vm7424_vm11, %v9589_v52  ;;  %1181 = vmin.xlane.f32.xlu1 %v7429_v7  ;;  %vm9934_vm11 = vcmask 23552  }
 0x27a   : > { %9767 = vst [vmem:[#allocation31_spill] sm:$0xff] %v9766_v24  ;;  %v1092_v16 = vpop.xlane.xlu1 %1091  ;;  %v9786_v24 = vmov 1.0|1.0  }
 0x27b   : > { %vm1116_vm14 = vcmp.eq.f32.partialorder %v7301_v13, %v1092_v16 }
 0x27c   : > { %v7437_v28 = vsel %vm1116_vm14, inf, %v7301_v13 }
 0x27d   : > { %1187 = vmin.xlane.f32.xlu0 %v7437_v28 }
 0x27e   : > { %v1090_v56 = vpop.xlane.xlu1 %1089 }
 0x27f   : > { %vm1115_vm5 = vcmp.eq.f32.partialorder %v7310_v12, %v1090_v56 }
 0x280   : > { %vm7441_vm0 = vmpackc.low %vm1116_vm14, %vm1115_vm5  ;;  %v7446_v9 = vsel %vm1115_vm5, inf, %v7310_v12  ;;  %v9771_v12 = vmov 0 }
 0x281   : > { %v9769_v11 = vsel %vm7441_vm0, 4294967295, %v9768_v11  ;;  %5943 = vmatmul.mubr.msk.bf16.gmra.mrb[52].mxu1 %vm7441_vm0, %v9589_v52  ;;  %1185 = vmin.xlane.f32.xlu1 %v7446_v9 }
 0x282   : > { %9770 = vst [vmem:[#allocation32_spill] sm:$0xff] %v9769_v11  ;;  %v1096_v13 = vpop.xlane.xlu1 %1095 }
 0x283   : > { %vm1118_vm7 = vcmp.eq.f32.partialorder %v7318_v22, %v1096_v13 }
 0x284   : > { %v7454_v14 = vsel %vm1118_vm7, inf, %v7318_v22 }
 0x285   : > { %1191 = vmin.xlane.f32.xlu0 %v7454_v14 }
 0x286   : > { %v1094_v60 = vpop.xlane.xlu1 %1093 }
 0x287   : > { %vm1117_vm14 = vcmp.eq.f32.partialorder %v7327_v18, %v1094_v60 }
 0x288   : > { %vm7458_vm2 = vmpackc.low %vm1118_vm7, %vm1117_vm14  ;;  %v7463_v5 = vsel %vm1117_vm14, inf, %v7327_v18  ;;  %v9774_v18 = vmov 0 }
 0x289   : > { %v9772_v12 = vsel %vm7458_vm2, 4294967295, %v9771_v12  ;;  %5946 = vmatprep.mubr.msk.bf16.mxu1 %vm7458_vm2, %v9589_v52  ;;  %1189 = vmin.xlane.f32.xlu1 %v7463_v5 }
 0x28a   : > { %9773 = vst [vmem:[#allocation33_spill] sm:$0xff] %v9772_v12  ;;  %v1100_v22 = vpop.xlane.xlu0 %1099  ;;  %v9783_v12 = vmov 0 }
 0x28b   : > { %vm1120_vm5 = vcmp.eq.f32.partialorder %v7335_v46, %v1100_v22 }
 0x28c   : > { %v7471_v10 = vsel %vm1120_vm5, inf, %v7335_v46 }
 0x28d   : > { %1195 = vmin.xlane.f32.xlu0 %v7471_v10 }
 0x28e   : > { %v1098_v21 = vpop.xlane.xlu1 %1097 }
 0x28f   : > { %vm1119_vm7 = vcmp.eq.f32.partialorder %v7344_v26, %v1098_v21 }
 0x290   : > { %vm7475_vm0 = vmpackc.low %vm1120_vm5, %vm1119_vm7  ;;  %v7480_v30 = vsel %vm1119_vm7, inf, %v7344_v26  ;;  %v9777_v26 = vmov 0 }
 0x291   : > { %v9775_v18 = vsel %vm7475_vm0, 4294967295, %v9774_v18  ;;  %5947 = vmatmul.mubr.msk.bf16.gmra.mrb[56].mxu1 %vm7475_vm0, %v9589_v52  ;;  %1193 = vmin.xlane.f32.xlu1 %v7480_v30 }
 0x292   : > { %9776 = vst [vmem:[#allocation34_spill] sm:$0xff] %v9775_v18  ;;  %v1104_v46 = vpop.xlane.xlu1 %1103 }
 0x293   : > { %vm1122_vm14 = vcmp.eq.f32.partialorder %v7352_v23, %v1104_v46 }
 0x294   : > { %v7488_v49 = vsel %vm1122_vm14, inf, %v7352_v23 }
 0x295   : > { %1199 = vmin.xlane.f32.xlu0 %v7488_v49 }
 0x296   : > { %v1102_v29 = vpop.xlane.xlu1 %1101 }
 0x297   : > { %vm1121_vm5 = vcmp.eq.f32.partialorder %v7361_v15, %v1102_v29 }
 0x298   : > { %vm7492_vm2 = vmpackc.low %vm1122_vm14, %vm1121_vm5  ;;  %v7497_v19 = vsel %vm1121_vm5, inf, %v7361_v15  ;;  %v9780_v15 = vmov 0 }
 0x299   : > { %v9778_v26 = vsel %vm7492_vm2, 4294967295, %v9777_v26  ;;  %5950 = vmatprep.mubr.msk.bf16.mxu1 %vm7492_vm2, %v9589_v52  ;;  %1197 = vmin.xlane.f32.xlu1 %v7497_v19 }
 0x29a   : > { %9779 = vst [vmem:[#allocation35_spill] sm:$0xff] %v9778_v26  ;;  %v1106_v23 = vpop.xlane.xlu1 %1105 }
 0x29b   : > { %vm1123_vm7 = vcmp.eq.f32.partialorder %v7369_v55, %v1106_v23 }
 0x29c   : > { %v7505_v1 = vsel %vm1123_vm7, inf, %v7369_v55 }
 0x29d   : > { %1201 = vmin.xlane.f32.xlu1 %v7505_v1 }
 0x29e   : > { %v1108_v17 = vpop.xlane.xlu1 %1107 }
 0x29f   : > { %vm1124_vm14 = vcmp.eq.f32.partialorder %v7378_v59, %v1108_v17 }
 0x2a0   : > { %vm7509_vm0 = vmpackc.low %vm1124_vm14, %vm1123_vm7  ;;  %v7514_v32 = vsel %vm1124_vm14, inf, %v7378_v59 }
 0x2a1   : > { %v9781_v15 = vsel %vm7509_vm0, 4294967295, %v9780_v15  ;;  %5951 = vmatmul.mubr.msk.bf16.gmra.mrb[60].mxu1 %vm7509_vm0, %v9589_v52  ;;  %1203 = vmin.xlane.f32.xlu0 %v7514_v32 }
 0x2a2   : > { %9782 = vst [vmem:[#allocation36_spill] sm:$0xff] %v9781_v15 }
 0x2b4   : > { %v7520_v55 = vpop.f32.mrb[32].mxu1 }
 0x2b5   : > { %v7522_v62 = vpop.f32.mrb[33].mxu1 }
 0x2b6   : > { %v7524_v4 = vpop.f32.mrb[34].mxu1 }
 0x2b7   : > { %v7526_v3 = vpop.f32.mrb[35].mxu1 }
 0x2c4   : > { %v7528_v16 = vpop.f32.mrb[36].mxu1 }
 0x2c5   : > { %v7530_v56 = vpop.f32.mrb[37].mxu1 }
 0x2c6   : > { %v7532_v59 = vpop.f32.mrb[38].mxu1 }
 0x2c7   : > { %v7534_v13 = vpop.f32.mrb[39].mxu1 }
 0x2d4   : > { %v7536_v60 = vpop.f32.mrb[40].mxu1 }
 0x2d5   : > { %v7538_v22 = vpop.f32.mrb[41].mxu1 }
 0x2d6   : > { %v7540_v21 = vpop.f32.mrb[42].mxu1 }
 0x2d7   : > { %v7542_v46 = vpop.f32.mrb[43].mxu1 }
 0x2e4   : > { %v7544_v29 = vpop.f32.mrb[44].mxu1 }
 0x2e5   : > { %v7546_v23 = vpop.f32.mrb[45].mxu1 }
 0x2e6   : > { %v7548_v17 = vpop.f32.mrb[46].mxu1 }
 0x2e7   : > { %v7550_v52 = vpop.f32.mrb[47].mxu1 }
 0x2f2   : > { %v1176_v15 = vpop.xlane.xlu1 %1175 }
 0x2f3   : > { %vm1206_vm5 = vcmp.eq.f32.partialorder %v7386_v31, %v1176_v15 }
 0x2f4   : > { %v7554_v26 = vsel %vm1206_vm5, inf, %v7386_v31 }
 0x2f5   : > { %1271 = vmin.xlane.f32.xlu0 %v7554_v26 }
 0x2f6   : > { %v1174_v18 = vpop.xlane.xlu1 %1173 }
 0x2f7   : > { %vm1205_vm7 = vcmp.eq.f32.partialorder %v7395_v25, %v1174_v18 }
 0x2f8   : > { %vm7558_vm14 = vmpackc.low %vm1206_vm5, %vm1205_vm7  ;;  %v7563_v11 = vsel %vm1205_vm7, inf, %v7395_v25 }
 0x2f9   : > { %v9784_v12 = vsel %vm7558_vm14, 4294967295, %v9783_v12  ;;  %5954 = vmatprep.mubr.msk.bf16.mxu1 %vm7558_vm14, %v9786_v24  ;;  %1269 = vmin.xlane.f32.xlu1 %v7563_v11 }
 0x2fa   : > { %9785 = vst [vmem:[#allocation37_spill] sm:$0xff] %v9784_v12  ;;  %v1180_v31 = vpop.xlane.xlu1 %1179  ;;  %v9790_v12 = vmov 0 }
 0x2fb   : > { %vm1208_vm0 = vcmp.eq.f32.partialorder %v7403_v53, %v1180_v31 }
 0x2fc   : > { %v7571_v15 = vsel %vm1208_vm0, inf, %v7403_v53 }
 0x2fd   : > { %1275 = vmin.xlane.f32.xlu0 %v7571_v15 }
 0x2fe   : > { %v1178_v18 = vpop.xlane.xlu1 %1177 }
 0x2ff   : > { %vm1207_vm5 = vcmp.eq.f32.partialorder %v7412_v0, %v1178_v18 }
 0x300   : > { %v7576_v25 = vsel %vm1207_vm5, inf, %v7412_v0  ;;  %vm7578_vm7 = vmpackc.low %vm1208_vm0, %vm1207_vm5 }
 0x301   : > { %v9788_v63 = vsel %vm7578_vm7, 4294967295, %v9787_v63  ;;  %5955 = vmatmul.mubr.msk.bf16.gmra.mrb[64].mxu1 %vm7578_vm7, %v9786_v24  ;;  %1273 = vmin.xlane.f32.xlu1 %v7576_v25 }
 0x302   : > { %9789 = vst [vmem:[#allocation38_spill] sm:$0xff] %v9788_v63  ;;  %v1184_v53 = vpop.xlane.xlu1 %1183  ;;  %v9793_v63 = vmov 0 }
 0x303   : > { %vm1210_vm14 = vcmp.eq.f32.partialorder %v7420_v20, %v1184_v53 }
 0x304   : > { %v7588_v31 = vsel %vm1210_vm14, inf, %v7420_v20 }
 0x305   : > { %1279 = vmin.xlane.f32.xlu0 %v7588_v31 }
 0x306   : > { %v1182_v0 = vpop.xlane.xlu1 %1181 }
 0x307   : > { %vm1209_vm0 = vcmp.eq.f32.partialorder %v7429_v7, %v1182_v0 }
 0x308   : > { %v7593_v18 = vsel %vm1209_vm0, inf, %v7429_v7  ;;  %vm7595_vm5 = vmpackc.low %vm1210_vm14, %vm1209_vm0 }
 0x309   : > { %v9791_v12 = vsel %vm7595_vm5, 4294967295, %v9790_v12  ;;  %5958 = vmatprep.mubr.msk.bf16.mxu1 %vm7595_vm5, %v9786_v24  ;;  %1277 = vmin.xlane.f32.xlu1 %v7593_v18 }
 0x30a   : > { %9792 = vst [vmem:[#allocation39_spill] sm:$0xff] %v9791_v12  ;;  %v1188_v20 = vpop.xlane.xlu0 %1187  ;;  %v9796_v12 = vmov 0 }
 0x30b   : > { %vm1212_vm7 = vcmp.eq.f32.partialorder %v7437_v28, %v1188_v20 }
 0x30c   : > { %v7605_v53 = vsel %vm1212_vm7, inf, %v7437_v28 }
 0x30d   : > { %1283 = vmin.xlane.f32.xlu0 %v7605_v53 }
 0x30e   : > { %v1186_v7 = vpop.xlane.xlu1 %1185 }
 0x30f   : > { %vm1211_vm14 = vcmp.eq.f32.partialorder %v7446_v9, %v1186_v7 }
 0x310   : > { %v7610_v0 = vsel %vm1211_vm14, inf, %v7446_v9  ;;  %vm7612_vm0 = vmpackc.low %vm1212_vm7, %vm1211_vm14 }
 0x311   : > { %v9794_v63 = vsel %vm7612_vm0, 4294967295, %v9793_v63  ;;  %5959 = vmatmul.mubr.msk.bf16.gmra.mrb[68].mxu1 %vm7612_vm0, %v9786_v24  ;;  %1281 = vmin.xlane.f32.xlu1 %v7610_v0 }
 0x312   : > { %9795 = vst [vmem:[#allocation40_spill] sm:$0xff] %v9794_v63  ;;  %v1192_v28 = vpop.xlane.xlu0 %1191  ;;  %v9799_v63 = vmov 0 }
 0x313   : > { %vm1214_vm5 = vcmp.eq.f32.partialorder %v7454_v14, %v1192_v28 }
 0x314   : > { %v7622_v20 = vsel %vm1214_vm5, inf, %v7454_v14 }
 0x315   : > { %1287 = vmin.xlane.f32.xlu0 %v7622_v20 }
 0x316   : > { %v1190_v9 = vpop.xlane.xlu1 %1189 }
 0x317   : > { %vm1213_vm7 = vcmp.eq.f32.partialorder %v7463_v5, %v1190_v9 }
 0x318   : > { %v7627_v7 = vsel %vm1213_vm7, inf, %v7463_v5  ;;  %vm7629_vm14 = vmpackc.low %vm1214_vm5, %vm1213_vm7 }
 0x319   : > { %v9797_v12 = vsel %vm7629_vm14, 4294967295, %v9796_v12  ;;  %5962 = vmatprep.mubr.msk.bf16.mxu1 %vm7629_vm14, %v9786_v24  ;;  %1285 = vmin.xlane.f32.xlu1 %v7627_v7 }
 0x31a   : > { %9798 = vst [vmem:[#allocation41_spill] sm:$0xff] %v9797_v12  ;;  %v1196_v14 = vpop.xlane.xlu0 %1195  ;;  %v9802_v12 = vmov 0 }
 0x31b   : > { %vm1216_vm0 = vcmp.eq.f32.partialorder %v7471_v10, %v1196_v14 }
 0x31c   : > { %v7639_v28 = vsel %vm1216_vm0, inf, %v7471_v10 }
 0x31d   : > { %1291 = vmin.xlane.f32.xlu0 %v7639_v28 }
 0x31e   : > { %v1194_v5 = vpop.xlane.xlu1 %1193 }
 0x31f   : > { %vm1215_vm5 = vcmp.eq.f32.partialorder %v7480_v30, %v1194_v5 }
 0x320   : > { %v7644_v9 = vsel %vm1215_vm5, inf, %v7480_v30  ;;  %vm7646_vm7 = vmpackc.low %vm1216_vm0, %vm1215_vm5 }
 0x321   : > { %v9800_v63 = vsel %vm7646_vm7, 4294967295, %v9799_v63  ;;  %5963 = vmatmul.mubr.msk.bf16.gmra.mrb[72].mxu1 %vm7646_vm7, %v9786_v24  ;;  %1289 = vmin.xlane.f32.xlu1 %v7644_v9 }
 0x322   : > { %9801 = vst [vmem:[#allocation42_spill] sm:$0xff] %v9800_v63  ;;  %v1200_v10 = vpop.xlane.xlu0 %1199  ;;  %v9805_v63 = vmov 0 }
 0x323   : > { %vm1218_vm14 = vcmp.eq.f32.partialorder %v7488_v49, %v1200_v10 }
 0x324   : > { %v7656_v14 = vsel %vm1218_vm14, inf, %v7488_v49 }
 0x325   : > { %1295 = vmin.xlane.f32.xlu0 %v7656_v14 }
 0x326   : > { %v1198_v30 = vpop.xlane.xlu1 %1197 }
 0x327   : > { %vm1217_vm0 = vcmp.eq.f32.partialorder %v7497_v19, %v1198_v30 }
 0x328   : > { %v7661_v5 = vsel %vm1217_vm0, inf, %v7497_v19  ;;  %vm7663_vm5 = vmpackc.low %vm1218_vm14, %vm1217_vm0 }
 0x329   : > { %v9803_v12 = vsel %vm7663_vm5, 4294967295, %v9802_v12  ;;  %5966 = vmatprep.mubr.msk.bf16.mxu1 %vm7663_vm5, %v9786_v24  ;;  %1293 = vmin.xlane.f32.xlu1 %v7661_v5 }
 0x32a   : > { %9804 = vst [vmem:[#allocation43_spill] sm:$0xff] %v9803_v12  ;;  %v1202_v49 = vpop.xlane.xlu1 %1201 }
 0x32b   : > { %vm1219_vm7 = vcmp.eq.f32.partialorder %v7505_v1, %v1202_v49 }
 0x32c   : > { %v7673_v10 = vsel %vm1219_vm7, inf, %v7505_v1 }
 0x32d   : > { %1297 = vmin.xlane.f32.xlu1 %v7673_v10 }
 0x32e   : > { %v1204_v19 = vpop.xlane.xlu0 %1203 }
 0x32f   : > { %vm1220_vm14 = vcmp.eq.f32.partialorder %v7514_v32, %v1204_v19 }
 0x330   : > { %v7678_v30 = vsel %vm1220_vm14, inf, %v7514_v32  ;;  %vm7680_vm0 = vmpackc.low %vm1220_vm14, %vm1219_vm7 }
 0x331   : > { %v9806_v63 = vsel %vm7680_vm0, 4294967295, %v9805_v63  ;;  %1299 = vmin.xlane.f32.xlu0 %v7678_v30  ;;  %5967 = vmatmul.mubr.msk.bf16.gmra.mrb[76].mxu1 %vm7680_vm0, %v9786_v24 }
 0x332   : > { %9807 = vst [vmem:[#allocation44_spill] sm:$0xff] %v9806_v63  ;;  %v9811_v63 = vmov 0 }
 0x344   : > { %v7688_v1 = vpop.f32.mrb[48].mxu1 }
 0x345   : > { %v7692_v12 = vpop.f32.mrb[49].mxu1 }
 0x346   : > { %v7696_v19 = vpop.f32.mrb[50].mxu1 }
 0x347   : > { %v7700_v58 = vpop.f32.mrb[51].mxu1  ;;  %v9834_v39 = vmax.f32 %v7524_v4, %v7696_v19 }
 0x348   : > { %v9835_v40 = vmax.f32 %v7526_v3, %v7700_v58 }
 0x354   : > { %v7704_v54 = vpop.f32.mrb[52].mxu1 }
 0x355   : > { %v7708_v27 = vpop.f32.mrb[53].mxu1 }
 0x356   : > { %v7712_v2 = vpop.f32.mrb[54].mxu1 }
 0x357   : > { %v7716_v43 = vpop.f32.mrb[55].mxu1 }
 0x358   : > { %v9839_v58 = vmax.f32 %v7534_v13, %v7716_v43 }
 0x364   : > { %v7720_v57 = vpop.f32.mrb[56].mxu1 }
 0x365   : > { %v7724_v6 = vpop.f32.mrb[57].mxu1  ;;  %v9840_v3 = vmax.f32 %v7536_v60, %v7720_v57 }
 0x366   : > { %v7728_v8 = vpop.f32.mrb[58].mxu1 }
 0x367   : > { %v7732_v47 = vpop.f32.mrb[59].mxu1 }
 0x368   : > { %v9843_v13 = vmax.f32 %v7542_v46, %v7732_v47 }
 0x374   : > { %v7736_v50 = vpop.f32.mrb[60].mxu1 }
 0x375   : > { %v7740_v48 = vpop.f32.mrb[61].mxu1  ;;  %v9844_v60 = vmax.f32 %v7544_v29, %v7736_v50 }
 0x376   : > { %v7744_v51 = vpop.f32.mrb[62].mxu1 }
 0x377   : > { %v7748_v41 = vpop.f32.mrb[63].mxu1 }
 0x378   : > { %v9847_v46 = vmax.f32 %v7550_v52, %v7748_v41 }
 0x382   : > { %v1272_v44 = vpop.xlane.xlu0 %1271 }
 0x383   : > { %vm1302_vm7 = vcmp.eq.f32.partialorder %v7554_v26, %v1272_v44 }
 0x384   : > { %v7754_v49 = vsel %vm1302_vm7, inf, %v7554_v26 }
 0x385   : > { %1367 = vmin.xlane.f32.xlu0 %v7754_v49 }
 0x386   : > { %v1270_v42 = vpop.xlane.xlu1 %1269 }
 0x387   : > { %vm1301_vm14 = vcmp.eq.f32.partialorder %v7563_v11, %v1270_v42 }
 0x388   : > { %v7759_v32 = vsel %vm1301_vm14, inf, %v7563_v11  ;;  %vm7761_vm0 = vmpackc.low %vm1302_vm7, %vm1301_vm14 }
 0x389   : > { %v9809_v61 = vsel %vm7761_vm0, 4294967295, %v9808_v61  ;;  %5970 = vmatprep.mubr.msk.bf16.mxu1 %vm7761_vm0, %v9786_v24  ;;  %1365 = vmin.xlane.f32.xlu1 %v7759_v32 }
 0x38a   : > { %9810 = vst [vmem:[#allocation45_spill] sm:$0xff] %v9809_v61  ;;  %v1276_v44 = vpop.xlane.xlu0 %1275  ;;  %v9814_v61 = vmov 0 }
 0x38b   : > { %vm1304_vm5 = vcmp.eq.f32.partialorder %v7571_v15, %v1276_v44 }
 0x38c   : > { %v7771_v26 = vsel %vm1304_vm5, inf, %v7571_v15 }
 0x38d   : > { %1371 = vmin.xlane.f32.xlu0 %v7771_v26 }
 0x38e   : > { %v1274_v42 = vpop.xlane.xlu1 %1273 }
 0x38f   : > { %vm1303_vm7 = vcmp.eq.f32.partialorder %v7576_v25, %v1274_v42 }
 0x390   : > { %v7776_v11 = vsel %vm1303_vm7, inf, %v7576_v25  ;;  %vm7778_vm14 = vmpackc.low %vm1304_vm5, %vm1303_vm7 }
 0x391   : > { %v9812_v63 = vsel %vm7778_vm14, 4294967295, %v9811_v63  ;;  %5971 = vmatmul.mubr.msk.bf16.gmra.mrb[80].mxu1 %vm7778_vm14, %v9786_v24  ;;  %1369 = vmin.xlane.f32.xlu1 %v7776_v11 }
 0x392   : > { %9813 = vst [vmem:[#allocation46_spill] sm:$0xff] %v9812_v63  ;;  %v1280_v15 = vpop.xlane.xlu0 %1279  ;;  %v9817_v63 = vmov 0 }
 0x393   : > { %vm1306_vm0 = vcmp.eq.f32.partialorder %v7588_v31, %v1280_v15 }
 0x394   : > { %v7788_v44 = vsel %vm1306_vm0, inf, %v7588_v31 }
 0x395   : > { %1375 = vmin.xlane.f32.xlu0 %v7788_v44 }
 0x396   : > { %v1278_v25 = vpop.xlane.xlu1 %1277 }
 0x397   : > { %vm1305_vm5 = vcmp.eq.f32.partialorder %v7593_v18, %v1278_v25 }
 0x398   : > { %v7793_v42 = vsel %vm1305_vm5, inf, %v7593_v18  ;;  %vm7795_vm7 = vmpackc.low %vm1306_vm0, %vm1305_vm5 }
 0x399   : > { %v9815_v61 = vsel %vm7795_vm7, 4294967295, %v9814_v61  ;;  %5974 = vmatprep.mubr.msk.bf16.mxu1 %vm7795_vm7, %v9786_v24  ;;  %1373 = vmin.xlane.f32.xlu1 %v7793_v42 }
 0x39a   : > { %9816 = vst [vmem:[#allocation47_spill] sm:$0xff] %v9815_v61  ;;  %v1284_v31 = vpop.xlane.xlu0 %1283  ;;  %v9820_v61 = vmov 0 }
 0x39b   : > { %vm1308_vm14 = vcmp.eq.f32.partialorder %v7605_v53, %v1284_v31 }
 0x39c   : > { %v7805_v15 = vsel %vm1308_vm14, inf, %v7605_v53 }
 0x39d   : > { %1379 = vmin.xlane.f32.xlu0 %v7805_v15 }
 0x39e   : > { %v1282_v18 = vpop.xlane.xlu1 %1281 }
 0x39f   : > { %vm1307_vm0 = vcmp.eq.f32.partialorder %v7610_v0, %v1282_v18 }
 0x3a0   : > { %v7810_v25 = vsel %vm1307_vm0, inf, %v7610_v0  ;;  %vm7812_vm5 = vmpackc.low %vm1308_vm14, %vm1307_vm0 }
 0x3a1   : > { %v9818_v63 = vsel %vm7812_vm5, 4294967295, %v9817_v63  ;;  %5975 = vmatmul.mubr.msk.bf16.gmra.mrb[84].mxu1 %vm7812_vm5, %v9786_v24  ;;  %1377 = vmin.xlane.f32.xlu1 %v7810_v25 }
 0x3a2   : > { %9819 = vst [vmem:[#allocation48_spill] sm:$0xff] %v9818_v63  ;;  %v1288_v53 = vpop.xlane.xlu0 %1287  ;;  %v9823_v63 = vmov 0 }
 0x3a3   : > { %vm1310_vm7 = vcmp.eq.f32.partialorder %v7622_v20, %v1288_v53 }
 0x3a4   : > { %v7822_v31 = vsel %vm1310_vm7, inf, %v7622_v20 }
 0x3a5   : > { %1383 = vmin.xlane.f32.xlu0 %v7822_v31 }
 0x3a6   : > { %v1286_v0 = vpop.xlane.xlu1 %1285 }
 0x3a7   : > { %vm1309_vm14 = vcmp.eq.f32.partialorder %v7627_v7, %v1286_v0 }
 0x3a8   : > { %v7827_v18 = vsel %vm1309_vm14, inf, %v7627_v7  ;;  %vm7829_vm0 = vmpackc.low %vm1310_vm7, %vm1309_vm14 }
 0x3a9   : > { %v9821_v61 = vsel %vm7829_vm0, 4294967295, %v9820_v61  ;;  %5978 = vmatprep.mubr.msk.bf16.mxu1 %vm7829_vm0, %v9786_v24  ;;  %1381 = vmin.xlane.f32.xlu1 %v7827_v18 }
 0x3aa   : > { %9822 = vst [vmem:[#allocation49_spill] sm:$0xff] %v9821_v61  ;;  %v1292_v20 = vpop.xlane.xlu0 %1291  ;;  %v9826_v61 = vmov 0 }
 0x3ab   : > { %vm1312_vm5 = vcmp.eq.f32.partialorder %v7639_v28, %v1292_v20 }
 0x3ac   : > { %v7839_v53 = vsel %vm1312_vm5, inf, %v7639_v28 }
 0x3ad   : > { %1387 = vmin.xlane.f32.xlu0 %v7839_v53 }
 0x3ae   : > { %v1290_v7 = vpop.xlane.xlu1 %1289 }
 0x3af   : > { %vm1311_vm7 = vcmp.eq.f32.partialorder %v7644_v9, %v1290_v7 }
 0x3b0   : > { %v7844_v0 = vsel %vm1311_vm7, inf, %v7644_v9  ;;  %vm7846_vm14 = vmpackc.low %vm1312_vm5, %vm1311_vm7 }
 0x3b1   : > { %v9824_v63 = vsel %vm7846_vm14, 4294967295, %v9823_v63  ;;  %5979 = vmatmul.mubr.msk.bf16.gmra.mrb[88].mxu1 %vm7846_vm14, %v9786_v24  ;;  %1385 = vmin.xlane.f32.xlu1 %v7844_v0 }
 0x3b2   : > { %9825 = vst [vmem:[#allocation50_spill] sm:$0xff] %v9824_v63  ;;  %v1296_v28 = vpop.xlane.xlu0 %1295  ;;  %v9829_v63 = vmov 0 }
 0x3b3   : > { %vm1314_vm0 = vcmp.eq.f32.partialorder %v7656_v14, %v1296_v28 }
 0x3b4   : > { %v7856_v20 = vsel %vm1314_vm0, inf, %v7656_v14 }
 0x3b5   : > { %1391 = vmin.xlane.f32.xlu0 %v7856_v20 }
 0x3b6   : > { %v1294_v9 = vpop.xlane.xlu1 %1293 }
 0x3b7   : > { %vm1313_vm5 = vcmp.eq.f32.partialorder %v7661_v5, %v1294_v9 }
 0x3b8   : > { %v7861_v7 = vsel %vm1313_vm5, inf, %v7661_v5  ;;  %vm7863_vm7 = vmpackc.low %vm1314_vm0, %vm1313_vm5 }
 0x3b9   : > { %v9827_v61 = vsel %vm7863_vm7, 4294967295, %v9826_v61  ;;  %5982 = vmatprep.mubr.msk.bf16.mxu1 %vm7863_vm7, %v9786_v24  ;;  %1389 = vmin.xlane.f32.xlu1 %v7861_v7 }
 0x3ba   : > { %9828 = vst [vmem:[#allocation51_spill] sm:$0xff] %v9827_v61  ;;  %v1298_v14 = vpop.xlane.xlu1 %1297 }
 0x3bb   : > { %vm1315_vm14 = vcmp.eq.f32.partialorder %v7673_v10, %v1298_v14  ;;  %v9832_v14 = vmax.f32 %v7520_v55, %v7688_v1  ;;  %v9836_v1 = vmax.f32 %v7528_v16, %v7704_v54 }
 0x3bc   : > { %v7873_v28 = vsel %vm1315_vm14, inf, %v7673_v10 }
 0x3bd   : > { %1393 = vmin.xlane.f32.xlu1 %v7873_v28 }
 0x3be   : > { %v1300_v5 = vpop.xlane.xlu0 %1299 }
 0x3bf   : > { %vm1316_vm0 = vcmp.eq.f32.partialorder %v7678_v30, %v1300_v5 }
 0x3c0   : > { %v7878_v9 = vsel %vm1316_vm0, inf, %v7678_v30  ;;  %vm7880_vm5 = vmpackc.low %vm1316_vm0, %vm1315_vm14  ;;  %v9833_v30 = vmax.f32 %v7522_v62, %v7692_v12  ;;  %v9837_v62 = vmax.f32 %v7530_v56, %v7708_v27  ;;  %v9841_v56 = vmax.f32 %v7538_v22, %v7724_v6 }
 0x3c1   : > { %v9830_v63 = vsel %vm7880_vm5, 4294967295, %v9829_v63  ;;  %1395 = vmin.xlane.f32.xlu0 %v7878_v9  ;;  %5983 = vmatmul.mubr.msk.bf16.gmra.mrb[92].mxu1 %vm7880_vm5, %v9786_v24  ;;  %v9845_v22 = vmax.f32 %v7546_v23, %v7740_v48  ;;  %v9848_v23 = vmov 0 }
 0x3c2   : > { %9831 = vst [vmem:[#allocation52_spill] sm:$0xff] %v9830_v63 }
 0x3d4   : > { %v5956_v10 = vpop.f32.mrb[64].mxu1 }
 0x3d5   : > { %v7891_v61 = vmax.f32 %v9832_v14, %v5956_v10  ;;  %v2358_v5 = vpop.f32.mrb[65].mxu1 }
 0x3d6   : > { %v7896_v45 = vmax.f32 %v9833_v30, %v2358_v5  ;;  %v5957_v37 = vpop.f32.mrb[66].mxu1 }
 0x3d7   : > { %v7901_v38 = vmax.f32 %v9834_v39, %v5957_v37  ;;  %v2361_v63 = vpop.f32.mrb[67].mxu1  ;;  %v9838_v39 = vmax.f32 %v7532_v59, %v7712_v2  ;;  %v9842_v59 = vmax.f32 %v7540_v21, %v7728_v8  ;;  %v9846_v21 = vmax.f32 %v7548_v17, %v7744_v51 }
 0x3d8   : > { %v7906_v33 = vmax.f32 %v9835_v40, %v2361_v63 }
 0x3e4   : > { %v5960_v55 = vpop.f32.mrb[68].mxu1 }
 0x3e5   : > { %v7911_v10 = vmax.f32 %v9836_v1, %v5960_v55  ;;  %v2374_v12 = vpop.f32.mrb[69].mxu1 }
 0x3e6   : > { %v7916_v14 = vmax.f32 %v9837_v62, %v2374_v12  ;;  %v5961_v37 = vpop.f32.mrb[70].mxu1 }
 0x3e7   : > { %v7921_v4 = vmax.f32 %v9838_v39, %v5961_v37  ;;  %v2377_v40 = vpop.f32.mrb[71].mxu1 }
 0x3e8   : > { %v7926_v63 = vmax.f32 %v9839_v58, %v2377_v40  ;;  %v9854_v40 = vmov 0 }
 0x3f4   : > { %v5964_v54 = vpop.f32.mrb[72].mxu1 }
 0x3f5   : > { %v7931_v16 = vmax.f32 %v9840_v3, %v5964_v54  ;;  %v2390_v27 = vpop.f32.mrb[73].mxu1  ;;  %v9857_v3 = vmov 0 }
 0x3f6   : > { %v7936_v19 = vmax.f32 %v9841_v56, %v2390_v27  ;;  %v5965_v2 = vpop.f32.mrb[74].mxu1 }
 0x3f7   : > { %v7941_v5 = vmax.f32 %v9842_v59, %v5965_v2  ;;  %v2393_v43 = vpop.f32.mrb[75].mxu1  ;;  %v9860_v2 = vmov 0 }
 0x3f8   : > { %v7946_v30 = vmax.f32 %v9843_v13, %v2393_v43  ;;  %v9863_v13 = vmov 0 }
 0x404   : > { %v5968_v57 = vpop.f32.mrb[76].mxu1 }
 0x405   : > { %v7951_v55 = vmax.f32 %v9844_v60, %v5968_v57  ;;  %v2406_v6 = vpop.f32.mrb[77].mxu1 }
 0x406   : > { %v7956_v1 = vmax.f32 %v9845_v22, %v2406_v6  ;;  %v5969_v8 = vpop.f32.mrb[78].mxu1  ;;  %v9866_v6 = vmov 0 }
 0x407   : > { %v7961_v12 = vmax.f32 %v9846_v21, %v5969_v8  ;;  %v2409_v47 = vpop.f32.mrb[79].mxu1  ;;  %v9869_v21 = vmov 0 }
 0x408   : > { %v7966_v62 = vmax.f32 %v9847_v46, %v2409_v47 }
 0x412   : > { %v1368_v50 = vpop.xlane.xlu0 %1367 }
 0x413   : > { %vm1398_vm14 = vcmp.eq.f32.partialorder %v7754_v49, %v1368_v50 }
 0x414   : > { %v7970_v29 = vsel %vm1398_vm14, inf, %v7754_v49 }
 0x415   : > { %1463 = vmin.xlane.f32.xlu0 %v7970_v29 }
 0x416   : > { %v1366_v48 = vpop.xlane.xlu1 %1365 }
 0x417   : > { %vm1397_vm0 = vcmp.eq.f32.partialorder %v7759_v32, %v1366_v48 }
 0x418   : > { %v7975_v51 = vsel %vm1397_vm0, inf, %v7759_v32  ;;  %vm7977_vm5 = vmpackc.low %vm1398_vm14, %vm1397_vm0  ;;  %v9851_v32 = vmov 0 }
 0x419   : > { %v9849_v23 = vsel %vm7977_vm5, 4294967295, %v9848_v23  ;;  %5986 = vmatprep.mubr.msk.bf16.mxu1 %vm7977_vm5, %v9786_v24  ;;  %1461 = vmin.xlane.f32.xlu1 %v7975_v51 }
 0x41a   : > { %9850 = vst [vmem:[#allocation53_spill] sm:$0xff] %v9849_v23  ;;  %v1372_v41 = vpop.xlane.xlu0 %1371 }
 0x41b   : > { %vm1400_vm7 = vcmp.eq.f32.partialorder %v7771_v26, %v1372_v41 }
 0x41c   : > { %v7987_v52 = vsel %vm1400_vm7, inf, %v7771_v26 }
 0x41d   : > { %1467 = vmin.xlane.f32.xlu0 %v7987_v52 }
 0x41e   : > { %v1370_v17 = vpop.xlane.xlu1 %1369 }
 0x41f   : > { %vm1399_vm14 = vcmp.eq.f32.partialorder %v7776_v11, %v1370_v17 }
 0x420   : > { %v7992_v49 = vsel %vm1399_vm14, inf, %v7776_v11  ;;  %vm7994_vm0 = vmpackc.low %vm1400_vm7, %vm1399_vm14 }
 0x421   : > { %v9852_v32 = vsel %vm7994_vm0, 4294967295, %v9851_v32  ;;  %5987 = vmatmul.mubr.msk.bf16.gmra.mrb[96].mxu1 %vm7994_vm0, %v9786_v24  ;;  %1465 = vmin.xlane.f32.xlu1 %v7992_v49 }
 0x422   : > { %9853 = vst [vmem:[#allocation54_spill] sm:$0xff] %v9852_v32  ;;  %v1376_v26 = vpop.xlane.xlu0 %1375 }
 0x423   : > { %vm1402_vm5 = vcmp.eq.f32.partialorder %v7788_v44, %v1376_v26 }
 0x424   : > { %v8004_v37 = vsel %vm1402_vm5, inf, %v7788_v44 }
 0x425   : > { %1471 = vmin.xlane.f32.xlu0 %v8004_v37 }
 0x426   : > { %v1374_v11 = vpop.xlane.xlu1 %1373 }
 0x427   : > { %vm1401_vm7 = vcmp.eq.f32.partialorder %v7793_v42, %v1374_v11 }
 0x428   : > { %v8009_v39 = vsel %vm1401_vm7, inf, %v7793_v42  ;;  %vm8011_vm14 = vmpackc.low %vm1402_vm5, %vm1401_vm7 }
 0x429   : > { %v9855_v40 = vsel %vm8011_vm14, 4294967295, %v9854_v40  ;;  %5990 = vmatprep.mubr.msk.bf16.mxu1 %vm8011_vm14, %v9786_v24  ;;  %1469 = vmin.xlane.f32.xlu1 %v8009_v39 }
 0x42a   : > { %9856 = vst [vmem:[#allocation55_spill] sm:$0xff] %v9855_v40  ;;  %v1380_v44 = vpop.xlane.xlu0 %1379 }
 0x42b   : > { %vm1404_vm0 = vcmp.eq.f32.partialorder %v7805_v15, %v1380_v44 }
 0x42c   : > { %v8021_v58 = vsel %vm1404_vm0, inf, %v7805_v15 }
 0x42d   : > { %1475 = vmin.xlane.f32.xlu0 %v8021_v58 }
 0x42e   : > { %v1378_v42 = vpop.xlane.xlu1 %1377 }
 0x42f   : > { %vm1403_vm5 = vcmp.eq.f32.partialorder %v7810_v25, %v1378_v42 }
 0x430   : > { %v8026_v54 = vsel %vm1403_vm5, inf, %v7810_v25  ;;  %vm8028_vm7 = vmpackc.low %vm1404_vm0, %vm1403_vm5 }
 0x431   : > { %v9858_v3 = vsel %vm8028_vm7, 4294967295, %v9857_v3  ;;  %5991 = vmatmul.mubr.msk.bf16.gmra.mrb[100].mxu1 %vm8028_vm7, %v9786_v24  ;;  %1473 = vmin.xlane.f32.xlu1 %v8026_v54 }
 0x432   : > { %9859 = vst [vmem:[#allocation56_spill] sm:$0xff] %v9858_v3  ;;  %v1384_v15 = vpop.xlane.xlu0 %1383 }
 0x433   : > { %vm1406_vm14 = vcmp.eq.f32.partialorder %v7822_v31, %v1384_v15 }
 0x434   : > { %v8038_v27 = vsel %vm1406_vm14, inf, %v7822_v31 }
 0x435   : > { %1479 = vmin.xlane.f32.xlu0 %v8038_v27 }
 0x436   : > { %v1382_v25 = vpop.xlane.xlu1 %1381 }
 0x437   : > { %vm1405_vm0 = vcmp.eq.f32.partialorder %v7827_v18, %v1382_v25  ;;  %v9872_v25 = vmov 0 }
 0x438   : > { %v8043_v56 = vsel %vm1405_vm0, inf, %v7827_v18  ;;  %vm8045_vm5 = vmpackc.low %vm1406_vm14, %vm1405_vm0 }
 0x439   : > { %v9861_v2 = vsel %vm8045_vm5, 4294967295, %v9860_v2  ;;  %5994 = vmatprep.mubr.msk.bf16.mxu1 %vm8045_vm5, %v9786_v24  ;;  %1477 = vmin.xlane.f32.xlu1 %v8043_v56 }
 0x43a   : > { %9862 = vst [vmem:[#allocation57_spill] sm:$0xff] %v9861_v2  ;;  %v1388_v31 = vpop.xlane.xlu0 %1387 }
 0x43b   : > { %vm1408_vm7 = vcmp.eq.f32.partialorder %v7839_v53, %v1388_v31 }
 0x43c   : > { %v8055_v59 = vsel %vm1408_vm7, inf, %v7839_v53 }
 0x43d   : > { %1483 = vmin.xlane.f32.xlu0 %v8055_v59 }
 0x43e   : > { %v1386_v18 = vpop.xlane.xlu1 %1385 }
 0x43f   : > { %vm1407_vm14 = vcmp.eq.f32.partialorder %v7844_v0, %v1386_v18  ;;  %v9875_v18 = vmov 0 }
 0x440   : > { %v8060_v43 = vsel %vm1407_vm14, inf, %v7844_v0  ;;  %vm8062_vm0 = vmpackc.low %vm1408_vm7, %vm1407_vm14 }
 0x441   : > { %v9864_v13 = vsel %vm8062_vm0, 4294967295, %v9863_v13  ;;  %5995 = vmatmul.mubr.msk.bf16.gmra.mrb[104].mxu1 %vm8062_vm0, %v9786_v24  ;;  %1481 = vmin.xlane.f32.xlu1 %v8060_v43 }
 0x442   : > { %9865 = vst [vmem:[#allocation58_spill] sm:$0xff] %v9864_v13  ;;  %v1392_v53 = vpop.xlane.xlu0 %1391 }
 0x443   : > { %vm1410_vm5 = vcmp.eq.f32.partialorder %v7856_v20, %v1392_v53 }
 0x444   : > { %v8072_v57 = vsel %vm1410_vm5, inf, %v7856_v20 }
 0x445   : > { %1487 = vmin.xlane.f32.xlu0 %v8072_v57 }
 0x446   : > { %v1390_v0 = vpop.xlane.xlu1 %1389 }
 0x447   : > { %vm1409_vm7 = vcmp.eq.f32.partialorder %v7861_v7, %v1390_v0 }
 0x448   : > { %v8077_v60 = vsel %vm1409_vm7, inf, %v7861_v7  ;;  %vm8079_vm14 = vmpackc.low %vm1410_vm5, %vm1409_vm7 }
 0x449   : > { %v9867_v6 = vsel %vm8079_vm14, 4294967295, %v9866_v6  ;;  %5998 = vmatprep.mubr.msk.bf16.mxu1 %vm8079_vm14, %v9786_v24  ;;  %1485 = vmin.xlane.f32.xlu1 %v8077_v60 }
 0x44a   : > { %9868 = vst [vmem:[#allocation59_spill] sm:$0xff] %v9867_v6  ;;  %v1394_v20 = vpop.xlane.xlu1 %1393 }
 0x44b   : > { %vm1411_vm0 = vcmp.eq.f32.partialorder %v7873_v28, %v1394_v20 }
 0x44c   : > { %v8089_v22 = vsel %vm1411_vm0, inf, %v7873_v28 }
 0x44d   : > { %1489 = vmin.xlane.f32.xlu1 %v8089_v22 }
 0x44e   : > { %v1396_v7 = vpop.xlane.xlu0 %1395 }
 0x44f   : > { %vm1412_vm5 = vcmp.eq.f32.partialorder %v7878_v9, %v1396_v7 }
 0x450   : > { %v8094_v8 = vsel %vm1412_vm5, inf, %v7878_v9  ;;  %vm8096_vm7 = vmpackc.low %vm1412_vm5, %vm1411_vm0 }
 0x451   : > { %v9870_v21 = vsel %vm8096_vm7, 4294967295, %v9869_v21  ;;  %1491 = vmin.xlane.f32.xlu0 %v8094_v8  ;;  %5999 = vmatmul.mubr.msk.bf16.gmra.mrb[108].mxu1 %vm8096_vm7, %v9786_v24 }
 0x452   : > { %9871 = vst [vmem:[#allocation60_spill] sm:$0xff] %v9870_v21 }
 0x464   : > { %v8104_v28 = vpop.f32.mrb[80].mxu1 }
 0x465   : > { %v8108_v46 = vpop.f32.mrb[81].mxu1 }
 0x466   : > { %v8112_v50 = vpop.f32.mrb[82].mxu1 }
 0x467   : > { %v8116_v41 = vpop.f32.mrb[83].mxu1  ;;  %v9898_v3 = vmax.f32 %v7901_v38, %v8112_v50 }
 0x468   : > { %v9899_v32 = vmax.f32 %v7906_v33, %v8116_v41 }
 0x474   : > { %v8120_v26 = vpop.f32.mrb[84].mxu1 }
 0x475   : > { %v8124_v44 = vpop.f32.mrb[85].mxu1 }
 0x476   : > { %v8128_v15 = vpop.f32.mrb[86].mxu1 }
 0x477   : > { %v8132_v31 = vpop.f32.mrb[87].mxu1 }
 0x484   : > { %v8136_v53 = vpop.f32.mrb[88].mxu1 }
 0x485   : > { %v8140_v20 = vpop.f32.mrb[89].mxu1  ;;  %v9904_v41 = vmax.f32 %v7931_v16, %v8136_v53 }
 0x486   : > { %v8144_v42 = vpop.f32.mrb[90].mxu1 }
 0x487   : > { %v8148_v11 = vpop.f32.mrb[91].mxu1 }
 0x494   : > { %v8152_v17 = vpop.f32.mrb[92].mxu1 }
 0x495   : > { %v8156_v48 = vpop.f32.mrb[93].mxu1  ;;  %v9908_v53 = vmax.f32 %v7951_v55, %v8152_v17 }
 0x496   : > { %v8160_v9 = vpop.f32.mrb[94].mxu1 }
 0x497   : > { %v8164_v47 = vpop.f32.mrb[95].mxu1 }
 0x4a2   : > { %v1464_v21 = vpop.xlane.xlu0 %1463 }
 0x4a3   : > { %vm1494_vm0 = vcmp.eq.f32.partialorder %v7970_v29, %v1464_v21 }
 0x4a4   : > { %v8170_v0 = vsel %vm1494_vm0, inf, %v7970_v29 }
 0x4a5   : > { %1559 = vmin.xlane.f32.xlu0 %v8170_v0 }
 0x4a6   : > { %v1462_v6 = vpop.xlane.xlu1 %1461 }
 0x4a7   : > { %vm1493_vm5 = vcmp.eq.f32.partialorder %v7975_v51, %v1462_v6 }
 0x4a8   : > { %v8175_v7 = vsel %vm1493_vm5, inf, %v7975_v51  ;;  %vm8177_vm7 = vmpackc.low %vm1494_vm0, %vm1493_vm5 }
 0x4a9   : > { %v9873_v25 = vsel %vm8177_vm7, 4294967295, %v9872_v25  ;;  %6002 = vmatprep.mubr.msk.bf16.mxu1 %vm8177_vm7, %v9786_v24  ;;  %1557 = vmin.xlane.f32.xlu1 %v8175_v7 }
 0x4aa   : > { %9874 = vst [vmem:[#allocation61_spill] sm:$0xff] %v9873_v25  ;;  %v1468_v29 = vpop.xlane.xlu0 %1467  ;;  %v9878_v25 = vmov 0 }
 0x4ab   : > { %vm1496_vm14 = vcmp.eq.f32.partialorder %v7987_v52, %v1468_v29 }
 0x4ac   : > { %v8187_v21 = vsel %vm1496_vm14, inf, %v7987_v52 }
 0x4ad   : > { %1563 = vmin.xlane.f32.xlu0 %v8187_v21 }
 0x4ae   : > { %v1466_v51 = vpop.xlane.xlu1 %1465 }
 0x4af   : > { %vm1495_vm0 = vcmp.eq.f32.partialorder %v7992_v49, %v1466_v51 }
 0x4b0   : > { %v8192_v6 = vsel %vm1495_vm0, inf, %v7992_v49  ;;  %vm8194_vm5 = vmpackc.low %vm1496_vm14, %vm1495_vm0 }
 0x4b1   : > { %v9876_v18 = vsel %vm8194_vm5, 4294967295, %v9875_v18  ;;  %6003 = vmatmul.mubr.msk.bf16.gmra.mrb[112].mxu1 %vm8194_vm5, %v9786_v24  ;;  %1561 = vmin.xlane.f32.xlu1 %v8192_v6 }
 0x4b2   : > { %9877 = vst [vmem:[#allocation62_spill] sm:$0xff] %v9876_v18  ;;  %v1472_v52 = vpop.xlane.xlu0 %1471  ;;  %v9881_v18 = vmov 0 }
 0x4b3   : > { %vm1498_vm7 = vcmp.eq.f32.partialorder %v8004_v37, %v1472_v52 }
 0x4b4   : > { %v8204_v29 = vsel %vm1498_vm7, inf, %v8004_v37 }
 0x4b5   : > { %1567 = vmin.xlane.f32.xlu0 %v8204_v29 }
 0x4b6   : > { %v1470_v49 = vpop.xlane.xlu1 %1469 }
 0x4b7   : > { %vm1497_vm14 = vcmp.eq.f32.partialorder %v8009_v39, %v1470_v49 }
 0x4b8   : > { %v8209_v51 = vsel %vm1497_vm14, inf, %v8009_v39  ;;  %vm8211_vm0 = vmpackc.low %vm1498_vm7, %vm1497_vm14 }
 0x4b9   : > { %v9879_v25 = vsel %vm8211_vm0, 4294967295, %v9878_v25  ;;  %6006 = vmatprep.mubr.msk.bf16.mxu1 %vm8211_vm0, %v9786_v24  ;;  %1565 = vmin.xlane.f32.xlu1 %v8209_v51 }
 0x4ba   : > { %9880 = vst [vmem:[#allocation63_spill] sm:$0xff] %v9879_v25  ;;  %v1476_v37 = vpop.xlane.xlu0 %1475  ;;  %v9884_v25 = vmov 0 }
 0x4bb   : > { %vm1500_vm5 = vcmp.eq.f32.partialorder %v8021_v58, %v1476_v37 }
 0x4bc   : > { %v8221_v52 = vsel %vm1500_vm5, inf, %v8021_v58 }
 0x4bd   : > { %1571 = vmin.xlane.f32.xlu0 %v8221_v52 }
 0x4be   : > { %v1474_v39 = vpop.xlane.xlu1 %1473 }
 0x4bf   : > { %vm1499_vm7 = vcmp.eq.f32.partialorder %v8026_v54, %v1474_v39 }
 0x4c0   : > { %v8226_v49 = vsel %vm1499_vm7, inf, %v8026_v54  ;;  %vm8228_vm14 = vmpackc.low %vm1500_vm5, %vm1499_vm7 }
 0x4c1   : > { %v9882_v18 = vsel %vm8228_vm14, 4294967295, %v9881_v18  ;;  %6007 = vmatmul.mubr.msk.bf16.gmra.mrb[116].mxu1 %vm8228_vm14, %v9786_v24  ;;  %1569 = vmin.xlane.f32.xlu1 %v8226_v49 }
 0x4c2   : > { %9883 = vst [vmem:[#allocation64_spill] sm:$0xff] %v9882_v18  ;;  %v1480_v58 = vpop.xlane.xlu0 %1479  ;;  %v9887_v18 = vmov 0 }
 0x4c3   : > { %vm1502_vm0 = vcmp.eq.f32.partialorder %v8038_v27, %v1480_v58 }
 0x4c4   : > { %v8238_v37 = vsel %vm1502_vm0, inf, %v8038_v27 }
 0x4c5   : > { %1575 = vmin.xlane.f32.xlu0 %v8238_v37 }
 0x4c6   : > { %v1478_v54 = vpop.xlane.xlu1 %1477 }
 0x4c7   : > { %vm1501_vm5 = vcmp.eq.f32.partialorder %v8043_v56, %v1478_v54 }
 0x4c8   : > { %v8243_v39 = vsel %vm1501_vm5, inf, %v8043_v56  ;;  %vm8245_vm7 = vmpackc.low %vm1502_vm0, %vm1501_vm5 }
 0x4c9   : > { %v9885_v25 = vsel %vm8245_vm7, 4294967295, %v9884_v25  ;;  %6010 = vmatprep.mubr.msk.bf16.mxu1 %vm8245_vm7, %v9786_v24  ;;  %1573 = vmin.xlane.f32.xlu1 %v8243_v39 }
 0x4ca   : > { %9886 = vst [vmem:[#allocation65_spill] sm:$0xff] %v9885_v25  ;;  %v1484_v27 = vpop.xlane.xlu0 %1483  ;;  %v9890_v25 = vmov 0 }
 0x4cb   : > { %vm1504_vm14 = vcmp.eq.f32.partialorder %v8055_v59, %v1484_v27 }
 0x4cc   : > { %v8255_v58 = vsel %vm1504_vm14, inf, %v8055_v59 }
 0x4cd   : > { %1579 = vmin.xlane.f32.xlu0 %v8255_v58 }
 0x4ce   : > { %v1482_v56 = vpop.xlane.xlu1 %1481 }
 0x4cf   : > { %vm1503_vm0 = vcmp.eq.f32.partialorder %v8060_v43, %v1482_v56 }
 0x4d0   : > { %v8260_v54 = vsel %vm1503_vm0, inf, %v8060_v43  ;;  %vm8262_vm5 = vmpackc.low %vm1504_vm14, %vm1503_vm0 }
 0x4d1   : > { %v9888_v18 = vsel %vm8262_vm5, 4294967295, %v9887_v18  ;;  %6011 = vmatmul.mubr.msk.bf16.gmra.mrb[120].mxu1 %vm8262_vm5, %v9786_v24  ;;  %1577 = vmin.xlane.f32.xlu1 %v8260_v54 }
 0x4d2   : > { %9889 = vst [vmem:[#allocation66_spill] sm:$0xff] %v9888_v18  ;;  %v1488_v59 = vpop.xlane.xlu0 %1487  ;;  %v9893_v18 = vmov 0 }
 0x4d3   : > { %vm1506_vm7 = vcmp.eq.f32.partialorder %v8072_v57, %v1488_v59 }
 0x4d4   : > { %v8272_v27 = vsel %vm1506_vm7, inf, %v8072_v57 }
 0x4d5   : > { %1583 = vmin.xlane.f32.xlu0 %v8272_v27 }
 0x4d6   : > { %v1486_v43 = vpop.xlane.xlu1 %1485 }
 0x4d7   : > { %vm1505_vm14 = vcmp.eq.f32.partialorder %v8077_v60, %v1486_v43 }
 0x4d8   : > { %v8277_v56 = vsel %vm1505_vm14, inf, %v8077_v60  ;;  %vm8279_vm0 = vmpackc.low %vm1506_vm7, %vm1505_vm14 }
 0x4d9   : > { %v9891_v25 = vsel %vm8279_vm0, 4294967295, %v9890_v25  ;;  %6014 = vmatprep.mubr.msk.bf16.mxu1 %vm8279_vm0, %v9786_v24  ;;  %1581 = vmin.xlane.f32.xlu1 %v8277_v56 }
 0x4da   : > { %9892 = vst [vmem:[#allocation67_spill] sm:$0xff] %v9891_v25  ;;  %v1490_v57 = vpop.xlane.xlu1 %1489 }
 0x4db   : > { %vm1507_vm5 = vcmp.eq.f32.partialorder %v8089_v22, %v1490_v57  ;;  %v9896_v57 = vmax.f32 %v7891_v61, %v8104_v28  ;;  %v9900_v28 = vmax.f32 %v7911_v10, %v8120_v26 }
 0x4dc   : > { %v8289_v59 = vsel %vm1507_vm5, inf, %v8089_v22 }
 0x4dd   : > { %1585 = vmin.xlane.f32.xlu1 %v8289_v59 }
 0x4de   : > { %v1492_v60 = vpop.xlane.xlu0 %1491 }
 0x4df   : > { %vm1508_vm7 = vcmp.eq.f32.partialorder %v8094_v8, %v1492_v60 }
 0x4e0   : > { %v8294_v43 = vsel %vm1508_vm7, inf, %v8094_v8  ;;  %vm8296_vm14 = vmpackc.low %vm1508_vm7, %vm1507_vm5  ;;  %v9897_v8 = vmax.f32 %v7896_v45, %v8108_v46  ;;  %v9901_v46 = vmax.f32 %v7916_v14, %v8124_v44  ;;  %v9905_v44 = vmax.f32 %v7936_v19, %v8140_v20 }
 0x4e1   : > { %v9894_v18 = vsel %vm8296_vm14, 4294967295, %v9893_v18  ;;  %1587 = vmin.xlane.f32.xlu0 %v8294_v43  ;;  %6015 = vmatmul.mubr.msk.bf16.gmra.mrb[124].mxu1 %vm8296_vm14, %v9786_v24  ;;  %v9909_v20 = vmax.f32 %v7956_v1, %v8156_v48 }
 0x4e2   : > { %9895 = vst [vmem:[#allocation68_spill] sm:$0xff] %v9894_v18 }
 0x4f4   : > { %v5988_v22 = vpop.f32.mrb[96].mxu1 }
 0x4f5   : > { %v8307_v25 = vmax.f32 %v9896_v57, %v5988_v22  ;;  %v2486_v60 = vpop.f32.mrb[97].mxu1 }
 0x4f6   : > { %v8312_v13 = vmax.f32 %v9897_v8, %v2486_v60  ;;  %v5989_v2 = vpop.f32.mrb[98].mxu1 }
 0x4f7   : > { %v8317_v40 = vmax.f32 %v9898_v3, %v5989_v2  ;;  %v2489_v18 = vpop.f32.mrb[99].mxu1  ;;  %v9902_v3 = vmax.f32 %v7921_v4, %v8128_v15  ;;  %v9906_v15 = vmax.f32 %v7941_v5, %v8144_v42  ;;  %v9910_v42 = vmax.f32 %v7961_v12, %v8160_v9 }
 0x4f8   : > { %v8322_v23 = vmax.f32 %v9899_v32, %v2489_v18  ;;  %v9903_v32 = vmax.f32 %v7926_v63, %v8132_v31  ;;  %v9907_v31 = vmax.f32 %v7946_v30, %v8148_v11  ;;  %v9911_v11 = vmax.f32 %v7966_v62, %v8164_v47 }
 0x4f9   : > { %v9912_v9 = vmov 0 }
 0x504   : > { %v5992_v61 = vpop.f32.mrb[100].mxu1 }
 0x505   : > { %v8327_v22 = vmax.f32 %v9900_v28, %v5992_v61  ;;  %v2502_v45 = vpop.f32.mrb[101].mxu1 }
 0x506   : > { %v8332_v57 = vmax.f32 %v9901_v46, %v2502_v45  ;;  %v5993_v38 = vpop.f32.mrb[102].mxu1 }
 0x507   : > { %v8337_v2 = vmax.f32 %v9902_v3, %v5993_v38  ;;  %v2505_v33 = vpop.f32.mrb[103].mxu1 }
 0x508   : > { %v8342_v50 = vmax.f32 %v9903_v32, %v2505_v33  ;;  %v9916_v33 = vmov 0 }
 0x514   : > { %v5996_v10 = vpop.f32.mrb[104].mxu1 }
 0x515   : > { %v8347_v26 = vmax.f32 %v9904_v41, %v5996_v10  ;;  %v2518_v14 = vpop.f32.mrb[105].mxu1  ;;  %v9918_v41 = vmov 0 }
 0x516   : > { %v8352_v18 = vmax.f32 %v9905_v44, %v2518_v14  ;;  %v5997_v4 = vpop.f32.mrb[106].mxu1 }
 0x517   : > { %v8357_v60 = vmax.f32 %v9906_v15, %v5997_v4  ;;  %v2521_v63 = vpop.f32.mrb[107].mxu1  ;;  %v9920_v4 = vmov 0 }
 0x518   : > { %v8362_v8 = vmax.f32 %v9907_v31, %v2521_v63  ;;  %v9922_v31 = vmov 0 }
 0x524   : > { %v6000_v16 = vpop.f32.mrb[108].mxu1 }
 0x525   : > { %v8367_v61 = vmax.f32 %v9908_v53, %v6000_v16  ;;  %v2534_v19 = vpop.f32.mrb[109].mxu1 }
 0x526   : > { %v8372_v28 = vmax.f32 %v9909_v20, %v2534_v19  ;;  %v6001_v5 = vpop.f32.mrb[110].mxu1  ;;  %v9924_v19 = vmov 0 }
 0x527   : > { %v8377_v45 = vmax.f32 %v9910_v42, %v6001_v5  ;;  %v2537_v30 = vpop.f32.mrb[111].mxu1  ;;  %v9927_v42 = vmov 0 }
 0x528   : > { %v8382_v46 = vmax.f32 %v9911_v11, %v2537_v30 }
 0x532   : > { %v1560_v55 = vpop.xlane.xlu0 %1559 }
 0x533   : > { %vm1590_vm5 = vcmp.eq.f32.partialorder %v8170_v0, %v1560_v55 }
 0x534   : > { %v8386_v17 = vsel %vm1590_vm5, inf, %v8170_v0 }
 0x535   : > { %1655 = vmin.xlane.f32.xlu0 %v8386_v17 }
 0x536   : > { %v1558_v1 = vpop.xlane.xlu1 %1557 }
 0x537   : > { %vm1589_vm7 = vcmp.eq.f32.partialorder %v8175_v7, %v1558_v1 }
 0x538   : > { %v8391_v12 = vsel %vm1589_vm7, inf, %v8175_v7  ;;  %vm8393_vm14 = vmpackc.low %vm1590_vm5, %vm1589_vm7  ;;  %v9914_v7 = vmov 0 }
 0x539   : > { %v9913_v9 = vsel %vm8393_vm14, 4294967295, %v9912_v9  ;;  %6018 = vmatprep.mubr.msk.bf16.mxu1 %vm8393_vm14, %v9786_v24  ;;  %1653 = vmin.xlane.f32.xlu1 %v8391_v12 }
 0x53a   : > { %v1564_v62 = vpop.xlane.xlu0 %1563 }
 0x53b   : > { %vm1592_vm0 = vcmp.eq.f32.partialorder %v8187_v21, %v1564_v62 }
 0x53c   : > { %v8403_v47 = vsel %vm1592_vm0, inf, %v8187_v21 }
 0x53d   : > { %1659 = vmin.xlane.f32.xlu0 %v8403_v47 }
 0x53e   : > { %v1562_v48 = vpop.xlane.xlu1 %1561 }
 0x53f   : > { %vm1591_vm5 = vcmp.eq.f32.partialorder %v8192_v6, %v1562_v48 }
 0x540   : > { %v8408_v0 = vsel %vm1591_vm5, inf, %v8192_v6  ;;  %vm8410_vm7 = vmpackc.low %vm1592_vm0, %vm1591_vm5 }
 0x541   : > { %v9915_v7 = vsel %vm8410_vm7, 4294967295, %v9914_v7  ;;  %6019 = vmatmul.mubr.msk.bf16.gmra.mrb[128].mxu1 %vm8410_vm7, %v9786_v24  ;;  %1657 = vmin.xlane.f32.xlu1 %v8408_v0 }
 0x542   : > { %v1568_v21 = vpop.xlane.xlu0 %1567 }
 0x543   : > { %vm1594_vm14 = vcmp.eq.f32.partialorder %v8204_v29, %v1568_v21 }
 0x544   : > { %v8420_v38 = vsel %vm1594_vm14, inf, %v8204_v29 }
 0x545   : > { %1663 = vmin.xlane.f32.xlu0 %v8420_v38 }
 0x546   : > { %v1566_v6 = vpop.xlane.xlu1 %1565 }
 0x547   : > { %vm1593_vm0 = vcmp.eq.f32.partialorder %v8209_v51, %v1566_v6 }
 0x548   : > { %v8425_v3 = vsel %vm1593_vm0, inf, %v8209_v51  ;;  %vm8427_vm5 = vmpackc.low %vm1594_vm14, %vm1593_vm0 }
 0x549   : > { %v9917_v33 = vsel %vm8427_vm5, 4294967295, %v9916_v33  ;;  %6022 = vmatprep.mubr.msk.bf16.mxu1 %vm8427_vm5, %v9786_v24  ;;  %1661 = vmin.xlane.f32.xlu1 %v8425_v3 }
 0x54a   : > { %v1572_v29 = vpop.xlane.xlu0 %1571 }
 0x54b   : > { %vm1596_vm7 = vcmp.eq.f32.partialorder %v8221_v52, %v1572_v29 }
 0x54c   : > { %v8437_v32 = vsel %vm1596_vm7, inf, %v8221_v52 }
 0x54d   : > { %1667 = vmin.xlane.f32.xlu0 %v8437_v32 }
 0x54e   : > { %v1570_v51 = vpop.xlane.xlu1 %1569 }
 0x54f   : > { %vm1595_vm14 = vcmp.eq.f32.partialorder %v8226_v49, %v1570_v51 }
 0x550   : > { %v8442_v10 = vsel %vm1595_vm14, inf, %v8226_v49  ;;  %vm8444_vm0 = vmpackc.low %vm1596_vm7, %vm1595_vm14 }
 0x551   : > { %v9919_v41 = vsel %vm8444_vm0, 4294967295, %v9918_v41  ;;  %6023 = vmatmul.mubr.msk.bf16.gmra.mrb[132].mxu1 %vm8444_vm0, %v9786_v24  ;;  %1665 = vmin.xlane.f32.xlu1 %v8442_v10 }
 0x552   : > { %v1576_v52 = vpop.xlane.xlu0 %1575 }
 0x553   : > { %vm1598_vm5 = vcmp.eq.f32.partialorder %v8238_v37, %v1576_v52 }
 0x554   : > { %v8454_v14 = vsel %vm1598_vm5, inf, %v8238_v37 }
 0x555   : > { %1671 = vmin.xlane.f32.xlu0 %v8454_v14 }
 0x556   : > { %v1574_v49 = vpop.xlane.xlu1 %1573 }
 0x557   : > { %vm1597_vm7 = vcmp.eq.f32.partialorder %v8243_v39, %v1574_v49  ;;  %v2917_v49 = vld [vmem:[%s9572_s5] sm:$0x7] }
 0x558   : > { %v8459_v44 = vsel %vm1597_vm7, inf, %v8243_v39  ;;  %vm8461_vm14 = vmpackc.low %vm1598_vm5, %vm1597_vm7 }
 0x559   : > { %v9921_v4 = vsel %vm8461_vm14, 4294967295, %v9920_v4  ;;  %6026 = vmatprep.mubr.msk.bf16.mxu1 %vm8461_vm14, %v9786_v24  ;;  %1669 = vmin.xlane.f32.xlu1 %v8459_v44 }
 0x55a   : > { %v1580_v37 = vpop.xlane.xlu0 %1579 }
 0x55b   : > { %vm1600_vm0 = vcmp.eq.f32.partialorder %v8255_v58, %v1580_v37 }
 0x55c   : > { %v8471_v15 = vsel %vm1600_vm0, inf, %v8255_v58 }
 0x55d   : > { %1675 = vmin.xlane.f32.xlu0 %v8471_v15 }
 0x55e   : > { %v1578_v39 = vpop.xlane.xlu1 %1577 }
 0x55f   : > { %vm1599_vm5 = vcmp.eq.f32.partialorder %v8260_v54, %v1578_v39  ;;  %v6533_v39 = vld [vmem:[%s6785_s25 + $0x18] sm:$0xff] }
 0x560   : > { %v8476_v63 = vsel %vm1599_vm5, inf, %v8260_v54  ;;  %vm8478_vm7 = vmpackc.low %vm1600_vm0, %vm1599_vm5 }
 0x561   : > { %v9923_v31 = vsel %vm8478_vm7, 4294967295, %v9922_v31  ;;  %6027 = vmatmul.mubr.msk.bf16.gmra.mrb[136].mxu1 %vm8478_vm7, %v9786_v24  ;;  %1673 = vmin.xlane.f32.xlu1 %v8476_v63 }
 0x562   : > { %v1584_v58 = vpop.xlane.xlu0 %1583 }
 0x563   : > { %vm1602_vm14 = vcmp.eq.f32.partialorder %v8272_v27, %v1584_v58 }
 0x564   : > { %v8488_v16 = vsel %vm1602_vm14, inf, %v8272_v27 }
 0x565   : > { %1679 = vmin.xlane.f32.xlu0 %v8488_v16 }
 0x566   : > { %v1582_v54 = vpop.xlane.xlu1 %1581 }
 0x567   : > { %vm1601_vm0 = vcmp.eq.f32.partialorder %v8277_v56, %v1582_v54 }
 0x568   : > { %v8493_v53 = vsel %vm1601_vm0, inf, %v8277_v56  ;;  %vm8495_vm5 = vmpackc.low %vm1602_vm14, %vm1601_vm0 }
 0x569   : > { %v9925_v19 = vsel %vm8495_vm5, 4294967295, %v9924_v19  ;;  %6030 = vmatprep.mubr.msk.bf16.mxu1 %vm8495_vm5, %v9786_v24  ;;  %1677 = vmin.xlane.f32.xlu1 %v8493_v53  ;;  %vm9932_vm5 = vcmask 1042432  }
 0x56a   : > { %9926 = vst [vmem:[#allocation69_spill] sm:$0xff] %v9925_v19  ;;  %v1586_v27 = vpop.xlane.xlu1 %1585  ;;  %6050 = vmatprep.subr.msk.mxu0 %vm9932_vm5, %v2917_v49  ;;  %vm9933_vm2 = vmmov %vm9932_vm5 }
 0x56b   : > { %vm1603_vm7 = vcmp.eq.f32.partialorder %v8289_v59, %v1586_v27  ;;  %6051 = vmatpush3.msk.msra.mxu0 %vm9933_vm2, %v2917_v49  ;;  %v9937_v49 = vmov 0 }
 0x56c   : > { %v8505_v20 = vsel %vm1603_vm7, inf, %v8289_v59 }
 0x56d   : > { %1681 = vmin.xlane.f32.xlu1 %v8505_v20 }
 0x56e   : > { %v1588_v56 = vpop.xlane.xlu0 %1587 }
 0x56f   : > { %vm1604_vm14 = vcmp.eq.f32.partialorder %v8294_v43, %v1588_v56  ;;  %v9930_v56 = vmov 0 }
 0x570   : > { %v8510_v5 = vsel %vm1604_vm14, inf, %v8294_v43  ;;  %vm8512_vm0 = vmpackc.low %vm1604_vm14, %vm1603_vm7 }
 0x571   : > { %v9928_v42 = vsel %vm8512_vm0, 4294967295, %v9927_v42  ;;  %1683 = vmin.xlane.f32.xlu0 %v8510_v5  ;;  %6031 = vmatmul.mubr.msk.bf16.gmra.mrb[140].mxu1 %vm8512_vm0, %v9786_v24 }
 0x572   : > { %9929 = vst [vmem:[#allocation70_spill] sm:$0xff] %v9928_v42 }
 0x584   : > { %v8520_v59 = vpop.f32.mrb[112].mxu1 }
 0x585   : > { %v8524_v11 = vpop.f32.mrb[113].mxu1 }
 0x586   : > { %v8528_v55 = vpop.f32.mrb[114].mxu1 }
 0x587   : > { %v8532_v62 = vpop.f32.mrb[115].mxu1 }
 0x594   : > { %v8536_v21 = vpop.f32.mrb[116].mxu1 }
 0x595   : > { %v8540_v29 = vpop.f32.mrb[117].mxu1 }
 0x596   : > { %v8544_v52 = vpop.f32.mrb[118].mxu1 }
 0x597   : > { %v8548_v37 = vpop.f32.mrb[119].mxu1 }
 0x5a4   : > { %v8552_v58 = vpop.f32.mrb[120].mxu1 }
 0x5a5   : > { %v8556_v27 = vpop.f32.mrb[121].mxu1 }
 0x5a6   : > { %v8560_v51 = vpop.f32.mrb[122].mxu1 }
 0x5a7   : > { %v8564_v6 = vpop.f32.mrb[123].mxu1 }
 0x5b4   : > { %v8568_v48 = vpop.f32.mrb[124].mxu1 }
 0x5b5   : > { %v2819_v54 = vmax.f32 %v8367_v61, %v8568_v48  ;;  %v8572_v1 = vpop.f32.mrb[125].mxu1 }
 0x5b6   : > { %v8576_v43 = vpop.f32.mrb[126].mxu1 }
 0x5b7   : > { %v8580_v30 = vpop.f32.mrb[127].mxu1 }
 0x5c2   : > { %v1656_v42 = vpop.xlane.xlu0 %1655 }
 0x5c3   : > { %vm1686_vm7 = vcmp.eq.f32.partialorder %v8386_v17, %v1656_v42  ;;  %v6531_v17 = vld [vmem:[%s6785_s25 + $0x8] sm:$0xff] }
 0x5c4   : > { %6053 = vmatmul.mubr.msk.f32.vlgmr.msra.gmra.mrb[16].mxu0 %vm9934_vm11, %v6531_v17  ;;  %v6534_v17 = vld [vmem:[%s6785_s25 + $0x20] sm:$0xff] }
 0x5c6   : > { %v1654_v19 = vpop.xlane.xlu1 %1653 }
 0x5c7   : > { %vm1685_vm14 = vcmp.eq.f32.partialorder %v8391_v12, %v1654_v19  ;;  %v6532_v19 = vld [vmem:[%s6785_s25 + $0x10] sm:$0xff] }
 0x5c8   : > { %vm8586_vm0 = vmpackc.low %vm1686_vm7, %vm1685_vm14 }
 0x5c9   : > { %v9931_v56 = vsel %vm8586_vm0, 4294967295, %v9930_v56  ;;  %6034 = vmatprep.mubr.msk.bf16.mxu1 %vm8586_vm0, %v9786_v24  ;;  %vm9935_vm7 = vmmov %vm9934_vm11 }
 0x5ca   : > { %v1660_v12 = vpop.xlane.xlu0 %1659  ;;  %6055 = vmatprep.mubr.msk.f32.mxu0 %vm9935_vm7, %v6532_v19  ;;  %vm9936_vm0 = vmmov %vm9935_vm7  ;;  %v6537_v19 = vld [vmem:[%s6785_s25 + $0x38] sm:$0xff] }
 0x5cb   : > { %vm1688_vm14 = vcmp.eq.f32.partialorder %v8403_v47, %v1660_v12  ;;  %6056 = vmatmul.mubr.msk.f32.gmra.mrb[18].mxu0 %vm9936_vm0, %v6533_v39  ;;  %vm9939_vm2 = vmmov %vm9936_vm0  ;;  %v6535_v47 = vld [vmem:[%s6785_s25 + $0x28] sm:$0xff]  ;;  %v6536_v12 = vld [vmem:[%s6785_s25 + $0x30] sm:$0xff] }
 0x5cc   : > { %6058 = vmatprep.mubr.msk.f32.mxu0 %vm9939_vm2, %v6534_v17  ;;  %vm9940_vm11 = vmmov %vm9936_vm0  ;;  %v6538_v17 = vld [vmem:[%s6785_s25 + $0x40] sm:$0xff] }
 0x5ce   : > { %v1658_v42 = vpop.xlane.xlu1 %1657 }
 0x5cf   : > { %vm1687_vm1 = vcmp.eq.f32.partialorder %v8408_v0, %v1658_v42  ;;  %6059 = vmatmul.mubr.msk.f32.gmra.mrb[20].mxu0 %vm9940_vm11, %v6535_v47  ;;  %v9942_v42 = vmov 0  ;;  %vm9944_vm11 = vmmov %vm9936_vm0  ;;  %v6540_v47 = vld [vmem:[%s6785_s25 + $0x50] sm:$0xff] }
 0x5d0   : > { %vm8606_vm5 = vmpackc.low %vm1688_vm14, %vm1687_vm1  ;;  %6061 = vmatprep.mubr.msk.f32.mxu0 %vm9936_vm0, %v6536_v12  ;;  %v6541_v12 = vld [vmem:[%s6785_s25 + $0x58] sm:$0xff] }
 0x5d1   : > { %v9938_v49 = vsel %vm8606_vm5, 4294967295, %v9937_v49  ;;  %6035 = vmatmul.mubr.msk.bf16.gmra.mrb[144].mxu1 %vm8606_vm5, %v9786_v24  ;;  %vm9941_vm14 = vmmov %vm9936_vm0 }
 0x5d2   : > { %v1664_v0 = vpop.xlane.xlu0 %1663 }
 0x5d3   : > { %vm1690_vm1 = vcmp.eq.f32.partialorder %v8420_v38, %v1664_v0  ;;  %6062 = vmatmul.mubr.msk.f32.gmra.mrb[22].mxu0 %vm9941_vm14, %v6537_v19  ;;  %v6539_v38 = vld [vmem:[%s6785_s25 + $0x48] sm:$0xff]  ;;  %vm9945_vm14 = vmmov %vm9936_vm0  ;;  %v6542_v19 = vld [vmem:[%s6785_s25 + $0x60] sm:$0xff] }
 0x5d4   : > { %6064 = vmatprep.mubr.msk.f32.mxu0 %vm9944_vm11, %v6538_v17  ;;  %vm9946_vm11 = vmmov %vm9936_vm0  ;;  %v6543_v17 = vld [vmem:[%s6785_s25 + $0x68] sm:$0xff] }
 0x5d6   : > { %v1662_v39 = vpop.xlane.xlu1 %1661 }
 0x5d7   : > { %vm1689_vm7 = vcmp.eq.f32.partialorder %v8425_v3, %v1662_v39  ;;  %6065 = vmatmul.mubr.msk.f32.gmra.mrb[24].mxu0 %vm9936_vm0, %v6539_v38  ;;  %v9947_v39 = vmov 0  ;;  %v6544_v38 = vld [vmem:[%s6785_s25 + $0x70] sm:$0xff] }
 0x5d8   : > { %vm8623_vm2 = vmpackc.low %vm1690_vm1, %vm1689_vm7  ;;  %6067 = vmatprep.mubr.msk.f32.mxu0 %vm9945_vm14, %v6540_v47 }
 0x5d9   : > { %v9943_v42 = vsel %vm8623_vm2, 4294967295, %v9942_v42  ;;  %6038 = vmatprep.mubr.msk.bf16.mxu1 %vm8623_vm2, %v9786_v24  ;;  %vm9949_vm14 = vmmov %vm9936_vm0 }
 0x5da   : > { %v1668_v3 = vpop.xlane.xlu0 %1667  ;;  %vm9950_vm2 = vmmov %vm9936_vm0 }
 0x5db   : > { %vm1692_vm1 = vcmp.eq.f32.partialorder %v8437_v32, %v1668_v3  ;;  %6068 = vmatmul.mubr.msk.f32.gmra.mrb[26].mxu0 %vm9946_vm11, %v6541_v12  ;;  %v6545_v3 = vld [vmem:[%s6785_s25 + $0x78] sm:$0xff]  ;;  %vm9951_vm11 = vmmov %vm9936_vm0  ;;  %s9704_s25 = sshll.u32 %s9408_s30, 7 }
 0x5dc   : > { %6070 = vmatprep.mubr.msk.f32.mxu0 %vm9936_vm0, %v6542_v19  ;;  %s9421_s1 = scalar_lea.vmem [#allocation2], %s9704_s25 }
 0x5dd   : > { %s4787_s0 = sshll.u32 %s9421_s1, 4  ;;  %s9461_s0 = int_to_ptr.vmem [resolvable:$true] %s4787_s0 }
 0x5de   : > { %v1666_v0 = vpop.xlane.xlu1 %1665  ;;  %s6546_s25 = scalar_lea.vmem %s9461_s0, 2048 }
 0x5df   : > { %vm1691_vm7 = vcmp.eq.f32.partialorder %v8442_v10, %v1666_v0  ;;  %6071 = vmatmul.mubr.msk.f32.gmra.mrb[28].mxu0 %vm9949_vm14, %v6543_v17  ;;  %p6547_p11 = scmp.ne.s32.totalorder %s9461_s0, %s6546_s25 }
 0x5e0   : > { %vm8640_vm5 = vmpackc.low %vm1692_vm1, %vm1691_vm7  ;;  %6073 = vmatprep.mubr.msk.f32.mxu0 %vm9950_vm2, %v6544_v38 }
 0x5e1   : > { %v9948_v39 = vsel %vm8640_vm5, 4294967295, %v9947_v39  ;;  %6039 = vmatmul.mubr.msk.bf16.gmra.mrb[148].mxu1 %vm8640_vm5, %v9786_v24  ;;  %p6548_p12 = pnand %p6547_p11, %p6765_p5 }
 0x5e2   : > { %v1672_v32 = vpop.xlane.xlu0 %1671 }
 0x5e3   : > { %vm1694_vm1 = vcmp.eq.f32.partialorder %v8454_v14, %v1672_v32  ;;  %6074 = vmatmul.mubr.msk.f32.gmra.mrb[30].mxu0 %vm9951_vm11, %v6545_v3  ;;  %v9954_v14 = vmov 0  ;;  %v9958_v32 = vmov 0  ;;  %v9961_v3 = vmax.f32 %v8312_v13, %v8524_v11  ;;  %p6549_p13 = pneg %p6548_p12 }
 0x5e4   : > { %v9965_v13 = vmax.f32 %v8332_v57, %v8540_v29  ;;  %v3067_v57 = vld [vmem:[%s9573_s6 + $0x8] sm:$0xff] }
 0x5e6   : > { %v1670_v10 = vpop.xlane.xlu1 %1669 }
 0x5e7   : > { %vm1693_vm7 = vcmp.eq.f32.partialorder %v8459_v44, %v1670_v10 }
 0x5e8   : > { %vm8657_vm0 = vmpackc.low %vm1694_vm1, %vm1693_vm7 }
 0x5e9   : > { %6042 = vmatprep.mubr.msk.bf16.mxu1 %vm8657_vm0, %v9786_v24 }
 0x5ea   : > { %v1676_v0 = vpop.xlane.xlu0 %1675 }
 0x5eb   : > { %vm1696_vm2 = vcmp.eq.f32.partialorder %v8471_v15, %v1676_v0 }
 0x5ee   : > { %v1674_v12 = vpop.xlane.xlu1 %1673 }
 0x5ef   : > { %vm1695_vm14 = vcmp.eq.f32.partialorder %v8476_v63, %v1674_v12 }
 0x5f0   : > { %vm8666_vm5 = vmpackc.low %vm1696_vm2, %vm1695_vm14 }
 0x5f1   : > { %v9955_v14 = vsel %vm8666_vm5, 4294967295, %v9954_v14  ;;  %6043 = vmatmul.mubr.msk.bf16.gmra.mrb[152].mxu1 %vm8666_vm5, %v9786_v24 }
 0x5f2   : > { %v1680_v44 = vpop.xlane.xlu0 %1679 }
 0x5f3   : > { %vm1698_vm1 = vcmp.eq.f32.partialorder %v8488_v16, %v1680_v44 }
 0x5f6   : > { %v1678_v19 = vpop.xlane.xlu1 %1677 }
 0x5f7   : > { %vm1697_vm7 = vcmp.eq.f32.partialorder %v8493_v53, %v1678_v19  ;;  %v9960_v53 = vmax.f32 %v8307_v25, %v8520_v59  ;;  %v9963_v19 = vmax.f32 %v8322_v23, %v8532_v62  ;;  %v9964_v25 = vmax.f32 %v8327_v22, %v8536_v21  ;;  %v3066_v22 = vld [vmem:[%s9573_s6] sm:$0xff] }
 0x5f8   : > { %vm8675_vm11 = vmpackc.low %vm1698_vm1, %vm1697_vm7  ;;  %v9967_v62 = vmax.f32 %v8342_v50, %v8548_v37  ;;  %v6428_v21 = vpack.c.bf16 %v3067_v57, %v3066_v22  ;;  %v3069_v50 = vld [vmem:[%s9573_s6 + $0x18] sm:$0xff]  ;;  %v9968_v37 = vmax.f32 %v8347_v26, %v8552_v58  ;;  %vm3070_vm7 = vcmask 261120  }
 0x5f9   : > { %6046 = vmatprep.mubr.msk.bf16.mxu1 %vm8675_vm11, %v9786_v24 }
 0x5fa   : > { %v1682_v15 = vpop.xlane.xlu1 %1681  ;;  %6429 = vmatprep.subr.bf16.mxu0 %v6428_v21 }
 0x5fb   : > { %vm1699_vm2 = vcmp.eq.f32.partialorder %v8505_v20, %v1682_v15  ;;  %6431 = vmatpush3.bf16.msra.mxu0 %v6428_v21 }
 0x5fe   : > { %v1684_v63 = vpop.xlane.xlu0 %1683 }
 0x5ff   : > { %vm1700_vm14 = vcmp.eq.f32.partialorder %v8510_v5, %v1684_v63  ;;  %v9962_v5 = vmax.f32 %v8317_v40, %v8528_v55  ;;  %v9966_v40 = vmax.f32 %v8337_v2, %v8544_v52  ;;  %v3068_v2 = vld [vmem:[%s9573_s6 + $0x10] sm:$0xff] }
 0x600   : > { %vm8684_vm5 = vmpackc.low %vm1700_vm14, %vm1699_vm2  ;;  %v6432_v29 = vpack.c.bf16 %v3069_v50, %v3068_v2 }
 0x601   : > { %v9959_v32 = vsel %vm8684_vm5, 4294967295, %v9958_v32  ;;  %6047 = vmatmul.mubr.msk.bf16.gmra.mrb[156].mxu1 %vm8684_vm5, %v9786_v24 }
 0x602   : > { %6433 = vmatprep.subr.bf16.mxu0 %v6432_v29 }
 0x603   : > { %6435 = vmatpush3.bf16.msra.mxu0 %v6432_v29 }
 0x614   : > { %v6020_v16 = vpop.f32.mrb[128].mxu1 }
 0x615   : > { %v2823_v38 = vmax.f32 %v9960_v53, %v6020_v16  ;;  %v2614_v10 = vpop.f32.mrb[129].mxu1 }
 0x616   : > { %v2821_v20 = vmax.f32 %v9961_v3, %v2614_v10  ;;  %v6021_v0 = vpop.f32.mrb[130].mxu1 }
 0x617   : > { %v2824_v12 = vmax.f32 %v9962_v5, %v6021_v0  ;;  %v2617_v44 = vpop.f32.mrb[131].mxu1  ;;  %v9969_v5 = vmax.f32 %v8352_v18, %v8556_v27  ;;  %v9972_v27 = vmax.f32 %v8372_v28, %v8572_v1  ;;  %v8784_v28 = vld [vmem:[%s9975_s4] ss:$0 sm:$0xff]  ;;  %s6550_s4 = sshll.u32 %s6643_s3, 4  ;;  %s6551_s4 = int_to_ptr.vmem [resolvable:$false] %s6550_s4 }
 0x618   : > { %v2822_v15 = vmax.f32 %v9963_v19, %v2617_v44  ;;  %v2174_v1 = vsub.f32 %v8784_v28, %v7109_v36  ;;  %v2172_v22 = vsub.f32 %v8784_v28, %v7105_v34  ;;  %v2175_v50 = vsub.f32 %v8784_v28, %v7107_v35  ;;  %p6553_p0 = scmp.lt.s32.totalorder %s9461_s0, %s6551_s4 }
 0x624   : > { %v6024_v63 = vpop.f32.mrb[132].mxu1 }
 0x625   : > { %v8706_v59 = vmax.f32 %v9964_v25, %v6024_v63  ;;  %v2630_v16 = vpop.f32.mrb[133].mxu1  ;;  %v9970_v63 = vmax.f32 %v8357_v60, %v8560_v51  ;;  %v9973_v51 = vmax.f32 %v8377_v45, %v8576_v43 }
 0x626   : > { %v8711_v11 = vmax.f32 %v9965_v13, %v2630_v16  ;;  %v6025_v53 = vpop.f32.mrb[134].mxu1  ;;  %v9971_v13 = vmax.f32 %v8362_v8, %v8564_v6  ;;  %v9974_v6 = vmax.f32 %v8382_v46, %v8580_v30 }
 0x627   : > { %v8716_v55 = vmax.f32 %v9966_v40, %v6025_v53  ;;  %v2633_v23 = vpop.f32.mrb[135].mxu1 }
 0x628   : > { %v8721_v10 = vmax.f32 %v9967_v62, %v2633_v23 }
 0x634   : > { %v6028_v52 = vpop.f32.mrb[136].mxu1 }
 0x635   : > { %v8738_v3 = vmax.f32 %v9968_v37, %v6028_v52  ;;  %v2646_v0 = vpop.f32.mrb[137].mxu1 }
 0x636   : > { %v8743_v44 = vmax.f32 %v9969_v5, %v2646_v0  ;;  %v6029_v19 = vpop.f32.mrb[138].mxu1  ;;  %v9976_v5 = vld [vmem:[#allocation8_spill] sm:$0xff] }
 0x637   : > { %v8748_v25 = vmax.f32 %v9970_v63, %v6029_v19  ;;  %v2649_v16 = vpop.f32.mrb[139].mxu1  ;;  %v2173_v36 = vsub.f32 %v8784_v28, %v9976_v5  ;;  %v9979_v5 = vld [vmem:[#allocation11_spill] sm:$0xff] }
 0x638   : > { %v8753_v53 = vmax.f32 %v9971_v13, %v2649_v16 }
 0x644   : > { %v6032_v26 = vpop.f32.mrb[140].mxu1 }
 0x645   : > { %v8758_v58 = vmax.f32 %v2819_v54, %v6032_v26  ;;  %v2662_v18 = vpop.f32.mrb[141].mxu1 }
 0x646   : > { %v8763_v40 = vmax.f32 %v9972_v27, %v2662_v18  ;;  %v6033_v60 = vpop.f32.mrb[142].mxu1 }
 0x647   : > { %v8768_v23 = vmax.f32 %v9973_v51, %v6033_v60  ;;  %v2665_v8 = vpop.f32.mrb[143].mxu1 }
 0x648   : > { %v8773_v62 = vmax.f32 %v9974_v6, %v2665_v8 }
 0x697   : > { %v8775_v61 = vpop.f32.mrb[16].mxu0 }
 0x698   : > { %v8777_v48 = vpop.f32.mrb[17].mxu0 }
 0x69e   : > { %v8779_v54 = vpop.f32.mrb[18].mxu0 }
 0x69f   : > { %v8786_v45 = vpop.f32.mrb[19].mxu0 }
 0x6a2   : > { %v8792_v2 = vpop.f32.mrb[20].mxu0 }
 0x6a3   : > { %v8796_v0 = vpop.f32.mrb[21].mxu0 }
 0x6a4   : > { %v6036_v43 = vpop.f32.mrb[144].mxu1 }
 0x6a5   : > { %v2839_v46 = vmax.f32 %v2823_v38, %v6036_v43  ;;  %v2678_v30 = vpop.f32.mrb[145].mxu1 }
 0x6a6   : > { %v2837_v57 = vmax.f32 %v2821_v20, %v2678_v30  ;;  %v6037_v21 = vpop.f32.mrb[146].mxu1  ;;  %v8800_v20 = vpop.f32.mrb[22].mxu0 }
 0x6a7   : > { %v2855_v29 = vadd.f32 %v2839_v46, %v2174_v1  ;;  %v2840_v52 = vmax.f32 %v2824_v12, %v6037_v21  ;;  %v2681_v37 = vpop.f32.mrb[147].mxu1  ;;  %v8802_v26 = vpop.f32.mrb[23].mxu0  ;;  %v9977_v46 = vld [vmem:[#allocation12_spill] sm:$0xff]  ;;  %v9978_v21 = vld [vmem:[#allocation10_spill] sm:$0xff] }
 0x6a8   : > { %v2853_v38 = vadd.f32 %v2837_v57, %v2172_v22  ;;  %v2838_v19 = vmax.f32 %v2822_v15, %v2681_v37  ;;  %v2178_v30 = vsub.f32 %v8784_v28, %v9977_v46 }
 0x6a9   : > { %v2856_v63 = vadd.f32 %v2840_v52, %v2175_v50  ;;  %v2887_v13 = vmul.f32 0.1, %v2855_v29  ;;  %vm2871_vm14 = vcmp.ge.f32.partialorder %v2855_v29, 0.0  ;;  %v2176_v50 = vsub.f32 %v8784_v28, %v9978_v21  ;;  %v9981_v21 = vld [vmem:[#allocation16_spill] sm:$0xff] }
 0x6aa   : > { %v2885_v16 = vmul.f32 0.1, %v2853_v38  ;;  %v2854_v34 = vadd.f32 %v2838_v19, %v2173_v36  ;;  %vm2869_vm1 = vcmp.ge.f32.partialorder %v2853_v38, 0.0  ;;  %v8805_v60 = vpop.f32.mrb[24].mxu0  ;;  %v2179_v36 = vsub.f32 %v8784_v28, %v9979_v5  ;;  %v9982_v5 = vld [vmem:[#allocation14_spill] sm:$0xff] }
 0x6ab   : > { %v2888_v18 = vmul.f32 0.1, %v2856_v63  ;;  %v2903_v15 = vsel %vm2871_vm14, %v2855_v29, %v2887_v13  ;;  %vm2872_vm5 = vcmp.ge.f32.partialorder %v2856_v63, 0.0  ;;  %v8808_v51 = vpop.f32.mrb[25].mxu0 }
 0x6ac   : > { %vm2870_vm2 = vcmp.ge.f32.partialorder %v2854_v34, 0.0  ;;  %v2886_v35 = vmul.f32 0.1, %v2854_v34  ;;  %v2901_v12 = vsel %vm2869_vm1, %v2853_v38, %v2885_v16 }
 0x6ad   : > { %6084 = vmatprep.mubr.msk.f32.mxu0 %vm3070_vm7, %v2901_v12  ;;  %v2904_v8 = vsel %vm2872_vm5, %v2856_v63, %v2888_v18 }
 0x6ae   : > { %v2902_v27 = vsel %vm2870_vm2, %v2854_v34, %v2886_v35  ;;  %v8811_v6 = vpop.f32.mrb[26].mxu0  ;;  %v9980_v34 = vld [vmem:[#allocation9_spill] sm:$0xff] }
 0x6af   : > { %6085 = vmatmul.mubr.msk.f32.vlgmr.msra.gmra.mrb[32].mxu0 %vm3070_vm7, %v2902_v27  ;;  %v8814_v43 = vpop.f32.mrb[27].mxu0 }
 0x6b0   : > { %6087 = vmatprep.mubr.msk.f32.mxu0 %vm3070_vm7, %v2903_v15 }
 0x6b2   : > { %v8822_v37 = vpop.f32.mrb[28].mxu0 }
 0x6b3   : > { %6088 = vmatmul.mubr.msk.f32.gmra.mrb[34].mxu0 %vm3070_vm7, %v2904_v8  ;;  %v8827_v16 = vpop.f32.mrb[29].mxu0 }
 0x6b4   : > { %v6040_v1 = vpop.f32.mrb[148].mxu1 }
 0x6b5   : > { %v2843_v22 = vmax.f32 %v8706_v59, %v6040_v1  ;;  %v2694_v57 = vpop.f32.mrb[149].mxu1  ;;  %v2177_v59 = vsub.f32 %v8784_v28, %v9980_v34 }
 0x6b6   : > { %v2841_v29 = vmax.f32 %v8711_v11, %v2694_v57  ;;  %v6041_v52 = vpop.f32.mrb[150].mxu1  ;;  %v8832_v27 = vpop.f32.mrb[30].mxu0 }
 0x6b7   : > { %v2859_v38 = vadd.f32 %v2843_v22, %v2178_v30  ;;  %v2844_v19 = vmax.f32 %v8716_v55, %v6041_v52  ;;  %v2697_v63 = vpop.f32.mrb[151].mxu1  ;;  %v8834_v8 = vpop.f32.mrb[31].mxu0 }
 0x6b8   : > { %v2857_v13 = vadd.f32 %v2841_v29, %v2176_v50  ;;  %v2842_v35 = vmax.f32 %v8721_v10, %v2697_v63  ;;  %v2182_v50 = vsub.f32 %v8784_v28, %v9981_v21  ;;  %v9985_v21 = vld [vmem:[#allocation20_spill] sm:$0xff] }
 0x6b9   : > { %v2860_v12 = vadd.f32 %v2844_v19, %v2179_v36  ;;  %v2891_v15 = vmul.f32 0.1, %v2859_v38  ;;  %vm2875_vm2 = vcmp.ge.f32.partialorder %v2859_v38, 0.0  ;;  %v2180_v36 = vsub.f32 %v8784_v28, %v9982_v5  ;;  %v9986_v5 = vld [vmem:[#allocation18_spill] sm:$0xff] }
 0x6ba   : > { %v2889_v11 = vmul.f32 0.1, %v2857_v13  ;;  %v2858_v18 = vadd.f32 %v2842_v35, %v2177_v59  ;;  %vm2873_vm5 = vcmp.ge.f32.partialorder %v2857_v13, 0.0 }
 0x6bb   : > { %v2892_v46 = vmul.f32 0.1, %v2860_v12  ;;  %v2907_v10 = vsel %vm2875_vm2, %v2859_v38, %v2891_v15  ;;  %vm2876_vm14 = vcmp.ge.f32.partialorder %v2860_v12, 0.0  ;;  %v9983_v38 = vld [vmem:[#allocation15_spill] sm:$0xff] }
 0x6bc   : > { %v2890_v1 = vmul.f32 0.1, %v2858_v18  ;;  %v2905_v55 = vsel %vm2873_vm5, %v2857_v13, %v2889_v11  ;;  %vm2874_vm1 = vcmp.ge.f32.partialorder %v2858_v18, 0.0  ;;  %v2183_v34 = vsub.f32 %v8784_v28, %v9983_v38  ;;  %v9987_v38 = vld [vmem:[#allocation19_spill] sm:$0xff] }
 0x6bd   : > { %6090 = vmatprep.mubr.msk.f32.mxu0 %vm3070_vm7, %v2905_v55  ;;  %v2908_v22 = vsel %vm2876_vm14, %v2860_v12, %v2892_v46  ;;  %v9984_v12 = vld [vmem:[#allocation13_spill] sm:$0xff] }
 0x6be   : > { %v2906_v30 = vsel %vm2874_vm1, %v2858_v18, %v2890_v1  ;;  %v2181_v11 = vsub.f32 %v8784_v28, %v9984_v12  ;;  %v9988_v12 = vld [vmem:[#allocation17_spill] sm:$0xff] }
 0x6bf   : > { %6091 = vmatmul.mubr.msk.f32.gmra.mrb[36].mxu0 %vm3070_vm7, %v2906_v30 }
 0x6c0   : > { %6093 = vmatprep.mubr.msk.f32.mxu0 %vm3070_vm7, %v2907_v10 }
 0x6c3   : > { %6094 = vmatmul.mubr.msk.f32.gmra.mrb[38].mxu0 %vm3070_vm7, %v2908_v22 }
 0x6c4   : > { %v6044_v57 = vpop.f32.mrb[152].mxu1 }
 0x6c5   : > { %v2847_v29 = vmax.f32 %v8738_v3, %v6044_v57  ;;  %v2710_v52 = vpop.f32.mrb[153].mxu1 }
 0x6c6   : > { %v2845_v19 = vmax.f32 %v8743_v44, %v2710_v52  ;;  %v6045_v63 = vpop.f32.mrb[154].mxu1 }
 0x6c7   : > { %v2863_v59 = vadd.f32 %v2847_v29, %v2182_v50  ;;  %v2848_v13 = vmax.f32 %v8748_v25, %v6045_v63  ;;  %v2713_v35 = vpop.f32.mrb[155].mxu1  ;;  %v2186_v50 = vsub.f32 %v8784_v28, %v9985_v21 }
 0x6c8   : > { %v2861_v18 = vadd.f32 %v2845_v19, %v2180_v36  ;;  %v2846_v3 = vmax.f32 %v8753_v53, %v2713_v35  ;;  %v2184_v36 = vsub.f32 %v8784_v28, %v9986_v5 }
 0x6c9   : > { %v2864_v15 = vadd.f32 %v2848_v13, %v2183_v34  ;;  %v2895_v46 = vmul.f32 0.1, %v2863_v59  ;;  %vm2879_vm2 = vcmp.ge.f32.partialorder %v2863_v59, 0.0  ;;  %v2187_v34 = vsub.f32 %v8784_v28, %v9987_v38 }
 0x6ca   : > { %v2893_v1 = vmul.f32 0.1, %v2861_v18  ;;  %v2862_v55 = vadd.f32 %v2846_v3, %v2181_v11  ;;  %vm2877_vm5 = vcmp.ge.f32.partialorder %v2861_v18, 0.0  ;;  %v2185_v11 = vsub.f32 %v8784_v28, %v9988_v12 }
 0x6cb   : > { %v2896_v10 = vmul.f32 0.1, %v2864_v15  ;;  %v2911_v22 = vsel %vm2879_vm2, %v2863_v59, %v2895_v46  ;;  %vm2880_vm14 = vcmp.ge.f32.partialorder %v2864_v15, 0.0 }
 0x6cc   : > { %v2894_v44 = vmul.f32 0.1, %v2862_v55  ;;  %v2909_v30 = vsel %vm2877_vm5, %v2861_v18, %v2893_v1  ;;  %vm2878_vm1 = vcmp.ge.f32.partialorder %v2862_v55, 0.0 }
 0x6cd   : > { %6096 = vmatprep.mubr.msk.f32.mxu0 %vm3070_vm7, %v2909_v30  ;;  %v2912_v53 = vsel %vm2880_vm14, %v2864_v15, %v2896_v10 }
 0x6ce   : > { %v2910_v25 = vsel %vm2878_vm1, %v2862_v55, %v2894_v44 }
 0x6cf   : > { %6097 = vmatmul.mubr.msk.f32.gmra.mrb[40].mxu0 %vm3070_vm7, %v2910_v25 }
 0x6d0   : > { %6099 = vmatprep.mubr.msk.f32.mxu0 %vm3070_vm7, %v2911_v22 }
 0x6d3   : > { %6100 = vmatmul.mubr.msk.f32.gmra.mrb[42].mxu0 %vm3070_vm7, %v2912_v53 }
 0x6d4   : > { %v6048_v57 = vpop.f32.mrb[156].mxu1 }
 0x6d5   : > { %v2851_v29 = vmax.f32 %v8758_v58, %v6048_v57  ;;  %v2726_v52 = vpop.f32.mrb[157].mxu1 }
 0x6d6   : > { %v2849_v19 = vmax.f32 %v8763_v40, %v2726_v52  ;;  %v6049_v63 = vpop.f32.mrb[158].mxu1 }
 0x6d7   : > { %v2867_v59 = vadd.f32 %v2851_v29, %v2186_v50  ;;  %v2852_v13 = vmax.f32 %v8768_v23, %v6049_v63  ;;  %v2729_v35 = vpop.f32.mrb[159].mxu1 }
 0x6d8   : > { %v2865_v18 = vadd.f32 %v2849_v19, %v2184_v36  ;;  %v2850_v58 = vmax.f32 %v8773_v62, %v2729_v35 }
 0x6d9   : > { %v2868_v3 = vadd.f32 %v2852_v13, %v2187_v34  ;;  %v2899_v55 = vmul.f32 0.1, %v2867_v59  ;;  %vm2883_vm2 = vcmp.ge.f32.partialorder %v2867_v59, 0.0 }
 0x6da   : > { %v2897_v15 = vmul.f32 0.1, %v2865_v18  ;;  %v2866_v1 = vadd.f32 %v2850_v58, %v2185_v11  ;;  %vm2881_vm5 = vcmp.ge.f32.partialorder %v2865_v18, 0.0 }
 0x6db   : > { %v2900_v44 = vmul.f32 0.1, %v2868_v3  ;;  %v2915_v30 = vsel %vm2883_vm2, %v2867_v59, %v2899_v55  ;;  %vm2884_vm14 = vcmp.ge.f32.partialorder %v2868_v3, 0.0 }
 0x6dc   : > { %v2898_v40 = vmul.f32 0.1, %v2866_v1  ;;  %v2913_v46 = vsel %vm2881_vm5, %v2865_v18, %v2897_v15  ;;  %vm2882_vm1 = vcmp.ge.f32.partialorder %v2866_v1, 0.0 }
 0x6dd   : > { %6102 = vmatprep.mubr.msk.f32.mxu0 %vm3070_vm7, %v2913_v46  ;;  %v2916_v62 = vsel %vm2884_vm14, %v2868_v3, %v2900_v44 }
 0x6de   : > { %v2914_v23 = vsel %vm2882_vm1, %v2866_v1, %v2898_v40 }
 0x6df   : > { %6103 = vmatmul.mubr.msk.f32.gmra.mrb[44].mxu0 %vm3070_vm7, %v2914_v23 }
 0x6e0   : > { %6105 = vmatprep.mubr.msk.f32.mxu0 %vm3070_vm7, %v2915_v30 }
 0x6e3   : > { %6106 = vmatmul.mubr.msk.f32.gmra.mrb[46].mxu0 %vm3070_vm7, %v2916_v62 }
 0x6e4   : > { %6124 = vmatprep.mubr.msk.bf16.mxu0 %vm7254_vm6, %v9786_v24 }
 0x782   : > { %v6086_v10 = vpop.f32.mrb[32].mxu0 }
 0x783   : > { %v3265_v25 = vadd.f32 %v6086_v10, %v8775_v61  ;;  %v3185_v22 = vpop.f32.mrb[33].mxu0 }
 0x784   : > { %v3264_v53 = vadd.f32 %v3185_v22, %v8777_v48 }
 0x786   : > { %v3303_v57 = vpack.c.bf16 %v3265_v25, %v3264_v53  ;;  %v6089_v21 = vpop.f32.mrb[34].mxu0 }
 0x787   : > { %v3267_v50 = vadd.f32 %v6089_v21, %v8779_v54  ;;  %v3195_v29 = vpop.f32.mrb[35].mxu0 }
 0x788   : > { %v3266_v52 = vadd.f32 %v3195_v29, %v8786_v45  ;;  %6108 = vmatprep.subr.bf16.mxu0 %v3303_v57  ;;  %v10042_v29 = vld [vmem:[#allocation52_spill] sm:$0xff] }
 0x789   : > { %6109 = vmatpush3.bf16.msra.mxu0 %v3303_v57 }
 0x78a   : > { %v3304_v5 = vpack.c.bf16 %v3267_v50, %v3266_v52  ;;  %v10044_v52 = vld [vmem:[#allocation53_spill] sm:$0xff] }
 0x78c   : > { %6110 = vmatprep.subr.bf16.mxu0 %v3304_v5 }
 0x78d   : > { %6111 = vmatpush3.bf16.msra.mxu0 %v3304_v5  ;;  %v10046_v5 = vld [vmem:[#allocation54_spill] sm:$0xff] }
 0x792   : > { %v6092_v36 = vpop.f32.mrb[36].mxu0 }
 0x793   : > { %v3269_v19 = vadd.f32 %v6092_v36, %v8792_v2  ;;  %v3205_v63 = vpop.f32.mrb[37].mxu0  ;;  %v10048_v36 = vld [vmem:[#allocation55_spill] sm:$0xff] }
 0x794   : > { %v3268_v38 = vadd.f32 %v3205_v63, %v8796_v0  ;;  %v10052_v63 = vld [vmem:[#allocation57_spill] sm:$0xff] }
 0x796   : > { %v3305_v34 = vpack.c.bf16 %v3269_v19, %v3268_v38  ;;  %v6095_v59 = vpop.f32.mrb[38].mxu0  ;;  %v10050_v19 = vld [vmem:[#allocation56_spill] sm:$0xff]  ;;  %v10054_v38 = vld [vmem:[#allocation58_spill] sm:$0xff] }
 0x797   : > { %v3271_v13 = vadd.f32 %v6095_v59, %v8800_v20  ;;  %v3215_v35 = vpop.f32.mrb[39].mxu0  ;;  %v9998_v59 = vld [vmem:[#allocation30_spill] sm:$0xff] }
 0x798   : > { %v3270_v12 = vadd.f32 %v3215_v35, %v8802_v26  ;;  %6112 = vmatprep.subr.bf16.mxu0 %v3305_v34  ;;  %vm9999_vm6 = vnez %v9998_v59  ;;  %v10002_v35 = vld [vmem:[#allocation32_spill] sm:$0xff] }
 0x799   : > { %6113 = vmatpush3.bf16.msra.mxu0 %v3305_v34  ;;  %v10056_v34 = vld [vmem:[#allocation59_spill] sm:$0xff]  ;;  %v10058_v59 = vld [vmem:[#allocation60_spill] sm:$0xff] }
 0x79a   : > { %v3306_v11 = vpack.c.bf16 %v3271_v13, %v3270_v12  ;;  %v10000_v13 = vld [vmem:[#allocation31_spill] sm:$0xff]  ;;  %v10004_v12 = vld [vmem:[#allocation33_spill] sm:$0xff] }
 0x79c   : > { %6114 = vmatprep.subr.bf16.mxu0 %v3306_v11 }
 0x79d   : > { %6115 = vmatpush3.bf16.msra.mxu0 %v3306_v11  ;;  %v10006_v11 = vld [vmem:[#allocation34_spill] sm:$0xff] }
 0x7a2   : > { %v6098_v18 = vpop.f32.mrb[40].mxu0 }
 0x7a3   : > { %v3273_v58 = vadd.f32 %v6098_v18, %v8805_v60  ;;  %v3225_v3 = vpop.f32.mrb[41].mxu0  ;;  %v10008_v18 = vld [vmem:[#allocation35_spill] sm:$0xff] }
 0x7a4   : > { %v3272_v15 = vadd.f32 %v3225_v3, %v8808_v51  ;;  %v10012_v3 = vld [vmem:[#allocation37_spill] sm:$0xff] }
 0x7a6   : > { %v3307_v1 = vpack.c.bf16 %v3273_v58, %v3272_v15  ;;  %v6101_v55 = vpop.f32.mrb[42].mxu0  ;;  %v10010_v58 = vld [vmem:[#allocation36_spill] sm:$0xff] }
 0x7a7   : > { %v3275_v40 = vadd.f32 %v6101_v55, %v8811_v6  ;;  %v3235_v46 = vpop.f32.mrb[43].mxu0  ;;  %v4032_v15 = vld [vmem:[%s9575_s8] sm:$0xff] }
 0x7a8   : > { %v3274_v44 = vadd.f32 %v3235_v46, %v8814_v43  ;;  %6116 = vmatprep.subr.bf16.mxu0 %v3307_v1  ;;  %v10016_v46 = vld [vmem:[#allocation39_spill] sm:$0xff] }
 0x7a9   : > { %6117 = vmatpush3.bf16.msra.mxu0 %v3307_v1  ;;  %v4033_v1 = vld [vmem:[%s9575_s8 + $0x8] sm:$0xff]  ;;  %vm10017_vm5 = vnez %v10016_v46 }
 0x7aa   : > { %v3308_v23 = vpack.c.bf16 %v3275_v40, %v3274_v44  ;;  %v6436_v55 = vpack.c.bf16 %v4033_v1, %v4032_v15  ;;  %v10014_v40 = vld [vmem:[#allocation38_spill] sm:$0xff]  ;;  %v10018_v44 = vld [vmem:[#allocation40_spill] sm:$0xff] }
 0x7ab   : > { %vm10019_vm1 = vnez %v10018_v44  ;;  %v10074_v15 = vld [vmem:[#allocation68_spill] sm:$0xff]  ;;  %v4034_v1 = vld [vmem:[%s9575_s8 + $0x10] sm:$0xff] }
 0x7ac   : > { %6118 = vmatprep.subr.bf16.mxu0 %v3308_v23  ;;  %6437 = vmatprep.subr.bf16.mxu1 %v6436_v55 }
 0x7ad   : > { %6119 = vmatpush3.bf16.msra.mxu0 %v3308_v23  ;;  %6439 = vmatpush3.bf16.msra.mxu1 %v6436_v55  ;;  %v10020_v23 = vld [vmem:[#allocation41_spill] sm:$0xff]  ;;  %v4035_v55 = vld [vmem:[%s9575_s8 + $0x18] sm:$0xff] }
 0x7ae   : > { %vm10021_vm2 = vnez %v10020_v23  ;;  %v10084_v23 = vld [vmem:[#allocation70_spill] sm:$0xff] }
 0x7b2   : > { %v6104_v30 = vpop.f32.mrb[44].mxu0 }
 0x7b3   : > { %v3277_v62 = vadd.f32 %v6104_v30, %v8822_v37  ;;  %v3245_v28 = vpop.f32.mrb[45].mxu0  ;;  %v10022_v30 = vld [vmem:[#allocation42_spill] sm:$0xff] }
 0x7b4   : > { %v3276_v10 = vadd.f32 %v3245_v28, %v8827_v16  ;;  %vm10023_vm14 = vnez %v10022_v30  ;;  %v10026_v28 = vld [vmem:[#allocation44_spill] sm:$0xff] }
 0x7b6   : > { %v3309_v25 = vpack.c.bf16 %v3277_v62, %v3276_v10  ;;  %v6107_v22 = vpop.f32.mrb[46].mxu0  ;;  %v10024_v62 = vld [vmem:[#allocation43_spill] sm:$0xff]  ;;  %v10028_v10 = vld [vmem:[#allocation45_spill] sm:$0xff] }
 0x7b7   : > { %v3279_v53 = vadd.f32 %v6107_v22, %v8832_v27  ;;  %v3255_v57 = vpop.f32.mrb[47].mxu0  ;;  %v10032_v22 = vld [vmem:[#allocation47_spill] sm:$0xff] }
 0x7b8   : > { %v3278_v21 = vadd.f32 %v3255_v57, %v8834_v8  ;;  %6120 = vmatprep.subr.bf16.mxu0 %v3309_v25  ;;  %v10036_v57 = vld [vmem:[#allocation49_spill] sm:$0xff] }
 0x7b9   : > { %6121 = vmatpush3.bf16.msra.mxu0 %v3309_v25  ;;  %v10030_v25 = vld [vmem:[#allocation46_spill] sm:$0xff] }
 0x7ba   : > { %v3310_v50 = vpack.c.bf16 %v3279_v53, %v3278_v21  ;;  %v10034_v53 = vld [vmem:[#allocation48_spill] sm:$0xff]  ;;  %v10038_v21 = vld [vmem:[#allocation50_spill] sm:$0xff] }
 0x7bc   : > { %6122 = vmatprep.subr.bf16.mxu0 %v3310_v50 }
 0x7bd   : > { %6123 = vmatpush3.bf16.msra.mxu0 %v3310_v50  ;;  %v10040_v50 = vld [vmem:[#allocation51_spill] sm:$0xff] }
 0x7c0   : > { %6125 = vmatmul.mubr.msk.bf16.vlgmr.msra.gmra.mrb[48].mxu0 %vm7271_vm9, %v9786_v24  ;;  %vm10001_vm9 = vnez %v10000_v13  ;;  %v10060_v13 = vld [vmem:[#allocation61_spill] sm:$0xff] }
 0x7c1   : > { %6128 = vmatprep.mubr.msk.bf16.mxu0 %vm7288_vm12, %v9786_v24  ;;  %vm10003_vm12 = vnez %v10002_v35  ;;  %v10062_v35 = vld [vmem:[#allocation62_spill] sm:$0xff] }
 0x7c8   : > { %6129 = vmatmul.mubr.msk.bf16.gmra.mrb[52].mxu0 %vm7305_vm15, %v9786_v24  ;;  %vm10005_vm15 = vnez %v10004_v12  ;;  %v10064_v12 = vld [vmem:[#allocation63_spill] sm:$0xff] }
 0x7c9   : > { %6132 = vmatprep.mubr.msk.bf16.mxu0 %vm7322_vm4, %v9786_v24  ;;  %vm10007_vm4 = vnez %v10006_v11  ;;  %v10066_v11 = vld [vmem:[#allocation64_spill] sm:$0xff] }
 0x7d0   : > { %6133 = vmatmul.mubr.msk.bf16.gmra.mrb[56].mxu0 %vm7339_vm8, %v9786_v24  ;;  %vm10009_vm8 = vnez %v10008_v18  ;;  %v10068_v18 = vld [vmem:[#allocation65_spill] sm:$0xff] }
 0x7d1   : > { %6136 = vmatprep.mubr.msk.bf16.mxu0 %vm7356_vm13, %v9786_v24  ;;  %vm10011_vm13 = vnez %v10010_v58  ;;  %v10070_v58 = vld [vmem:[#allocation66_spill] sm:$0xff] }
 0x7d8   : > { %6137 = vmatmul.mubr.msk.bf16.gmra.mrb[60].mxu0 %vm7373_vm3, %v9786_v24  ;;  %vm10013_vm3 = vnez %v10012_v3  ;;  %v10072_v3 = vld [vmem:[#allocation67_spill] sm:$0xff] }
 0x7d9   : > { %6140 = vmatprep.mubr.msk.bf16.mxu0 %vm7390_vm10, %v9786_v24  ;;  %vm10015_vm10 = vnez %v10014_v40  ;;  %v6440_v40 = vpack.c.bf16 %v4035_v55, %v4034_v1 }
 0x7db   : > { %6441 = vmatprep.subr.bf16.mxu1 %v6440_v40 }
 0x7dc   : > { %6443 = vmatpush3.bf16.msra.mxu1 %v6440_v40 }
 0x7e0   : > { %6141 = vmatmul.mubr.msk.bf16.gmra.mrb[64].mxu0 %vm9999_vm6, %v9786_v24  ;;  %vm10025_vm6 = vnez %v10024_v62 }
 0x7e1   : > { %6144 = vmatprep.mubr.msk.bf16.mxu0 %vm10001_vm9, %v9786_v24  ;;  %vm10027_vm9 = vnez %v10026_v28 }
 0x7e8   : > { %6145 = vmatmul.mubr.msk.bf16.gmra.mrb[68].mxu0 %vm10003_vm12, %v9786_v24  ;;  %vm10029_vm12 = vnez %v10028_v10 }
 0x7e9   : > { %6148 = vmatprep.mubr.msk.bf16.mxu0 %vm10005_vm15, %v9786_v24  ;;  %vm10031_vm15 = vnez %v10030_v25 }
 0x7f0   : > { %6149 = vmatmul.mubr.msk.bf16.gmra.mrb[72].mxu0 %vm10007_vm4, %v9786_v24  ;;  %vm10033_vm4 = vnez %v10032_v22 }
 0x7f1   : > { %6152 = vmatprep.mubr.msk.bf16.mxu0 %vm10009_vm8, %v9786_v24  ;;  %vm10035_vm8 = vnez %v10034_v53 }
 0x7f8   : > { %6153 = vmatmul.mubr.msk.bf16.gmra.mrb[76].mxu0 %vm10011_vm13, %v9786_v24  ;;  %vm10037_vm13 = vnez %v10036_v57 }
 0x7f9   : > { %6156 = vmatprep.mubr.msk.bf16.mxu0 %vm10013_vm3, %v9786_v24  ;;  %vm10039_vm3 = vnez %v10038_v21 }
 0x800   : > { %6157 = vmatmul.mubr.msk.bf16.gmra.mrb[80].mxu0 %vm10015_vm10, %v9786_v24  ;;  %vm10041_vm10 = vnez %v10040_v50 }
 0x801   : > { %6160 = vmatprep.mubr.msk.bf16.mxu0 %vm10017_vm5, %v9786_v24  ;;  %vm10043_vm5 = vnez %v10042_v29 }
 0x808   : > { %6161 = vmatmul.mubr.msk.bf16.gmra.mrb[84].mxu0 %vm10019_vm1, %v9786_v24  ;;  %vm10045_vm1 = vnez %v10044_v52 }
 0x809   : > { %6164 = vmatprep.mubr.msk.bf16.mxu0 %vm10021_vm2, %v9786_v24  ;;  %vm10047_vm2 = vnez %v10046_v5 }
 0x810   : > { %6165 = vmatmul.mubr.msk.bf16.gmra.mrb[88].mxu0 %vm10023_vm14, %v9786_v24  ;;  %vm10049_vm14 = vnez %v10048_v36 }
 0x811   : > { %6168 = vmatprep.mubr.msk.bf16.mxu0 %vm10025_vm6, %v9786_v24  ;;  %vm10051_vm6 = vnez %v10050_v19 }
 0x818   : > { %6169 = vmatmul.mubr.msk.bf16.gmra.mrb[92].mxu0 %vm10027_vm9, %v9786_v24  ;;  %vm10053_vm9 = vnez %v10052_v63 }
 0x819   : > { %6172 = vmatprep.mubr.msk.bf16.mxu0 %vm10029_vm12, %v9786_v24  ;;  %vm10055_vm12 = vnez %v10054_v38 }
 0x820   : > { %6173 = vmatmul.mubr.msk.bf16.gmra.mrb[96].mxu0 %vm10031_vm15, %v9786_v24  ;;  %vm10057_vm15 = vnez %v10056_v34 }
 0x821   : > { %6176 = vmatprep.mubr.msk.bf16.mxu0 %vm10033_vm4, %v9786_v24  ;;  %vm10059_vm4 = vnez %v10058_v59 }
 0x828   : > { %6177 = vmatmul.mubr.msk.bf16.gmra.mrb[100].mxu0 %vm10035_vm8, %v9786_v24  ;;  %vm10061_vm8 = vnez %v10060_v13 }
 0x829   : > { %6180 = vmatprep.mubr.msk.bf16.mxu0 %vm10037_vm13, %v9786_v24  ;;  %vm10063_vm13 = vnez %v10062_v35 }
 0x830   : > { %6181 = vmatmul.mubr.msk.bf16.gmra.mrb[104].mxu0 %vm10039_vm3, %v9786_v24  ;;  %vm10065_vm3 = vnez %v10064_v12 }
 0x831   : > { %6184 = vmatprep.mubr.msk.bf16.mxu0 %vm10041_vm10, %v9786_v24  ;;  %vm10067_vm10 = vnez %v10066_v11 }
 0x838   : > { %6185 = vmatmul.mubr.msk.bf16.gmra.mrb[108].mxu0 %vm10043_vm5, %v9786_v24  ;;  %vm10069_vm5 = vnez %v10068_v18 }
 0x839   : > { %6188 = vmatprep.mubr.msk.bf16.mxu0 %vm10045_vm1, %v9786_v24  ;;  %vm10071_vm1 = vnez %v10070_v58 }
 0x840   : > { %6189 = vmatmul.mubr.msk.bf16.gmra.mrb[112].mxu0 %vm10047_vm2, %v9786_v24  ;;  %vm10073_vm2 = vnez %v10072_v3 }
 0x841   : > { %6192 = vmatprep.mubr.msk.bf16.mxu0 %vm10049_vm14, %v9786_v24  ;;  %vm10075_vm14 = vnez %v10074_v15 }
 0x848   : > { %6193 = vmatmul.mubr.msk.bf16.gmra.mrb[116].mxu0 %vm10051_vm6, %v9786_v24  ;;  %vm10076_vm6 = vnez %v9913_v9  ;;  %v10082_v9 = vld [vmem:[#allocation69_spill] sm:$0xff] }
 0x849   : > { %6196 = vmatprep.mubr.msk.bf16.mxu0 %vm10053_vm9, %v9786_v24  ;;  %vm10077_vm9 = vnez %v9915_v7 }
 0x850   : > { %6197 = vmatmul.mubr.msk.bf16.gmra.mrb[120].mxu0 %vm10055_vm12, %v9786_v24  ;;  %vm10078_vm12 = vnez %v9917_v33 }
 0x851   : > { %6200 = vmatprep.mubr.msk.bf16.mxu0 %vm10057_vm15, %v9786_v24  ;;  %vm10079_vm15 = vnez %v9919_v41 }
 0x858   : > { %6201 = vmatmul.mubr.msk.bf16.gmra.mrb[124].mxu0 %vm10059_vm4, %v9786_v24  ;;  %vm10080_vm4 = vnez %v9921_v4 }
 0x859   : > { %6204 = vmatprep.mubr.msk.bf16.mxu0 %vm10061_vm8, %v9786_v24  ;;  %vm10081_vm8 = vnez %v9923_v31 }
 0x860   : > { %6205 = vmatmul.mubr.msk.bf16.gmra.mrb[128].mxu0 %vm10063_vm13, %v9786_v24  ;;  %vm10083_vm13 = vnez %v10082_v9 }
 0x861   : > { %6208 = vmatprep.mubr.msk.bf16.mxu0 %vm10065_vm3, %v9786_v24  ;;  %vm10085_vm3 = vnez %v10084_v23 }
 0x868   : > { %6209 = vmatmul.mubr.msk.bf16.gmra.mrb[132].mxu0 %vm10067_vm10, %v9786_v24  ;;  %vm10086_vm10 = vnez %v9931_v56 }
 0x869   : > { %6212 = vmatprep.mubr.msk.bf16.mxu0 %vm10069_vm5, %v9786_v24  ;;  %vm10087_vm5 = vnez %v9938_v49 }
 0x870   : > { %6213 = vmatmul.mubr.msk.bf16.gmra.mrb[136].mxu0 %vm10071_vm1, %v9786_v24  ;;  %vm10088_vm1 = vnez %v9943_v42 }
 0x871   : > { %6216 = vmatprep.mubr.msk.bf16.mxu0 %vm10073_vm2, %v9786_v24  ;;  %vm10089_vm2 = vnez %v9948_v39 }
 0x878   : > { %6217 = vmatmul.mubr.msk.bf16.gmra.mrb[140].mxu0 %vm10075_vm14, %v9786_v24  ;;  %vm10090_vm14 = vnez %v9955_v14 }
 0x879   : > { %6220 = vmatprep.mubr.msk.bf16.mxu0 %vm10076_vm6, %v9786_v24 }
 0x880   : > { %6221 = vmatmul.mubr.msk.bf16.gmra.mrb[144].mxu0 %vm10077_vm9, %v9786_v24 }
 0x881   : > { %6224 = vmatprep.mubr.msk.bf16.mxu0 %vm10078_vm12, %v9786_v24 }
 0x888   : > { %6225 = vmatmul.mubr.msk.bf16.gmra.mrb[148].mxu0 %vm10079_vm15, %v9786_v24 }
 0x889   : > { %6228 = vmatprep.mubr.msk.bf16.mxu0 %vm10080_vm4, %v9786_v24 }
 0x890   : > { %6229 = vmatmul.mubr.msk.bf16.gmra.mrb[152].mxu0 %vm10081_vm8, %v9786_v24 }
 0x891   : > { %6232 = vmatprep.mubr.msk.bf16.mxu0 %vm10083_vm13, %v9786_v24 }
 0x893   : > { %v6126_v7 = vpop.f32.mrb[48].mxu0 }
 0x894   : > { %v3345_v33 = vpop.f32.mrb[49].mxu0 }
 0x895   : > { %v6127_v46 = vpop.f32.mrb[50].mxu0 }
 0x896   : > { %v3348_v44 = vpop.f32.mrb[51].mxu0 }
 0x898   : > { %6233 = vmatmul.mubr.msk.bf16.gmra.mrb[156].mxu0 %vm10085_vm3, %v9786_v24 }
 0x899   : > { %6236 = vmatprep.mubr.msk.bf16.mxu0 %vm10086_vm10, %v9786_v24 }
 0x89b   : > { %v6130_v41 = vpop.f32.mrb[52].mxu0 }
 0x89c   : > { %v3361_v4 = vpop.f32.mrb[53].mxu0 }
 0x89d   : > { %v9071_v31 = vpop.f32.mrb[54].mxu0 }
 0x89e   : > { %v9073_v30 = vpop.f32.mrb[55].mxu0 }
 0x8a0   : > { %6237 = vmatmul.mubr.msk.bf16.gmra.mrb[160].mxu0 %vm10087_vm5, %v9786_v24 }
 0x8a1   : > { %6240 = vmatprep.mubr.msk.bf16.mxu0 %vm10088_vm1, %v9786_v24 }
 0x8a3   : > { %v9081_v62 = vpop.f32.mrb[56].mxu0 }
 0x8a4   : > { %v9083_v28 = vpop.f32.mrb[57].mxu0 }
 0x8a5   : > { %v9085_v56 = vpop.f32.mrb[58].mxu0 }
 0x8a6   : > { %v9087_v10 = vpop.f32.mrb[59].mxu0 }
 0x8a8   : > { %6241 = vmatmul.mubr.msk.bf16.gmra.mrb[164].mxu0 %vm10089_vm2, %v9786_v24 }
 0x8a9   : > { %6244 = vmatprep.mubr.msk.bf16.mxu0 %vm8657_vm0, %v9786_v24  ;;  %vm10091_vm0 = vnez %v9959_v32 }
 0x8ab   : > { %v9095_v49 = vpop.f32.mrb[60].mxu0 }
 0x8ac   : > { %v9097_v42 = vpop.f32.mrb[61].mxu0 }
 0x8ad   : > { %v9099_v25 = vpop.f32.mrb[62].mxu0 }
 0x8ae   : > { %v9101_v22 = vpop.f32.mrb[63].mxu0 }
 0x8b0   : > { %6245 = vmatmul.mubr.msk.bf16.gmra.mrb[168].mxu0 %vm10090_vm14, %v9786_v24 }
 0x8b1   : > { %6248 = vmatprep.mubr.msk.bf16.mxu0 %vm8675_vm11, %v9786_v24 }
 0x8b3   : > { %v6142_v39 = vpop.f32.mrb[64].mxu0 }
 0x8b4   : > { %v3858_v53 = vmax.f32 %v6126_v7, %v6142_v39  ;;  %v3409_v47 = vpop.f32.mrb[65].mxu0 }
 0x8b5   : > { %v3856_v57 = vmax.f32 %v3345_v33, %v3409_v47  ;;  %v6143_v21 = vpop.f32.mrb[66].mxu0 }
 0x8b6   : > { %v3859_v50 = vmax.f32 %v6127_v46, %v6143_v21  ;;  %v3412_v29 = vpop.f32.mrb[67].mxu0 }
 0x8b7   : > { %v3857_v52 = vmax.f32 %v3348_v44, %v3412_v29 }
 0x8b8   : > { %6249 = vmatmul.mubr.msk.bf16.gmra.mrb[172].mxu0 %vm10091_vm0, %v9786_v24 }
 0x8bb   : > { %v6146_v5 = vpop.f32.mrb[68].mxu0 }
 0x8bc   : > { %v3862_v36 = vmax.f32 %v6130_v41, %v6146_v5  ;;  %v3425_v14 = vpop.f32.mrb[69].mxu0 }
 0x8bd   : > { %v3860_v19 = vmax.f32 %v3361_v4, %v3425_v14  ;;  %v6147_v63 = vpop.f32.mrb[70].mxu0 }
 0x8be   : > { %v3863_v17 = vmax.f32 %v9071_v31, %v6147_v63  ;;  %v3428_v38 = vpop.f32.mrb[71].mxu0 }
 0x8bf   : > { %v3861_v34 = vmax.f32 %v9073_v30, %v3428_v38 }
 0x8c3   : > { %v6150_v59 = vpop.f32.mrb[72].mxu0 }
 0x8c4   : > { %v3866_v13 = vmax.f32 %v9081_v62, %v6150_v59  ;;  %v3441_v35 = vpop.f32.mrb[73].mxu0 }
 0x8c5   : > { %v3864_v12 = vmax.f32 %v9083_v28, %v3441_v35  ;;  %v6151_v11 = vpop.f32.mrb[74].mxu0 }
 0x8c6   : > { %v3867_v32 = vmax.f32 %v9085_v56, %v6151_v11  ;;  %v3444_v24 = vpop.f32.mrb[75].mxu0 }
 0x8c7   : > { %v3865_v18 = vmax.f32 %v9087_v10, %v3444_v24 }
 0x8cb   : > { %v6154_v58 = vpop.f32.mrb[76].mxu0 }
 0x8cc   : > { %v3870_v3 = vmax.f32 %v9095_v49, %v6154_v58  ;;  %v3457_v15 = vpop.f32.mrb[77].mxu0 }
 0x8cd   : > { %v3868_v1 = vmax.f32 %v9097_v42, %v3457_v15  ;;  %v6155_v55 = vpop.f32.mrb[78].mxu0 }
 0x8ce   : > { %v3871_v40 = vmax.f32 %v9099_v25, %v6155_v55  ;;  %v3460_v9 = vpop.f32.mrb[79].mxu0 }
 0x8cf   : > { %v3869_v7 = vmax.f32 %v9101_v22, %v3460_v9 }
 0x8d3   : > { %v6158_v33 = vpop.f32.mrb[80].mxu0 }
 0x8d4   : > { %v9122_v46 = vmax.f32 %v3858_v53, %v6158_v33  ;;  %v3473_v44 = vpop.f32.mrb[81].mxu0 }
 0x8d5   : > { %v9124_v23 = vmax.f32 %v3856_v57, %v3473_v44  ;;  %v6159_v41 = vpop.f32.mrb[82].mxu0 }
 0x8d6   : > { %v9126_v4 = vmax.f32 %v3859_v50, %v6159_v41  ;;  %v3476_v31 = vpop.f32.mrb[83].mxu0 }
 0x8d7   : > { %v9128_v30 = vmax.f32 %v3857_v52, %v3476_v31 }
 0x8db   : > { %v6162_v62 = vpop.f32.mrb[84].mxu0 }
 0x8dc   : > { %v9130_v28 = vmax.f32 %v3862_v36, %v6162_v62  ;;  %v3489_v56 = vpop.f32.mrb[85].mxu0 }
 0x8dd   : > { %v9132_v10 = vmax.f32 %v3860_v19, %v3489_v56  ;;  %v6163_v49 = vpop.f32.mrb[86].mxu0 }
 0x8de   : > { %v9134_v42 = vmax.f32 %v3863_v17, %v6163_v49  ;;  %v3492_v25 = vpop.f32.mrb[87].mxu0 }
 0x8df   : > { %v9136_v22 = vmax.f32 %v3861_v34, %v3492_v25 }
 0x8e3   : > { %v6166_v39 = vpop.f32.mrb[88].mxu0 }
 0x8e4   : > { %v9138_v53 = vmax.f32 %v3866_v13, %v6166_v39  ;;  %v3505_v47 = vpop.f32.mrb[89].mxu0 }
 0x8e5   : > { %v9140_v57 = vmax.f32 %v3864_v12, %v3505_v47  ;;  %v6167_v21 = vpop.f32.mrb[90].mxu0 }
 0x8e6   : > { %v9142_v50 = vmax.f32 %v3867_v32, %v6167_v21  ;;  %v3508_v29 = vpop.f32.mrb[91].mxu0 }
 0x8e7   : > { %v9144_v52 = vmax.f32 %v3865_v18, %v3508_v29 }
 0x8eb   : > { %v6170_v5 = vpop.f32.mrb[92].mxu0 }
 0x8ec   : > { %v9146_v36 = vmax.f32 %v3870_v3, %v6170_v5  ;;  %v3521_v14 = vpop.f32.mrb[93].mxu0  ;;  %v4284_v5 = vld [vmem:[%s9577_s10] sm:$0xff] }
 0x8ed   : > { %v9148_v19 = vmax.f32 %v3868_v1, %v3521_v14  ;;  %v6171_v63 = vpop.f32.mrb[94].mxu0 }
 0x8ee   : > { %v9150_v17 = vmax.f32 %v3871_v40, %v6171_v63  ;;  %v3524_v38 = vpop.f32.mrb[95].mxu0 }
 0x8ef   : > { %v9152_v34 = vmax.f32 %v3869_v7, %v3524_v38 }
 0x8f3   : > { %v6174_v59 = vpop.f32.mrb[96].mxu0 }
 0x8f4   : > { %v3890_v13 = vmax.f32 %v9122_v46, %v6174_v59  ;;  %v3537_v35 = vpop.f32.mrb[97].mxu0 }
 0x8f5   : > { %v3888_v12 = vmax.f32 %v9124_v23, %v3537_v35  ;;  %v6175_v11 = vpop.f32.mrb[98].mxu0 }
 0x8f6   : > { %v3891_v32 = vmax.f32 %v9126_v4, %v6175_v11  ;;  %v3540_v24 = vpop.f32.mrb[99].mxu0 }
 0x8f7   : > { %v3889_v18 = vmax.f32 %v9128_v30, %v3540_v24 }
 0x8fb   : > { %v6178_v58 = vpop.f32.mrb[100].mxu0 }
 0x8fc   : > { %v3894_v3 = vmax.f32 %v9130_v28, %v6178_v58  ;;  %v3553_v15 = vpop.f32.mrb[101].mxu0 }
 0x8fd   : > { %v3892_v1 = vmax.f32 %v9132_v10, %v3553_v15  ;;  %v6179_v55 = vpop.f32.mrb[102].mxu0 }
 0x8fe   : > { %v3895_v40 = vmax.f32 %v9134_v42, %v6179_v55  ;;  %v3556_v9 = vpop.f32.mrb[103].mxu0 }
 0x8ff   : > { %v3893_v7 = vmax.f32 %v9136_v22, %v3556_v9 }
 0x903   : > { %v6182_v33 = vpop.f32.mrb[104].mxu0 }
 0x904   : > { %v3898_v46 = vmax.f32 %v9138_v53, %v6182_v33  ;;  %v3569_v44 = vpop.f32.mrb[105].mxu0 }
 0x905   : > { %v3896_v23 = vmax.f32 %v9140_v57, %v3569_v44  ;;  %v6183_v41 = vpop.f32.mrb[106].mxu0 }
 0x906   : > { %v3899_v4 = vmax.f32 %v9142_v50, %v6183_v41  ;;  %v3572_v31 = vpop.f32.mrb[107].mxu0 }
 0x907   : > { %v3897_v30 = vmax.f32 %v9144_v52, %v3572_v31 }
 0x90b   : > { %v6186_v62 = vpop.f32.mrb[108].mxu0 }
 0x90c   : > { %v3902_v28 = vmax.f32 %v9146_v36, %v6186_v62  ;;  %v3585_v56 = vpop.f32.mrb[109].mxu0  ;;  %v4285_v36 = vld [vmem:[%s9577_s10 + $0x8] sm:$0xff] }
 0x90d   : > { %v3900_v10 = vmax.f32 %v9148_v19, %v3585_v56  ;;  %v6187_v49 = vpop.f32.mrb[110].mxu0  ;;  %v9184_v19 = vpack.c.bf16 %v4285_v36, %v4284_v5 }
 0x90e   : > { %v3903_v42 = vmax.f32 %v9150_v17, %v6187_v49  ;;  %v3588_v25 = vpop.f32.mrb[111].mxu0 }
 0x90f   : > { %v3901_v22 = vmax.f32 %v9152_v34, %v3588_v25  ;;  %6445 = vmatprep.subr.bf16.mxu1 %v9184_v19 }
 0x913   : > { %v6190_v39 = vpop.f32.mrb[112].mxu0 }
 0x914   : > { %v9170_v53 = vmax.f32 %v3890_v13, %v6190_v39  ;;  %v3601_v47 = vpop.f32.mrb[113].mxu0 }
 0x915   : > { %v9172_v57 = vmax.f32 %v3888_v12, %v3601_v47  ;;  %v6191_v21 = vpop.f32.mrb[114].mxu0 }
 0x916   : > { %v9174_v50 = vmax.f32 %v3891_v32, %v6191_v21  ;;  %v3604_v29 = vpop.f32.mrb[115].mxu0 }
 0x917   : > { %v9176_v52 = vmax.f32 %v3889_v18, %v3604_v29 }
 0x91b   : > { %v6194_v14 = vpop.f32.mrb[116].mxu0 }
 0x91c   : > { %v9186_v63 = vmax.f32 %v3894_v3, %v6194_v14  ;;  %v3617_v17 = vpop.f32.mrb[117].mxu0 }
 0x91d   : > { %v9188_v38 = vmax.f32 %v3892_v1, %v3617_v17  ;;  %v6195_v34 = vpop.f32.mrb[118].mxu0 }
 0x91e   : > { %v9191_v59 = vmax.f32 %v3895_v40, %v6195_v34  ;;  %v3620_v13 = vpop.f32.mrb[119].mxu0 }
 0x91f   : > { %v9193_v35 = vmax.f32 %v3893_v7, %v3620_v13 }
 0x923   : > { %v6198_v12 = vpop.f32.mrb[120].mxu0 }
 0x924   : > { %v9195_v11 = vmax.f32 %v3898_v46, %v6198_v12  ;;  %v3633_v32 = vpop.f32.mrb[121].mxu0 }
 0x925   : > { %v9197_v24 = vmax.f32 %v3896_v23, %v3633_v32  ;;  %v6199_v18 = vpop.f32.mrb[122].mxu0 }
 0x926   : > { %v9199_v58 = vmax.f32 %v3899_v4, %v6199_v18  ;;  %v3636_v3 = vpop.f32.mrb[123].mxu0 }
 0x927   : > { %v9201_v15 = vmax.f32 %v3897_v30, %v3636_v3 }
 0x92b   : > { %v6202_v1 = vpop.f32.mrb[124].mxu0 }
 0x92c   : > { %v9203_v55 = vmax.f32 %v3902_v28, %v6202_v1  ;;  %v3649_v40 = vpop.f32.mrb[125].mxu0 }
 0x92d   : > { %v9205_v9 = vmax.f32 %v3900_v10, %v3649_v40  ;;  %v6203_v7 = vpop.f32.mrb[126].mxu0 }
 0x92e   : > { %v9207_v33 = vmax.f32 %v3903_v42, %v6203_v7  ;;  %v3652_v46 = vpop.f32.mrb[127].mxu0 }
 0x92f   : > { %v9209_v44 = vmax.f32 %v3901_v22, %v3652_v46 }
 0x933   : > { %v6206_v23 = vpop.f32.mrb[128].mxu0 }
 0x934   : > { %v3922_v41 = vmax.f32 %v9170_v53, %v6206_v23  ;;  %v3665_v4 = vpop.f32.mrb[129].mxu0 }
 0x935   : > { %v3920_v31 = vmax.f32 %v9172_v57, %v3665_v4  ;;  %v6207_v30 = vpop.f32.mrb[130].mxu0 }
 0x936   : > { %v3923_v62 = vmax.f32 %v9174_v50, %v6207_v30  ;;  %v3668_v28 = vpop.f32.mrb[131].mxu0 }
 0x937   : > { %v3921_v56 = vmax.f32 %v9176_v52, %v3668_v28 }
 0x93b   : > { %v6210_v10 = vpop.f32.mrb[132].mxu0 }
 0x93c   : > { %v3926_v49 = vmax.f32 %v9186_v63, %v6210_v10  ;;  %v3681_v42 = vpop.f32.mrb[133].mxu0 }
 0x93d   : > { %v3924_v25 = vmax.f32 %v9188_v38, %v3681_v42  ;;  %v6211_v22 = vpop.f32.mrb[134].mxu0 }
 0x93e   : > { %v3927_v39 = vmax.f32 %v9191_v59, %v6211_v22  ;;  %v3684_v47 = vpop.f32.mrb[135].mxu0 }
 0x93f   : > { %v3925_v53 = vmax.f32 %v9193_v35, %v3684_v47 }
 0x943   : > { %v6214_v21 = vpop.f32.mrb[136].mxu0 }
 0x944   : > { %v3930_v57 = vmax.f32 %v9195_v11, %v6214_v21  ;;  %v3697_v29 = vpop.f32.mrb[137].mxu0 }
 0x945   : > { %v3928_v50 = vmax.f32 %v9197_v24, %v3697_v29  ;;  %v6215_v5 = vpop.f32.mrb[138].mxu0 }
 0x946   : > { %v3931_v52 = vmax.f32 %v9199_v58, %v6215_v5  ;;  %v3700_v36 = vpop.f32.mrb[139].mxu0 }
 0x947   : > { %v3929_v14 = vmax.f32 %v9201_v15, %v3700_v36 }
 0x94b   : > { %v6218_v63 = vpop.f32.mrb[140].mxu0 }
 0x94c   : > { %v3934_v17 = vmax.f32 %v9203_v55, %v6218_v63  ;;  %v3713_v38 = vpop.f32.mrb[141].mxu0 }
 0x94d   : > { %v3932_v34 = vmax.f32 %v9205_v9, %v3713_v38  ;;  %v6219_v59 = vpop.f32.mrb[142].mxu0 }
 0x94e   : > { %v3935_v13 = vmax.f32 %v9207_v33, %v6219_v59  ;;  %v3716_v35 = vpop.f32.mrb[143].mxu0 }
 0x94f   : > { %v3933_v12 = vmax.f32 %v9209_v44, %v3716_v35 }
 0x953   : > { %v6222_v11 = vpop.f32.mrb[144].mxu0 }
 0x954   : > { %v3938_v32 = vmax.f32 %v3922_v41, %v6222_v11  ;;  %v3729_v24 = vpop.f32.mrb[145].mxu0 }
 0x955   : > { %v3936_v18 = vmax.f32 %v3920_v31, %v3729_v24  ;;  %v6223_v58 = vpop.f32.mrb[146].mxu0 }
 0x956   : > { %v3939_v3 = vmax.f32 %v3923_v62, %v6223_v58  ;;  %v3732_v1 = vpop.f32.mrb[147].mxu0 }
 0x957   : > { %v3937_v15 = vmax.f32 %v3921_v56, %v3732_v1 }
 0x95b   : > { %v6226_v40 = vpop.f32.mrb[148].mxu0 }
 0x95c   : > { %v3942_v7 = vmax.f32 %v3926_v49, %v6226_v40  ;;  %v3745_v55 = vpop.f32.mrb[149].mxu0 }
 0x95d   : > { %v9227_v46 = vmax.f32 %v3924_v25, %v3745_v55  ;;  %v6227_v9 = vpop.f32.mrb[150].mxu0 }
 0x95e   : > { %v9229_v23 = vmax.f32 %v3927_v39, %v6227_v9  ;;  %v3748_v33 = vpop.f32.mrb[151].mxu0 }
 0x95f   : > { %v9231_v4 = vmax.f32 %v3925_v53, %v3748_v33 }
 0x963   : > { %v6230_v44 = vpop.f32.mrb[152].mxu0 }
 0x964   : > { %v9233_v30 = vmax.f32 %v3930_v57, %v6230_v44  ;;  %v3761_v41 = vpop.f32.mrb[153].mxu0  ;;  %v9252_v57 = vld [vmem:[%s9574_s7] ss:$0 sm:$0xff] }
 0x965   : > { %v9235_v31 = vmax.f32 %v3928_v50, %v3761_v41  ;;  %v6231_v62 = vpop.f32.mrb[154].mxu0  ;;  %v3289_v50 = vsub.f32 %v9252_v57, %v8786_v45  ;;  %v3287_v36 = vsub.f32 %v9252_v57, %v8777_v48  ;;  %v4286_v48 = vld [vmem:[%s9577_s10 + $0x10] sm:$0xff]  ;;  %v3293_v1 = vsub.f32 %v9252_v57, %v8802_v26 }
 0x966   : > { %v9237_v28 = vmax.f32 %v3931_v52, %v6231_v62  ;;  %v3764_v56 = vpop.f32.mrb[155].mxu0  ;;  %v3294_v9 = vsub.f32 %v9252_v57, %v8800_v20 }
 0x967   : > { %v9239_v10 = vmax.f32 %v3929_v14, %v3764_v56 }
 0x96b   : > { %v6234_v49 = vpop.f32.mrb[156].mxu0 }
 0x96c   : > { %v9241_v42 = vmax.f32 %v3934_v17, %v6234_v49  ;;  %v3777_v25 = vpop.f32.mrb[157].mxu0  ;;  %v3290_v17 = vsub.f32 %v9252_v57, %v8779_v54  ;;  %v4287_v54 = vld [vmem:[%s9577_s10 + $0x18] sm:$0xff] }
 0x96d   : > { %v9243_v22 = vmax.f32 %v3932_v34, %v3777_v25  ;;  %v6235_v39 = vpop.f32.mrb[158].mxu0  ;;  %v6448_v55 = vpack.c.bf16 %v4287_v54, %v4286_v48 }
 0x96e   : > { %v9245_v47 = vmax.f32 %v3935_v13, %v6235_v39  ;;  %v3780_v53 = vpop.f32.mrb[159].mxu0  ;;  %v3288_v13 = vsub.f32 %v9252_v57, %v8775_v61  ;;  %v3291_v61 = vsub.f32 %v9252_v57, %v8796_v0 }
 0x96f   : > { %v9247_v21 = vmax.f32 %v3933_v12, %v3780_v53 }
 0x973   : > { %v6238_v29 = vpop.f32.mrb[160].mxu0 }
 0x974   : > { %v3954_v5 = vmax.f32 %v3938_v32, %v6238_v29  ;;  %v3793_v52 = vpop.f32.mrb[161].mxu0 }
 0x975   : > { %v3952_v14 = vmax.f32 %v3936_v18, %v3793_v52  ;;  %v6239_v63 = vpop.f32.mrb[162].mxu0 }
 0x976   : > { %v3970_v38 = vadd.f32 %v3954_v5, %v3289_v50  ;;  %v3955_v34 = vmax.f32 %v3939_v3, %v6239_v63  ;;  %v3796_v59 = vpop.f32.mrb[163].mxu0 }
 0x977   : > { %v3968_v35 = vadd.f32 %v3952_v14, %v3287_v36  ;;  %v3953_v12 = vmax.f32 %v3937_v15, %v3796_v59  ;;  %v3298_v14 = vsub.f32 %v9252_v57, %v8811_v6 }
 0x978   : > { %v3971_v11 = vadd.f32 %v3955_v34, %v3290_v17  ;;  %v4002_v24 = vmul.f32 0.1, %v3970_v38  ;;  %vm3986_vm9 = vcmp.ge.f32.partialorder %v3970_v38, 0.0 }
 0x979   : > { %v4000_v45 = vmul.f32 0.1, %v3968_v35  ;;  %v3969_v32 = vadd.f32 %v3953_v12, %v3288_v13  ;;  %vm3984_vm11 = vcmp.ge.f32.partialorder %v3968_v35, 0.0 }
 0x97a   : > { %v4003_v33 = vmul.f32 0.1, %v3971_v11  ;;  %v4018_v26 = vsel %vm3986_vm9, %v3970_v38, %v4002_v24  ;;  %vm3987_vm12 = vcmp.ge.f32.partialorder %v3971_v11, 0.0 }
 0x97b   : > { %vm3985_vm6 = vcmp.ge.f32.partialorder %v3969_v32, 0.0  ;;  %v4001_v18 = vmul.f32 0.1, %v3969_v32  ;;  %v6242_v58 = vpop.f32.mrb[164].mxu0  ;;  %v4016_v3 = vsel %vm3984_vm11, %v3968_v35, %v4000_v45 }
 0x97c   : > { %v3958_v15 = vmax.f32 %v3942_v7, %v6242_v58  ;;  %v3809_v40 = vpop.f32.mrb[165].mxu0  ;;  %6260 = vmatprep.mubr.msk.f32.mxu1 %vm3070_vm7, %v4016_v3  ;;  %v3292_v7 = vsub.f32 %v9252_v57, %v8792_v2  ;;  %v4019_v53 = vsel %vm3987_vm12, %v3971_v11, %v4003_v33  ;;  %v3295_v2 = vsub.f32 %v9252_v57, %v8808_v51 }
 0x97d   : > { %v4017_v44 = vsel %vm3985_vm6, %v3969_v32, %v4001_v18  ;;  %v3956_v41 = vmax.f32 %v9227_v46, %v3809_v40  ;;  %v6243_v62 = vpop.f32.mrb[166].mxu0  ;;  %v3302_v58 = vsub.f32 %v9252_v57, %v8832_v27 }
 0x97e   : > { %v3974_v56 = vadd.f32 %v3958_v15, %v3293_v1  ;;  %v3959_v49 = vmax.f32 %v9229_v23, %v6243_v62  ;;  %v3812_v0 = vpop.f32.mrb[167].mxu0  ;;  %6261 = vmatmul.mubr.msk.f32.vlgmr.msra.gmra.mrb[160].mxu1 %vm3070_vm7, %v4017_v44 }
 0x97f   : > { %v3972_v25 = vadd.f32 %v3956_v41, %v3291_v61  ;;  %v3957_v20 = vmax.f32 %v9231_v4, %v3812_v0  ;;  %6263 = vmatprep.mubr.msk.f32.mxu1 %vm3070_vm7, %v4018_v26  ;;  %6447 = vmatpush3.bf16.msra.mxu1 %v9184_v19  ;;  %v3297_v19 = vsub.f32 %v9252_v57, %v8814_v43  ;;  %v4552_v0 = vld [vmem:[%s9579_s12] sm:$0xff]  ;;  %v4553_v26 = vld [vmem:[%s9579_s12 + $0x8] sm:$0xff] }
 0x980   : > { %v3975_v46 = vadd.f32 %v3959_v49, %v3294_v9  ;;  %6449 = vmatprep.subr.bf16.mxu1 %v6448_v55  ;;  %v4006_v29 = vmul.f32 0.1, %v3974_v56  ;;  %vm3990_vm8 = vcmp.ge.f32.partialorder %v3974_v56, 0.0 }
 0x981   : > { %v4004_v39 = vmul.f32 0.1, %v3972_v25  ;;  %v3973_v23 = vadd.f32 %v3957_v20, %v3292_v7  ;;  %vm3988_vm15 = vcmp.ge.f32.partialorder %v3972_v25, 0.0  ;;  %v6452_v7 = vpack.c.bf16 %v4553_v26, %v4552_v0 }
 0x982   : > { %6264 = vmatmul.mubr.msk.f32.gmra.mrb[162].mxu1 %vm3070_vm7, %v4019_v53  ;;  %v4007_v63 = vmul.f32 0.1, %v3975_v46  ;;  %v4022_v43 = vsel %vm3990_vm8, %v3974_v56, %v4006_v29  ;;  %vm3991_vm13 = vcmp.ge.f32.partialorder %v3975_v46, 0.0  ;;  %v4554_v29 = vld [vmem:[%s9579_s12 + $0x10] sm:$0xff] }
 0x983   : > { %v4005_v50 = vmul.f32 0.1, %v3973_v23  ;;  %v6246_v5 = vpop.f32.mrb[168].mxu0  ;;  %v4020_v52 = vsel %vm3988_vm15, %v3972_v25, %v4004_v39  ;;  %vm3989_vm4 = vcmp.ge.f32.partialorder %v3973_v23, 0.0  ;;  %6451 = vmatpush3.bf16.msra.mxu1 %v6448_v55  ;;  %v9331_v25 = vld [vmem:[%s9576_s9] ss:$0 sm:$0xff] }
 0x984   : > { %v3962_v4 = vmax.f32 %v9233_v30, %v6246_v5  ;;  %v3825_v36 = vpop.f32.mrb[169].mxu0  ;;  %6266 = vmatprep.mubr.msk.f32.mxu1 %vm3070_vm7, %v4020_v52  ;;  %v3296_v30 = vsub.f32 %v9252_v57, %v8805_v60  ;;  %v4023_v45 = vsel %vm3991_vm13, %v3975_v46, %v4007_v63  ;;  %v3299_v60 = vsub.f32 %v9252_v57, %v8827_v16 }
 0x985   : > { %v3960_v17 = vmax.f32 %v9235_v31, %v3825_v36  ;;  %v6247_v38 = vpop.f32.mrb[170].mxu0  ;;  %v4021_v34 = vsel %vm3989_vm4, %v3973_v23, %v4005_v50  ;;  %6453 = vmatprep.subr.bf16.mxu1 %v6452_v7  ;;  %v4555_v50 = vld [vmem:[%s9579_s12 + $0x18] sm:$0xff] }
 0x986   : > { %v3978_v59 = vadd.f32 %v3962_v4, %v3297_v19  ;;  %v3963_v13 = vmax.f32 %v9237_v28, %v6247_v38  ;;  %v3828_v51 = vpop.f32.mrb[171].mxu0  ;;  %6267 = vmatmul.mubr.msk.f32.gmra.mrb[164].mxu1 %vm3070_vm7, %v4021_v34  ;;  %v4556_v38 = vld [vmem:[%s9579_s12 + $0x20] sm:$0xff]  ;;  %v4557_v34 = vld [vmem:[%s9579_s12 + $0x28] sm:$0xff] }
 0x987   : > { %v3976_v35 = vadd.f32 %v3960_v17, %v3295_v2  ;;  %v3961_v6 = vmax.f32 %v9239_v10, %v3828_v51  ;;  %6269 = vmatprep.mubr.msk.f32.mxu1 %vm3070_vm7, %v4022_v43  ;;  %v3301_v10 = vsub.f32 %v9252_v57, %v8834_v8 }
 0x988   : > { %v3979_v31 = vadd.f32 %v3963_v13, %v3298_v14  ;;  %v4010_v28 = vmul.f32 0.1, %v3978_v59  ;;  %vm3994_vm5 = vcmp.ge.f32.partialorder %v3978_v59, 0.0  ;;  %v6456_v14 = vpack.c.bf16 %v4555_v50, %v4554_v29 }
 0x989   : > { %v4008_v12 = vmul.f32 0.1, %v3976_v35  ;;  %v3977_v11 = vadd.f32 %v3961_v6, %v3296_v30  ;;  %vm3992_vm3 = vcmp.ge.f32.partialorder %v3976_v35, 0.0  ;;  %v6460_v6 = vpack.c.bf16 %v4557_v34, %v4556_v38  ;;  %v4565_v38 = vld [vmem:[%s9579_s12 + $0x68] sm:$0xff] }
 0x98a   : > { %6270 = vmatmul.mubr.msk.f32.gmra.mrb[166].mxu1 %vm3070_vm7, %v4023_v45  ;;  %v4011_v3 = vmul.f32 0.1, %v3979_v31  ;;  %v4026_v8 = vsel %vm3994_vm5, %v3978_v59, %v4010_v28  ;;  %vm3995_vm1 = vcmp.ge.f32.partialorder %v3979_v31, 0.0  ;;  %v4559_v45 = vld [vmem:[%s9579_s12 + $0x38] sm:$0xff] }
 0x98b   : > { %v4009_v32 = vmul.f32 0.1, %v3977_v11  ;;  %v6250_v48 = vpop.f32.mrb[172].mxu0  ;;  %v4024_v54 = vsel %vm3992_vm3, %v3976_v35, %v4008_v12  ;;  %vm3993_vm10 = vcmp.ge.f32.partialorder %v3977_v11, 0.0 }
 0x98c   : > { %v3966_v24 = vmax.f32 %v9241_v42, %v6250_v48  ;;  %v3841_v18 = vpop.f32.mrb[173].mxu0  ;;  %6272 = vmatprep.mubr.msk.f32.mxu1 %vm3070_vm7, %v4024_v54  ;;  %v3300_v42 = vsub.f32 %v9252_v57, %v8822_v37  ;;  %v4027_v41 = vsel %vm3995_vm1, %v3979_v31, %v4011_v3  ;;  %v4560_v3 = vld [vmem:[%s9579_s12 + $0x40] sm:$0xff] }
 0x98d   : > { %v3964_v61 = vmax.f32 %v9243_v22, %v3841_v18  ;;  %v6251_v1 = vpop.f32.mrb[174].mxu0  ;;  %v4025_v15 = vsel %vm3993_vm10, %v3977_v11, %v4009_v32  ;;  %v4558_v11 = vld [vmem:[%s9579_s12 + $0x30] sm:$0xff] }
 0x98e   : > { %v3982_v40 = vadd.f32 %v3966_v24, %v3301_v10  ;;  %v3967_v55 = vmax.f32 %v9245_v47, %v6251_v1  ;;  %v3844_v16 = vpop.f32.mrb[175].mxu0  ;;  %6273 = vmatmul.mubr.msk.f32.gmra.mrb[168].mxu1 %vm3070_vm7, %v4025_v15  ;;  %v6464_v24 = vpack.c.bf16 %v4559_v45, %v4558_v11 }
 0x98f   : > { %v3980_v9 = vadd.f32 %v3964_v61, %v3299_v60  ;;  %v3965_v33 = vmax.f32 %v9247_v21, %v3844_v16  ;;  %6275 = vmatprep.mubr.msk.f32.mxu1 %vm3070_vm7, %v4026_v8  ;;  %v4561_v61 = vld [vmem:[%s9579_s12 + $0x48] sm:$0xff] }
 0x990   : > { %v3983_v27 = vadd.f32 %v3967_v55, %v3302_v58  ;;  %v4014_v62 = vmul.f32 0.1, %v3982_v40  ;;  %vm3998_vm0 = vcmp.ge.f32.partialorder %v3982_v40, 0.0 }
 0x991   : > { %v4012_v22 = vmul.f32 0.1, %v3980_v9  ;;  %v3981_v44 = vadd.f32 %v3965_v33, %v3300_v42  ;;  %vm3996_vm2 = vcmp.ge.f32.partialorder %v3980_v9, 0.0  ;;  %v6468_v42 = vpack.c.bf16 %v4561_v61, %v4560_v3 }
 0x992   : > { %6276 = vmatmul.mubr.msk.f32.gmra.mrb[170].mxu1 %vm3070_vm7, %v4027_v41  ;;  %v4015_v37 = vmul.f32 0.1, %v3983_v27  ;;  %v4030_v21 = vsel %vm3998_vm0, %v3982_v40, %v4014_v62  ;;  %vm3999_vm11 = vcmp.ge.f32.partialorder %v3983_v27, 0.0 }
 0x993   : > { %v4013_v47 = vmul.f32 0.1, %v3981_v44  ;;  %v4028_v56 = vsel %vm3996_vm2, %v3980_v9, %v4012_v22  ;;  %vm3997_vm14 = vcmp.ge.f32.partialorder %v3981_v44, 0.0  ;;  %v4563_v22 = vld [vmem:[%s9579_s12 + $0x58] sm:$0xff] }
 0x994   : > { %6278 = vmatprep.mubr.msk.f32.mxu1 %vm3070_vm7, %v4028_v56  ;;  %v4031_v49 = vsel %vm3999_vm11, %v3983_v27, %v4015_v37  ;;  %v4562_v27 = vld [vmem:[%s9579_s12 + $0x50] sm:$0xff] }
 0x995   : > { %v4029_v57 = vsel %vm3997_vm14, %v3981_v44, %v4013_v47 }
 0x996   : > { %6279 = vmatmul.mubr.msk.f32.gmra.mrb[172].mxu1 %vm3070_vm7, %v4029_v57  ;;  %v6472_v57 = vpack.c.bf16 %v4563_v22, %v4562_v27 }
 0x997   : > { %6281 = vmatprep.mubr.msk.f32.mxu1 %vm3070_vm7, %v4030_v21 }
 0x99a   : > { %6282 = vmatmul.mubr.msk.f32.gmra.mrb[174].mxu1 %vm3070_vm7, %v4031_v49 }
 0xa51   : > { %v6262_v20 = vpop.f32.mrb[160].mxu1 }
 0xa52   : > { %v4163_v46 = vadd.f32 %v6262_v20, %v9331_v25  ;;  %v4157_v39 = vpop.f32.mrb[161].mxu1 }
 0xa53   : > { %v4158_v23 = vadd.f32 %v9331_v25, %v4157_v39 }
 0xa54   : > { %v4253_v53 = vmul.f32 0.1, %v4163_v46  ;;  %vm4237_vm6 = vcmp.ge.f32.partialorder %v4163_v46, 0.0 }
 0xa55   : > { %vm4236_vm9 = vcmp.ge.f32.partialorder %v4158_v23, 0.0  ;;  %v4252_v5 = vmul.f32 0.1, %v4158_v23  ;;  %v6265_v52 = vpop.f32.mrb[162].mxu1 }
 0xa56   : > { %v4173_v2 = vadd.f32 %v6265_v52, %v9331_v25  ;;  %v4167_v19 = vpop.f32.mrb[163].mxu1  ;;  %v4269_v63 = vsel %vm4237_vm6, %v4163_v46, %v4253_v53 }
 0xa57   : > { %v4168_v4 = vadd.f32 %v9331_v25, %v4167_v19  ;;  %v4268_v36 = vsel %vm4236_vm9, %v4158_v23, %v4252_v5 }
 0xa58   : > { %v4255_v17 = vmul.f32 0.1, %v4173_v2  ;;  %6292 = vmatprep.mubr.msk.f32.mxu1 %vm3070_vm7, %v4268_v36  ;;  %vm4239_vm12 = vcmp.ge.f32.partialorder %v4173_v2, 0.0 }
 0xa59   : > { %vm4238_vm15 = vcmp.ge.f32.partialorder %v4168_v4, 0.0  ;;  %v4254_v59 = vmul.f32 0.1, %v4168_v4  ;;  %v6268_v13 = vpop.f32.mrb[164].mxu1  ;;  %6293 = vmatmul.mubr.msk.f32.vlgmr.msra.gmra.mrb[176].mxu1 %vm3070_vm7, %v4269_v63 }
 0xa5a   : > { %v4183_v51 = vadd.f32 %v6268_v13, %v9331_v25  ;;  %v4177_v43 = vpop.f32.mrb[165].mxu1  ;;  %6455 = vmatpush3.bf16.msra.mxu1 %v6452_v7  ;;  %v4271_v12 = vsel %vm4239_vm12, %v4173_v2, %v4255_v17  ;;  %v4567_v13 = vld [vmem:[%s9579_s12 + $0x78] sm:$0xff] }
 0xa5b   : > { %v4178_v30 = vadd.f32 %v9331_v25, %v4177_v43  ;;  %v4270_v35 = vsel %vm4238_vm15, %v4168_v4, %v4254_v59  ;;  %6457 = vmatprep.subr.bf16.mxu1 %v6456_v14  ;;  %v4566_v59 = vld [vmem:[%s9579_s12 + $0x70] sm:$0xff]  ;;  %v9413_v43 = vld [vmem:[%s9578_s11] ss:$0 sm:$0xff] }
 0xa5c   : > { %v4257_v31 = vmul.f32 0.1, %v4183_v51  ;;  %6295 = vmatprep.mubr.msk.f32.mxu1 %vm3070_vm7, %v4270_v35  ;;  %vm4241_vm4 = vcmp.ge.f32.partialorder %v4183_v51, 0.0 }
 0xa5d   : > { %vm4240_vm8 = vcmp.ge.f32.partialorder %v4178_v30, 0.0  ;;  %v4256_v28 = vmul.f32 0.1, %v4178_v30  ;;  %v6271_v32 = vpop.f32.mrb[166].mxu1  ;;  %6296 = vmatmul.mubr.msk.f32.gmra.mrb[178].mxu1 %vm3070_vm7, %v4271_v12 }
 0xa5e   : > { %v4193_v48 = vadd.f32 %v6271_v32, %v9331_v25  ;;  %v4187_v54 = vpop.f32.mrb[167].mxu1  ;;  %6459 = vmatpush3.bf16.msra.mxu1 %v6456_v14  ;;  %v4273_v58 = vsel %vm4241_vm4, %v4183_v51, %v4257_v31  ;;  %v6480_v51 = vpack.c.bf16 %v4567_v13, %v4566_v59 }
 0xa5f   : > { %v4188_v60 = vadd.f32 %v9331_v25, %v4187_v54  ;;  %v4272_v10 = vsel %vm4240_vm8, %v4178_v30, %v4256_v28  ;;  %6461 = vmatprep.subr.bf16.mxu1 %v6460_v6 }
 0xa60   : > { %v4259_v18 = vmul.f32 0.1, %v4193_v48  ;;  %6298 = vmatprep.mubr.msk.f32.mxu1 %vm3070_vm7, %v4272_v10  ;;  %vm4243_vm13 = vcmp.ge.f32.partialorder %v4193_v48, 0.0 }
 0xa61   : > { %vm4242_vm3 = vcmp.ge.f32.partialorder %v4188_v60, 0.0  ;;  %v4258_v1 = vmul.f32 0.1, %v4188_v60  ;;  %v6274_v15 = vpop.f32.mrb[168].mxu1  ;;  %6299 = vmatmul.mubr.msk.f32.gmra.mrb[180].mxu1 %vm3070_vm7, %v4273_v58 }
 0xa62   : > { %v4203_v40 = vadd.f32 %v6274_v15, %v9331_v25  ;;  %v4197_v55 = vpop.f32.mrb[169].mxu1  ;;  %6463 = vmatpush3.bf16.msra.mxu1 %v6460_v6  ;;  %v4275_v33 = vsel %vm4243_vm13, %v4193_v48, %v4259_v18 }
 0xa63   : > { %v4198_v16 = vadd.f32 %v9331_v25, %v4197_v55  ;;  %v4274_v8 = vsel %vm4242_vm3, %v4188_v60, %v4258_v1  ;;  %6465 = vmatprep.subr.bf16.mxu1 %v6464_v24 }
 0xa64   : > { %v4261_v9 = vmul.f32 0.1, %v4203_v40  ;;  %6301 = vmatprep.mubr.msk.f32.mxu1 %vm3070_vm7, %v4274_v8  ;;  %vm4245_vm10 = vcmp.ge.f32.partialorder %v4203_v40, 0.0 }
 0xa65   : > { %vm4244_vm5 = vcmp.ge.f32.partialorder %v4198_v16, 0.0  ;;  %v4260_v44 = vmul.f32 0.1, %v4198_v16  ;;  %v6277_v41 = vpop.f32.mrb[170].mxu1  ;;  %6302 = vmatmul.mubr.msk.f32.gmra.mrb[182].mxu1 %vm3070_vm7, %v4275_v33 }
 0xa66   : > { %v4213_v62 = vadd.f32 %v6277_v41, %v9331_v25  ;;  %v4207_v47 = vpop.f32.mrb[171].mxu1  ;;  %6467 = vmatpush3.bf16.msra.mxu1 %v6464_v24  ;;  %v4277_v49 = vsel %vm4245_vm10, %v4203_v40, %v4261_v9 }
 0xa67   : > { %v4208_v56 = vadd.f32 %v9331_v25, %v4207_v47  ;;  %v4276_v37 = vsel %vm4244_vm5, %v4198_v16, %v4260_v44  ;;  %6469 = vmatprep.subr.bf16.mxu1 %v6468_v42 }
 0xa68   : > { %v4263_v21 = vmul.f32 0.1, %v4213_v62  ;;  %6304 = vmatprep.mubr.msk.f32.mxu1 %vm3070_vm7, %v4276_v37  ;;  %vm4247_vm1 = vcmp.ge.f32.partialorder %v4213_v62, 0.0 }
 0xa69   : > { %vm4246_vm2 = vcmp.ge.f32.partialorder %v4208_v56, 0.0  ;;  %v4262_v0 = vmul.f32 0.1, %v4208_v56  ;;  %v6280_v26 = vpop.f32.mrb[172].mxu1  ;;  %6305 = vmatmul.mubr.msk.f32.gmra.mrb[184].mxu1 %vm3070_vm7, %v4277_v49 }
 0xa6a   : > { %v4223_v7 = vadd.f32 %v6280_v26, %v9331_v25  ;;  %v4217_v20 = vpop.f32.mrb[173].mxu1  ;;  %6471 = vmatpush3.bf16.msra.mxu1 %v6468_v42  ;;  %v4279_v53 = vsel %vm4247_vm1, %v4213_v62, %v4263_v21 }
 0xa6b   : > { %v4218_v46 = vadd.f32 %v9331_v25, %v4217_v20  ;;  %v4278_v39 = vsel %vm4246_vm2, %v4208_v56, %v4262_v0  ;;  %6473 = vmatprep.subr.bf16.mxu1 %v6472_v57 }
 0xa6c   : > { %v4265_v23 = vmul.f32 0.1, %v4223_v7  ;;  %6307 = vmatprep.mubr.msk.f32.mxu1 %vm3070_vm7, %v4278_v39  ;;  %vm4249_vm14 = vcmp.ge.f32.partialorder %v4223_v7, 0.0 }
 0xa6d   : > { %vm4248_vm0 = vcmp.ge.f32.partialorder %v4218_v46, 0.0  ;;  %v4264_v29 = vmul.f32 0.1, %v4218_v46  ;;  %v6283_v50 = vpop.f32.mrb[174].mxu1  ;;  %6308 = vmatmul.mubr.msk.f32.gmra.mrb[186].mxu1 %vm3070_vm7, %v4279_v53 }
 0xa6e   : > { %v4233_v5 = vadd.f32 %v6283_v50, %v9331_v25  ;;  %v4227_v52 = vpop.f32.mrb[175].mxu1  ;;  %6475 = vmatpush3.bf16.msra.mxu1 %v6472_v57  ;;  %v4281_v36 = vsel %vm4249_vm14, %v4223_v7, %v4265_v23 }
 0xa6f   : > { %v4228_v2 = vadd.f32 %v9331_v25, %v4227_v52  ;;  %v4280_v19 = vsel %vm4248_vm0, %v4218_v46, %v4264_v29  ;;  %v4564_v25 = vld [vmem:[%s9579_s12 + $0x60] sm:$0xff] }
 0xa70   : > { %v4267_v4 = vmul.f32 0.1, %v4233_v5  ;;  %6310 = vmatprep.mubr.msk.f32.mxu1 %vm3070_vm7, %v4280_v19  ;;  %vm4251_vm11 = vcmp.ge.f32.partialorder %v4233_v5, 0.0  ;;  %v6476_v34 = vpack.c.bf16 %v4565_v38, %v4564_v25 }
 0xa71   : > { %vm4250_vm6 = vcmp.ge.f32.partialorder %v4228_v2, 0.0  ;;  %v4266_v14 = vmul.f32 0.1, %v4228_v2  ;;  %6311 = vmatmul.mubr.msk.f32.gmra.mrb[188].mxu1 %vm3070_vm7, %v4281_v36 }
 0xa72   : > { %v4283_v17 = vsel %vm4251_vm11, %v4233_v5, %v4267_v4  ;;  %6477 = vmatprep.subr.bf16.mxu1 %v6476_v34 }
 0xa73   : > { %v4282_v63 = vsel %vm4250_vm6, %v4228_v2, %v4266_v14  ;;  %6479 = vmatpush3.bf16.msra.mxu1 %v6476_v34 }
 0xa74   : > { %6313 = vmatprep.mubr.msk.f32.mxu1 %vm3070_vm7, %v4282_v63  ;;  %6481 = vmatprep.subr.bf16.mxu1 %v6480_v51 }
 0xa75   : > { %6314 = vmatmul.mubr.msk.f32.gmra.mrb[190].mxu1 %vm3070_vm7, %v4283_v17 }
 0xa77   : > { %6483 = vmatpush3.bf16.msra.mxu1 %v6480_v51 }
 0xb2c   : > { %v6294_v30 = vpop.f32.mrb[176].mxu1 }
 0xb2d   : > { %v4415_v35 = vadd.f32 %v6294_v30, %v9413_v43  ;;  %v4409_v6 = vpop.f32.mrb[177].mxu1 }
 0xb2e   : > { %v4410_v31 = vadd.f32 %v9413_v43, %v4409_v6 }
 0xb2f   : > { %vm4489_vm7 = vcmp.ge.f32.partialorder %v4415_v35, 0.0  ;;  %v4505_v12 = vmul.f32 0.1, %v4415_v35 }
 0xb30   : > { %v4504_v11 = vmul.f32 0.1, %v4410_v31  ;;  %v6297_v45 = vpop.f32.mrb[178].mxu1  ;;  %vm4488_vm9 = vcmp.ge.f32.partialorder %v4410_v31, 0.0 }
 0xb31   : > { %v4521_v28 = vsel %vm4489_vm7, %v4415_v35, %v4505_v12  ;;  %v4425_v32 = vadd.f32 %v6297_v45, %v9413_v43  ;;  %v4419_v48 = vpop.f32.mrb[179].mxu1 }
 0xb32   : > { %4537 = vst [vmem:[%s9421_s1 + $0x8] sm:$0xff] %v4521_v28  ;;  %v4420_v54 = vadd.f32 %v9413_v43, %v4419_v48  ;;  %v4520_v60 = vsel %vm4488_vm9, %v4410_v31, %v4504_v11 }
 0xb33   : > { %v4507_v10 = vmul.f32 0.1, %v4425_v32  ;;  %4536 = vst [vmem:[%s9421_s1] sm:$0xff] %v4520_v60  ;;  %6348 = vmatprep.mubr.f32.mxu1 %v4520_v60  ;;  %vm4491_vm12 = vcmp.ge.f32.partialorder %v4425_v32, 0.0 }
 0xb34   : > { %v4506_v24 = vmul.f32 0.1, %v4420_v54  ;;  %v6300_v18 = vpop.f32.mrb[180].mxu1  ;;  %6349 = vmatmul.mubr.f32.vlgmr.msra.gmra.mrb[192].mxu1 %v4521_v28  ;;  %vm4490_vm15 = vcmp.ge.f32.partialorder %v4420_v54, 0.0 }
 0xb35   : > { %v4435_v58 = vadd.f32 %v6300_v18, %v9413_v43  ;;  %v4429_v3 = vpop.f32.mrb[181].mxu1  ;;  %v4523_v61 = vsel %vm4491_vm12, %v4425_v32, %v4507_v10 }
 0xb36   : > { %v4430_v1 = vadd.f32 %v9413_v43, %v4429_v3  ;;  %v4522_v15 = vsel %vm4490_vm15, %v4420_v54, %v4506_v24  ;;  %4539 = vst [vmem:[%s9421_s1 + $0x18] sm:$0xff] %v4523_v61 }
 0xb37   : > { %v4509_v40 = vmul.f32 0.1, %v4435_v58  ;;  %4538 = vst [vmem:[%s9421_s1 + $0x10] sm:$0xff] %v4522_v15  ;;  %6351 = vmatprep.mubr.f32.mxu1 %v4522_v15  ;;  %vm4493_vm4 = vcmp.ge.f32.partialorder %v4435_v58, 0.0 }
 0xb38   : > { %v4508_v55 = vmul.f32 0.1, %v4430_v1  ;;  %v6303_v16 = vpop.f32.mrb[182].mxu1  ;;  %6352 = vmatmul.mubr.f32.gmra.mrb[194].mxu1 %v4523_v61  ;;  %vm4492_vm8 = vcmp.ge.f32.partialorder %v4430_v1, 0.0 }
 0xb39   : > { %v4445_v8 = vadd.f32 %v6303_v16, %v9413_v43  ;;  %v4439_v42 = vpop.f32.mrb[183].mxu1  ;;  %v4525_v9 = vsel %vm4493_vm4, %v4435_v58, %v4509_v40 }
 0xb3a   : > { %v4440_v33 = vadd.f32 %v9413_v43, %v4439_v42  ;;  %v4524_v27 = vsel %vm4492_vm8, %v4430_v1, %v4508_v55  ;;  %4541 = vst [vmem:[%s9421_s1 + $0x28] sm:$0xff] %v4525_v9 }
 0xb3b   : > { %v4511_v22 = vmul.f32 0.1, %v4445_v8  ;;  %4540 = vst [vmem:[%s9421_s1 + $0x20] sm:$0xff] %v4524_v27  ;;  %6354 = vmatprep.mubr.f32.mxu1 %v4524_v27  ;;  %vm4495_vm13 = vcmp.ge.f32.partialorder %v4445_v8, 0.0 }
 0xb3c   : > { %v4510_v44 = vmul.f32 0.1, %v4440_v33  ;;  %v6306_v41 = vpop.f32.mrb[184].mxu1  ;;  %6355 = vmatmul.mubr.f32.gmra.mrb[196].mxu1 %v4525_v9  ;;  %vm4494_vm3 = vcmp.ge.f32.partialorder %v4440_v33, 0.0 }
 0xb3d   : > { %v4455_v62 = vadd.f32 %v6306_v41, %v9413_v43  ;;  %v4449_v47 = vpop.f32.mrb[185].mxu1  ;;  %v4527_v56 = vsel %vm4495_vm13, %v4445_v8, %v4511_v22 }
 0xb3e   : > { %v4450_v37 = vadd.f32 %v9413_v43, %v4449_v47  ;;  %v4526_v57 = vsel %vm4494_vm3, %v4440_v33, %v4510_v44  ;;  %4543 = vst [vmem:[%s9421_s1 + $0x38] sm:$0xff] %v4527_v56 }
 0xb3f   : > { %v4513_v21 = vmul.f32 0.1, %v4455_v62  ;;  %4542 = vst [vmem:[%s9421_s1 + $0x30] sm:$0xff] %v4526_v57  ;;  %6357 = vmatprep.mubr.f32.mxu1 %v4526_v57  ;;  %vm4497_vm10 = vcmp.ge.f32.partialorder %v4455_v62, 0.0 }
 0xb40   : > { %v4512_v49 = vmul.f32 0.1, %v4450_v37  ;;  %v6309_v0 = vpop.f32.mrb[186].mxu1  ;;  %6358 = vmatmul.mubr.f32.gmra.mrb[198].mxu1 %v4527_v56  ;;  %vm4496_vm5 = vcmp.ge.f32.partialorder %v4450_v37, 0.0 }
 0xb41   : > { %v4465_v26 = vadd.f32 %v6309_v0, %v9413_v43  ;;  %v4459_v7 = vpop.f32.mrb[187].mxu1  ;;  %v4529_v20 = vsel %vm4497_vm10, %v4455_v62, %v4513_v21 }
 0xb42   : > { %v4460_v46 = vadd.f32 %v9413_v43, %v4459_v7  ;;  %v4528_v39 = vsel %vm4496_vm5, %v4450_v37, %v4512_v49  ;;  %4545 = vst [vmem:[%s9421_s1 + $0x48] sm:$0xff] %v4529_v20 }
 0xb43   : > { %v4515_v23 = vmul.f32 0.1, %v4465_v26  ;;  %4544 = vst [vmem:[%s9421_s1 + $0x40] sm:$0xff] %v4528_v39  ;;  %6360 = vmatprep.mubr.f32.mxu1 %v4528_v39  ;;  %vm4499_vm1 = vcmp.ge.f32.partialorder %v4465_v26, 0.0 }
 0xb44   : > { %v4514_v53 = vmul.f32 0.1, %v4460_v46  ;;  %v6312_v29 = vpop.f32.mrb[188].mxu1  ;;  %6361 = vmatmul.mubr.f32.gmra.mrb[200].mxu1 %v4529_v20  ;;  %vm4498_vm2 = vcmp.ge.f32.partialorder %v4460_v46, 0.0 }
 0xb45   : > { %v4475_v50 = vadd.f32 %v6312_v29, %v9413_v43  ;;  %v4469_v5 = vpop.f32.mrb[189].mxu1  ;;  %v4531_v52 = vsel %vm4499_vm1, %v4465_v26, %v4515_v23 }
 0xb46   : > { %v4470_v2 = vadd.f32 %v9413_v43, %v4469_v5  ;;  %v4530_v19 = vsel %vm4498_vm2, %v4460_v46, %v4514_v53  ;;  %4547 = vst [vmem:[%s9421_s1 + $0x58] sm:$0xff] %v4531_v52 }
 0xb47   : > { %v4517_v4 = vmul.f32 0.1, %v4475_v50  ;;  %4546 = vst [vmem:[%s9421_s1 + $0x50] sm:$0xff] %v4530_v19  ;;  %6363 = vmatprep.mubr.f32.mxu1 %v4530_v19  ;;  %vm4501_vm14 = vcmp.ge.f32.partialorder %v4475_v50, 0.0 }
 0xb48   : > { %v4516_v36 = vmul.f32 0.1, %v4470_v2  ;;  %v6315_v14 = vpop.f32.mrb[190].mxu1  ;;  %6364 = vmatmul.mubr.f32.gmra.mrb[202].mxu1 %v4531_v52  ;;  %vm4500_vm0 = vcmp.ge.f32.partialorder %v4470_v2, 0.0 }
 0xb49   : > { %v4485_v63 = vadd.f32 %v6315_v14, %v9413_v43  ;;  %v4479_v17 = vpop.f32.mrb[191].mxu1  ;;  %v4533_v25 = vsel %vm4501_vm14, %v4475_v50, %v4517_v4 }
 0xb4a   : > { %v4480_v38 = vadd.f32 %v9413_v43, %v4479_v17  ;;  %v4532_v34 = vsel %vm4500_vm0, %v4470_v2, %v4516_v36  ;;  %4549 = vst [vmem:[%s9421_s1 + $0x68] sm:$0xff] %v4533_v25 }
 0xb4b   : > { %v4519_v59 = vmul.f32 0.1, %v4485_v63  ;;  %4548 = vst [vmem:[%s9421_s1 + $0x60] sm:$0xff] %v4532_v34  ;;  %6366 = vmatprep.mubr.f32.mxu1 %v4532_v34  ;;  %vm4503_vm11 = vcmp.ge.f32.partialorder %v4485_v63, 0.0 }
 0xb4c   : > { %v4518_v13 = vmul.f32 0.1, %v4480_v38  ;;  %6367 = vmatmul.mubr.f32.gmra.mrb[204].mxu1 %v4533_v25  ;;  %vm4502_vm6 = vcmp.ge.f32.partialorder %v4480_v38, 0.0 }
 0xb4d   : > { %v4535_v51 = vsel %vm4503_vm11, %v4485_v63, %v4519_v59 }
 0xb4e   : > { %v4534_v30 = vsel %vm4502_vm6, %v4480_v38, %v4518_v13  ;;  %4551 = vst [vmem:[%s9421_s1 + $0x78] sm:$0xff] %v4535_v51 }
 0xb4f   : > { %4550 = vst [vmem:[%s9421_s1 + $0x70] sm:$0xff] %v4534_v30  ;;  %6369 = vmatprep.mubr.f32.mxu1 %v4534_v30  ;;  %s6552_s1 = scalar_lea.vmem %s6551_s4, 4096 }
 0xb50   : > { %6370 = vmatmul.mubr.f32.gmra.mrb[206].mxu1 %v4535_v51  ;;  %p6554_p1 = scmp.lt.s32.totalorder %s6552_s1, %s6546_s25 }
 0xb52   : > { %p6555_p2 = por %p6554_p1, %p6553_p0 }
 0xb54   : > { %p6556_p3 = pnand %p6555_p2, %p6549_p13 }
 0xb56   : > { %6559 = shalt.err (!%p6556_p3)
}
 0xb57   : > { %s6560_s2 = scalar_lea.hbm %s9459_s26, 2048  ;;  %s6564_s3 = scalar_lea.hbm %s9581_s14, 4096 }
 0xb58   : > { %p6561_p4 = scmp.ne.s32.totalorder %s9459_s26, %s6560_s2  ;;  %p6565_p9 = scmp.lt.u32.totalorder %s9459_s26, %s9581_s14 }
 0xb59   : > { %p6566_p10 = scmp.lt.u32.totalorder %s6564_s3, %s6560_s2  ;;  %p6568_p12 = scmp.lt.u32.totalorder %s6560_s2, %s9459_s26 }
 0xb5a   : > { %p6562_p7 = pnand %p6561_p4, %p6765_p5 }
 0xb5b   : > { %p6567_p11 = por %p6566_p10, %p6565_p9 }
 0xb5c   : > { %p6563_p8 = pneg %p6562_p7 }
 0xb5d   : > { %p6569_p13 = por %p6568_p12, %p6567_p11 }
 0xb5f   : > { %p6570_p0 = pnand %p6569_p13, %p6563_p8 }
 0xb61   : > { %6573 = shalt.err (!%p6570_p0)
}
 0xb62   : > { %s9706_s25 = smov 128   ;;  %s9707_s1 = smov 8   ;;  %v5438_v43 = vld [vmem:[%s9580_s13] ss:$0 sm:$0xff] }
 0xb63   : > { %s10092_s17 = scalar_lea.sflag [#allocation3], %s9408_s30  ;;  %s10093_s2 = sshll.u32 %s9408_s30, 7 }
 0xb64   : > { %6484 = dma.vmem_to_hbm [thread:$0]  (%p6765_p5), %s9461_s0, 2048, %s9459_s26, %s10092_s17, %s9706_s25, %s9706_s25, %s9707_s1  }
 0xb65   : > { %s9495_s3 = scalar_lea.vmem [#allocation4], %s10093_s2  ;;  %s10094_s26 = sshll.u32 %s6748_s22, 11 }
 0xb66   : > { %s4803_s0 = sshll.u32 %s9495_s3, 4  ;;  %s9517_s16 = scalar_lea.hbm %s9582_s15, %s10094_s26  ;;  %s9519_s0 = int_to_ptr.vmem [resolvable:$true] %s4803_s0 }
 0xb67   : > { %s4774_s23 = scalar_lea.sflag [#allocation5], %s9408_s30  ;;  %s6574_s2 = scalar_lea.vmem %s9519_s0, 2048 }
 0xb68   : > { %p6575_p1 = scmp.ne.s32.totalorder %s9519_s0, %s6574_s2  ;;  %s6646_s25 = smov [#allocation4]  }
 0xb69   : > { %s6578_s22 = sshll.u32 %s6646_s25, 4  ;;  %s6579_s22 = int_to_ptr.vmem [resolvable:$false] %s6578_s22 }
 0xb6a   : > { %p6576_p2 = pnand %p6575_p1, %p6765_p5  ;;  %s6580_s1 = scalar_lea.vmem %s6579_s22, 4096 }
 0xb6b   : > { %p6581_p4 = scmp.lt.s32.totalorder %s9519_s0, %s6579_s22  ;;  %p6582_p7 = scmp.lt.s32.totalorder %s6580_s1, %s6574_s2 }
 0xb6c   : > { %p6577_p3 = pneg %p6576_p2 }
 0xb6d   : > { %p6583_p8 = por %p6582_p7, %p6581_p4 }
 0xb6f   : > { %p6584_p9 = pnand %p6583_p8, %p6577_p3 }
 0xc07   : > { %v6350_v35 = vpop.f32.mrb[192].mxu1 }
 0xc08   : > { %v4647_v6 = vadd.f32 %v6350_v35, %v5438_v43  ;;  %v4641_v31 = vpop.f32.mrb[193].mxu1 }
 0xc09   : > { %v4642_v12 = vadd.f32 %v5438_v43, %v4641_v31 }
 0xc0a   : > { %v5440_v11 = vclamps-f32 %v4647_v6, 20.0 }
 0xc0b   : > { %v5439_v45 = vclamps-f32 %v4642_v12, 20.0  ;;  %v6353_v28 = vpop.f32.mrb[194].mxu1 }
 0xc0c   : > { %4753 = vst [vmem:[%s9495_s3 + $0x8] sm:$0xff] %v5440_v11  ;;  %v4657_v32 = vadd.f32 %v6353_v28, %v5438_v43  ;;  %v4651_v48 = vpop.f32.mrb[195].mxu1 }
 0xc0d   : > { %4752 = vst [vmem:[%s9495_s3] sm:$0xff] %v5439_v45  ;;  %v4652_v54 = vadd.f32 %v5438_v43, %v4651_v48 }
 0xc0e   : > { %v5442_v60 = vclamps-f32 %v4657_v32, 20.0 }
 0xc0f   : > { %v5441_v10 = vclamps-f32 %v4652_v54, 20.0  ;;  %v6356_v24 = vpop.f32.mrb[196].mxu1 }
 0xc10   : > { %4755 = vst [vmem:[%s9495_s3 + $0x18] sm:$0xff] %v5442_v60  ;;  %v4667_v18 = vadd.f32 %v6356_v24, %v5438_v43  ;;  %v4661_v58 = vpop.f32.mrb[197].mxu1 }
 0xc11   : > { %4754 = vst [vmem:[%s9495_s3 + $0x10] sm:$0xff] %v5441_v10  ;;  %v4662_v3 = vadd.f32 %v5438_v43, %v4661_v58 }
 0xc12   : > { %v5444_v61 = vclamps-f32 %v4667_v18, 20.0 }
 0xc13   : > { %v5443_v1 = vclamps-f32 %v4662_v3, 20.0  ;;  %v6359_v15 = vpop.f32.mrb[198].mxu1 }
 0xc14   : > { %4757 = vst [vmem:[%s9495_s3 + $0x28] sm:$0xff] %v5444_v61  ;;  %v4677_v40 = vadd.f32 %v6359_v15, %v5438_v43  ;;  %v4671_v55 = vpop.f32.mrb[199].mxu1 }
 0xc15   : > { %4756 = vst [vmem:[%s9495_s3 + $0x20] sm:$0xff] %v5443_v1  ;;  %v4672_v16 = vadd.f32 %v5438_v43, %v4671_v55 }
 0xc16   : > { %v5446_v8 = vclamps-f32 %v4677_v40, 20.0 }
 0xc17   : > { %v5445_v42 = vclamps-f32 %v4672_v16, 20.0  ;;  %v6362_v9 = vpop.f32.mrb[200].mxu1 }
 0xc18   : > { %4759 = vst [vmem:[%s9495_s3 + $0x38] sm:$0xff] %v5446_v8  ;;  %v4687_v33 = vadd.f32 %v6362_v9, %v5438_v43  ;;  %v4681_v27 = vpop.f32.mrb[201].mxu1 }
 0xc19   : > { %4758 = vst [vmem:[%s9495_s3 + $0x30] sm:$0xff] %v5445_v42  ;;  %v4682_v22 = vadd.f32 %v5438_v43, %v4681_v27 }
 0xc1a   : > { %v5448_v44 = vclamps-f32 %v4687_v33, 20.0 }
 0xc1b   : > { %v5447_v41 = vclamps-f32 %v4682_v22, 20.0  ;;  %v6365_v62 = vpop.f32.mrb[202].mxu1 }
 0xc1c   : > { %4761 = vst [vmem:[%s9495_s3 + $0x48] sm:$0xff] %v5448_v44  ;;  %v4697_v47 = vadd.f32 %v6365_v62, %v5438_v43  ;;  %v4691_v56 = vpop.f32.mrb[203].mxu1 }
 0xc1d   : > { %4760 = vst [vmem:[%s9495_s3 + $0x40] sm:$0xff] %v5447_v41  ;;  %v4692_v37 = vadd.f32 %v5438_v43, %v4691_v56 }
 0xc1e   : > { %v5450_v57 = vclamps-f32 %v4697_v47, 20.0 }
 0xc1f   : > { %v5449_v21 = vclamps-f32 %v4692_v37, 20.0  ;;  %v6368_v49 = vpop.f32.mrb[204].mxu1 }
 0xc20   : > { %4763 = vst [vmem:[%s9495_s3 + $0x58] sm:$0xff] %v5450_v57  ;;  %v4707_v0 = vadd.f32 %v6368_v49, %v5438_v43  ;;  %v4701_v26 = vpop.f32.mrb[205].mxu1 }
 0xc21   : > { %4762 = vst [vmem:[%s9495_s3 + $0x50] sm:$0xff] %v5449_v21  ;;  %v4702_v7 = vadd.f32 %v5438_v43, %v4701_v26 }
 0xc22   : > { %v5452_v20 = vclamps-f32 %v4707_v0, 20.0 }
 0xc23   : > { %v5451_v46 = vclamps-f32 %v4702_v7, 20.0  ;;  %v6371_v39 = vpop.f32.mrb[206].mxu1 }
 0xc24   : > { %4765 = vst [vmem:[%s9495_s3 + $0x68] sm:$0xff] %v5452_v20  ;;  %v4717_v23 = vadd.f32 %v6371_v39, %v5438_v43  ;;  %v4711_v53 = vpop.f32.mrb[207].mxu1 }
 0xc25   : > { %4764 = vst [vmem:[%s9495_s3 + $0x60] sm:$0xff] %v5451_v46  ;;  %v4712_v29 = vadd.f32 %v5438_v43, %v4711_v53 }
 0xc26   : > { %v5454_v50 = vclamps-f32 %v4717_v23, 20.0 }
 0xc27   : > { %v5453_v5 = vclamps-f32 %v4712_v29, 20.0 }
 0xc28   : > { %4767 = vst [vmem:[%s9495_s3 + $0x78] sm:$0xff] %v5454_v50 }
 0xc29   : > { %4766 = vst [vmem:[%s9495_s3 + $0x70] sm:$0xff] %v5453_v5 }
 0xc2a   : > { %6587 = shalt.err (!%p6584_p9)
}
 0xc2b   : > { %s6588_s3 = scalar_lea.hbm %s9517_s16, 2048  ;;  %s6592_s25 = scalar_lea.hbm %s9582_s15, 4096 }
 0xc2c   : > { %p6589_p10 = scmp.ne.s32.totalorder %s9517_s16, %s6588_s3  ;;  %p6593_p13 = scmp.lt.u32.totalorder %s9517_s16, %s9582_s15 }
 0xc2d   : > { %p6594_p0 = scmp.lt.u32.totalorder %s6592_s25, %s6588_s3  ;;  %p6596_p2 = scmp.lt.u32.totalorder %s6588_s3, %s9517_s16 }
 0xc2e   : > { %p6590_p11 = pnand %p6589_p10, %p6765_p5 }
 0xc2f   : > { %p6595_p1 = por %p6594_p0, %p6593_p13 }
 0xc30   : > { %p6591_p12 = pneg %p6590_p11 }
 0xc31   : > { %p6597_p3 = por %p6596_p2, %p6595_p1 }
 0xc33   : > { %p6598_p4 = pnand %p6597_p3, %p6591_p12 }
 0xc35   : > { %6601 = shalt.err (!%p6598_p4)
}
 0xc36   : > { %s10095_s1 = smov 8   ;;  %s10096_s2 = smov 128  }
 0xc37   : > { %6485 = dma.vmem_to_hbm [thread:$0]  (%p6765_p5), %s9519_s0, 2048, %s9517_s16, %s4774_s23, %s10096_s2, %s10096_s2, %s10095_s1  }
 0xc38 PF: > { %p6495_p7 = scmp.ge.s32.totalorder %s6640_s21, 2  ;;  %s4818_s26 = sand.u32 1, %s6628_s18  }
 0xc39   : > { %s4819_s3 = scalar_lea.sflag [#allocation3], %s4818_s26 }
 0xc3a   : > { %p6489_p8 = pnand %p6495_p7, %p6769_p6 }
 0xc3c   : > { %6619 = dma.done.wait (!%p6489_p8), %s4819_s3, 2048  }
 0xc3d   : > { %6621 = vsyncadd (!%p6489_p8), %s4819_s3, 4294965248  ;;  %s4828_s28 = scalar_lea.sflag [#allocation5], %s4818_s26 }
 0xc3e   : > { %6623 = dma.done.wait (!%p6489_p8), %s4828_s28, 2048  }
 0xc3f   : > { %6625 = vsyncadd (!%p6489_p8), %s4828_s28, 4294965248  ;;  %p29_p5 = scmp.ge.s32.totalorder %s6752_s24, 4   ;;  %s10097_s18 = smov %s6632_s19 }
 0xc40   : > { %s10098_s19 = smov %s6636_s20  ;;  %s10099_s20 = smov %s6763_s27 }
 0xc41   : > { %s10100_s21 = smov %s6752_s24  ;;  %31 = sbr.rel (!%p29_p5) target bundleno = 11 (0xb), region = 131 }
 0xc48   :  { %4833 = vsyncpa [#allocation3], 1 }
 0xc49   :  { %4835 = vsyncpa [#allocation3 + $0x1], 1 }
 0xc4a   :  { %4836 = vsyncpa [#allocation5], 1 }
 0xc4b   :  { %4838 = vsyncpa [#allocation5 + $0x1], 1 }

</bundles_post_ra>
